<compile_context>
chip_gen: v6e
topology: v6e:2x2x1
jax: 0.10.0
libtpu: 0.0.40
codegen_flags: <defaults>
</compile_context>

<pallas_src>
import functools
import math

import jax
import jax.numpy as jnp
from jax.experimental import pallas as pl
from jax.experimental.pallas import tpu as pltpu

LN_EPS = 1e-6
NEG_INF = -1e30  # finite "minus infinity" for max-pool padding


def conv_pool_kernel(x_ref, w_ref, b_ref, g_ref, beta_ref, o_ref, pad_scr,
                     *, H, W):
    """One batch image per grid step.

    x_ref   : (1, H+2, W+2, Cin)  zero-padded NHWC input (f32)
    w_ref   : (3, 3, Cin, Cout)   conv weight, HWIO, bf16
    b_ref   : (1, Cout)           conv bias   (f32)
    g_ref   : (1, Cout)           LN gamma    (f32)
    beta_ref: (1, Cout)           LN beta     (f32)
    o_ref   : (1, H//2, W//2, Cout)
    pad_scr : (H+2, W+2, Cout) f32 VMEM scratch (padded buffer for pooling)
    """
    Cin = x_ref.shape[-1]
    Cout = o_ref.shape[-1]
    H2, W2 = H // 2, W // 2

    # ---- 3x3 "same" conv as 9 shifted (H*W, Cin) @ (Cin, Cout) MXU matmuls --
    acc = None
    for kh in range(3):
        for kw in range(3):
            patch = x_ref[0, kh:kh + H, kw:kw + W, :]            # (H, W, Cin)
            patch = patch.reshape(H * W, Cin).astype(jnp.bfloat16)
            part = jnp.dot(patch, w_ref[kh, kw],
                           preferred_element_type=jnp.float32)   # (H*W, Cout)
            acc = part if acc is None else acc + part
    acc = acc + b_ref[...]

    # ---- LayerNorm over channels (f32 elementwise math) --------------------
    mu = jnp.mean(acc, axis=-1, keepdims=True)
    var = jnp.mean((acc - mu) ** 2, axis=-1, keepdims=True)
    yn = (acc - mu) * jax.lax.rsqrt(var + LN_EPS) * g_ref[...] + beta_ref[...]

    # ---- 3x3 / stride-2 / pad-1 max pool ------------------------------------
    # Padded copy in VMEM with -inf border, then 9 shifted window maxima.
    pad_scr[...] = jnp.full((H + 2, W + 2, Cout), NEG_INF, jnp.float32)
    pad_scr[1:H + 1, 1:W + 1, :] = yn.reshape(H, W, Cout)

    m = pad_scr[0:H, 0:W, :]
    for dh in range(3):
        for dw in range(3):
            if dh == 0 and dw == 0:
                continue
            m = jnp.maximum(m, pad_scr[dh:dh + H, dw:dw + W, :])

    # keep even rows (stride 2 along H) via a cheap leading-dim reshape
    m = m.reshape(H2, 2, W, Cout)[:, 0]                          # (H2, W, Cout)
    # keep even cols (stride 2 along W) via a strided sublane read from VMEM
    pad_scr[0:H2, 0:W, :] = m
    o_ref[0] = pad_scr[0:H2, pl.ds(0, W2, stride=2), :].astype(o_ref.dtype)


def conv_pool(x, conv_w, conv_b, ln_w, ln_b):
    """x: (B, Cin, H, W) NCHW like the PyTorch module. Returns NCHW output."""
    B, Cin, H, W = x.shape
    Cout = conv_w.shape[0]
    assert H % 2 == 0 and W % 2 == 0, "BlockAggregation requires even spatial"
    H2, W2 = H // 2, W // 2

    # NHWC + zero pad by 1 on each spatial side (conv 'same' padding).
    xp = jnp.pad(jnp.transpose(x, (0, 2, 3, 1)),
                 ((0, 0), (1, 1), (1, 1), (0, 0)))
    # OIHW -> HWIO; bf16 MXU inputs (f32 accumulation in-kernel).
    w = jnp.transpose(conv_w, (2, 3, 1, 0)).astype(jnp.bfloat16)
    b = conv_b.reshape(1, Cout).astype(jnp.float32)
    g = ln_w.reshape(1, Cout).astype(jnp.float32)
    beta = ln_b.reshape(1, Cout).astype(jnp.float32)

    kernel = functools.partial(conv_pool_kernel, H=H, W=W)
    out_nhwc = pl.pallas_call(
        kernel,
        out_shape=jax.ShapeDtypeStruct((B, H2, W2, Cout), x.dtype),
        grid=(B,),
        in_specs=[
            pl.BlockSpec((1, H + 2, W + 2, Cin), lambda bb: (bb, 0, 0, 0)),
            pl.BlockSpec((3, 3, Cin, Cout), lambda bb: (0, 0, 0, 0)),
            pl.BlockSpec((1, Cout), lambda bb: (0, 0)),
            pl.BlockSpec((1, Cout), lambda bb: (0, 0)),
            pl.BlockSpec((1, Cout), lambda bb: (0, 0)),
        ],
        out_specs=pl.BlockSpec((1, H2, W2, Cout), lambda bb: (bb, 0, 0, 0)),
        scratch_shapes=[pltpu.VMEM((H + 2, W + 2, Cout), jnp.float32)],
        compiler_params=pltpu.CompilerParams(
            dimension_semantics=("parallel",)),
    )(xp, w, b, g, beta)
    return jnp.transpose(out_nhwc, (0, 3, 1, 2))   # back to NCHW


def reference_forward(x, conv_w, conv_b, ln_w, ln_b):
    """Pure-JAX reproduction of the PyTorch ConvPool forward (f32)."""
    y = jax.lax.conv_general_dilated(
        x, conv_w, window_strides=(1, 1), padding=((1, 1), (1, 1)),
        dimension_numbers=("NCHW", "OIHW", "NCHW"),
        precision=jax.lax.Precision.HIGHEST)
    y = y + conv_b[None, :, None, None]
    yt = jnp.transpose(y, (0, 2, 3, 1))
    mu = yt.mean(-1, keepdims=True)
    var = ((yt - mu) ** 2).mean(-1, keepdims=True)
    yt = (yt - mu) / jnp.sqrt(var + LN_EPS) * ln_w + ln_b
    y = jnp.transpose(yt, (0, 3, 1, 2))
    y = jax.lax.reduce_window(
        y, -jnp.inf, jax.lax.max,
        window_dimensions=(1, 1, 3, 3), window_strides=(1, 1, 2, 2),
        padding=((0, 0), (0, 0), (1, 1), (1, 1)))
    return y


if __name__ == "__main__":
    # Small shapes: B=2, Cin=32, H=W=16, Cout=128 (lane-dense channel dim).
    B, Cin, H, W, Cout = 2, 32, 16, 16, 128
    key = jax.random.PRNGKey(0)
    kx, kw, kb, kg, kbt = jax.random.split(key, 5)
    x = jax.random.normal(kx, (B, Cin, H, W), jnp.float32)
    conv_w = jax.random.normal(kw, (Cout, Cin, 3, 3), jnp.float32) / math.sqrt(9 * Cin)
    conv_b = 0.1 * jax.random.normal(kb, (Cout,), jnp.float32)
    ln_w = 1.0 + 0.1 * jax.random.normal(kg, (Cout,), jnp.float32)
    ln_b = 0.1 * jax.random.normal(kbt, (Cout,), jnp.float32)

    out = conv_pool(x, conv_w, conv_b, ln_w, ln_b)
    out = jax.block_until_ready(out)

    ref = reference_forward(x, conv_w, conv_b, ln_w, ln_b)
    assert out.shape == (B, Cout, H // 2, W // 2), out.shape
    max_err = float(jnp.max(jnp.abs(out - ref)))
    # bf16 MXU inputs vs. f32 reference -> loose-ish but tight-enough tolerance.
    assert jnp.allclose(out, ref, rtol=2e-2, atol=2e-2), max_err
    print("KERNEL_OK")
</pallas_src>

<mosaic_0001>
module attributes {stable_mosaic.version = 11 : i64} {
  func.func @conv_pool_kernel(%arg0: i32, %arg1: memref<1x18x18x32xf32, #tpu.memory_space<vmem>>, %arg2: memref<3x3x32x128xbf16, #tpu.memory_space<vmem>>, %arg3: memref<1x128xf32, #tpu.memory_space<vmem>>, %arg4: memref<1x128xf32, #tpu.memory_space<vmem>>, %arg5: memref<1x128xf32, #tpu.memory_space<vmem>>, %arg6: memref<1x8x8x128xf32, #tpu.memory_space<vmem>>, %arg7: memref<18x18x128xf32, #tpu.memory_space<vmem>>) attributes {dimension_semantics = [#tpu.dimension_semantics<parallel>], iteration_bounds = array<i64: 2>, scalar_prefetch = 0 : i64, scratch_operands = 1 : i64, tpu.core_type = #tpu.core_type<tc>, window_params = [{transform_indices = @transform_0, window_bounds = array<i64: 1, 18, 18, 32>}, {pipeline_mode = #tpu.pipeline_mode<synchronous>, transform_indices = @transform_1, window_bounds = array<i64: 3, 3, 32, 128>}, {pipeline_mode = #tpu.pipeline_mode<synchronous>, transform_indices = @transform_2, window_bounds = array<i64: 1, 128>}, {pipeline_mode = #tpu.pipeline_mode<synchronous>, transform_indices = @transform_3, window_bounds = array<i64: 1, 128>}, {pipeline_mode = #tpu.pipeline_mode<synchronous>, transform_indices = @transform_4, window_bounds = array<i64: 1, 128>}, {transform_indices = @transform_5, window_bounds = array<i64: 1, 8, 8, 128>}]} {
    %c0 = arith.constant 0 : index
    %c0_0 = arith.constant 0 : index
    %c0_1 = arith.constant 0 : index
    %c0_2 = arith.constant 0 : index
    %0 = vector.load %arg1[%c0, %c0_0, %c0_1, %c0_2] : memref<1x18x18x32xf32, #tpu.memory_space<vmem>>, vector<1x16x16x32xf32>
    %1 = vector.shape_cast %0 : vector<1x16x16x32xf32> to vector<16x16x32xf32>
    %2 = vector.shape_cast %1 : vector<16x16x32xf32> to vector<256x32xf32>
    %3 = arith.truncf %2 : vector<256x32xf32> to vector<256x32xbf16>
    %c0_3 = arith.constant 0 : index
    %c0_4 = arith.constant 0 : index
    %c0_5 = arith.constant 0 : index
    %c0_6 = arith.constant 0 : index
    %4 = vector.load %arg2[%c0_3, %c0_4, %c0_5, %c0_6] : memref<3x3x32x128xbf16, #tpu.memory_space<vmem>>, vector<1x1x32x128xbf16>
    %5 = vector.shape_cast %4 : vector<1x1x32x128xbf16> to vector<32x128xbf16>
    %cst = arith.constant dense<0.000000e+00> : vector<256x128xf32>
    %6 = tpu.matmul %3, %5, %cst {dimension_numbers = #tpu.dot_dimension_numbers<[1], [0], [0], [1], [0, 0, 1, 1], [], []>} : vector<256x32xbf16>, vector<32x128xbf16>, vector<256x128xf32> -> vector<256x128xf32>
    %c0_7 = arith.constant 0 : index
    %c0_8 = arith.constant 0 : index
    %c1 = arith.constant 1 : index
    %c0_9 = arith.constant 0 : index
    %7 = vector.load %arg1[%c0_7, %c0_8, %c1, %c0_9] : memref<1x18x18x32xf32, #tpu.memory_space<vmem>>, vector<1x16x16x32xf32>
    %8 = vector.shape_cast %7 : vector<1x16x16x32xf32> to vector<16x16x32xf32>
    %9 = vector.shape_cast %8 : vector<16x16x32xf32> to vector<256x32xf32>
    %10 = arith.truncf %9 : vector<256x32xf32> to vector<256x32xbf16>
    %c0_10 = arith.constant 0 : index
    %c1_11 = arith.constant 1 : index
    %c0_12 = arith.constant 0 : index
    %c0_13 = arith.constant 0 : index
    %11 = vector.load %arg2[%c0_10, %c1_11, %c0_12, %c0_13] : memref<3x3x32x128xbf16, #tpu.memory_space<vmem>>, vector<1x1x32x128xbf16>
    %12 = vector.shape_cast %11 : vector<1x1x32x128xbf16> to vector<32x128xbf16>
    %cst_14 = arith.constant dense<0.000000e+00> : vector<256x128xf32>
    %13 = tpu.matmul %10, %12, %cst_14 {dimension_numbers = #tpu.dot_dimension_numbers<[1], [0], [0], [1], [0, 0, 1, 1], [], []>} : vector<256x32xbf16>, vector<32x128xbf16>, vector<256x128xf32> -> vector<256x128xf32>
    %14 = arith.addf %6, %13 : vector<256x128xf32>
    %c0_15 = arith.constant 0 : index
    %c0_16 = arith.constant 0 : index
    %c2 = arith.constant 2 : index
    %c0_17 = arith.constant 0 : index
    %15 = vector.load %arg1[%c0_15, %c0_16, %c2, %c0_17] : memref<1x18x18x32xf32, #tpu.memory_space<vmem>>, vector<1x16x16x32xf32>
    %16 = vector.shape_cast %15 : vector<1x16x16x32xf32> to vector<16x16x32xf32>
    %17 = vector.shape_cast %16 : vector<16x16x32xf32> to vector<256x32xf32>
    %18 = arith.truncf %17 : vector<256x32xf32> to vector<256x32xbf16>
    %c0_18 = arith.constant 0 : index
    %c2_19 = arith.constant 2 : index
    %c0_20 = arith.constant 0 : index
    %c0_21 = arith.constant 0 : index
    %19 = vector.load %arg2[%c0_18, %c2_19, %c0_20, %c0_21] : memref<3x3x32x128xbf16, #tpu.memory_space<vmem>>, vector<1x1x32x128xbf16>
    %20 = vector.shape_cast %19 : vector<1x1x32x128xbf16> to vector<32x128xbf16>
    %cst_22 = arith.constant dense<0.000000e+00> : vector<256x128xf32>
    %21 = tpu.matmul %18, %20, %cst_22 {dimension_numbers = #tpu.dot_dimension_numbers<[1], [0], [0], [1], [0, 0, 1, 1], [], []>} : vector<256x32xbf16>, vector<32x128xbf16>, vector<256x128xf32> -> vector<256x128xf32>
    %22 = arith.addf %14, %21 : vector<256x128xf32>
    %c0_23 = arith.constant 0 : index
    %c1_24 = arith.constant 1 : index
    %c0_25 = arith.constant 0 : index
    %c0_26 = arith.constant 0 : index
    %23 = vector.load %arg1[%c0_23, %c1_24, %c0_25, %c0_26] : memref<1x18x18x32xf32, #tpu.memory_space<vmem>>, vector<1x16x16x32xf32>
    %24 = vector.shape_cast %23 : vector<1x16x16x32xf32> to vector<16x16x32xf32>
    %25 = vector.shape_cast %24 : vector<16x16x32xf32> to vector<256x32xf32>
    %26 = arith.truncf %25 : vector<256x32xf32> to vector<256x32xbf16>
    %c1_27 = arith.constant 1 : index
    %c0_28 = arith.constant 0 : index
    %c0_29 = arith.constant 0 : index
    %c0_30 = arith.constant 0 : index
    %27 = vector.load %arg2[%c1_27, %c0_28, %c0_29, %c0_30] : memref<3x3x32x128xbf16, #tpu.memory_space<vmem>>, vector<1x1x32x128xbf16>
    %28 = vector.shape_cast %27 : vector<1x1x32x128xbf16> to vector<32x128xbf16>
    %cst_31 = arith.constant dense<0.000000e+00> : vector<256x128xf32>
    %29 = tpu.matmul %26, %28, %cst_31 {dimension_numbers = #tpu.dot_dimension_numbers<[1], [0], [0], [1], [0, 0, 1, 1], [], []>} : vector<256x32xbf16>, vector<32x128xbf16>, vector<256x128xf32> -> vector<256x128xf32>
    %30 = arith.addf %22, %29 : vector<256x128xf32>
    %c0_32 = arith.constant 0 : index
    %c1_33 = arith.constant 1 : index
    %c1_34 = arith.constant 1 : index
    %c0_35 = arith.constant 0 : index
    %31 = vector.load %arg1[%c0_32, %c1_33, %c1_34, %c0_35] : memref<1x18x18x32xf32, #tpu.memory_space<vmem>>, vector<1x16x16x32xf32>
    %32 = vector.shape_cast %31 : vector<1x16x16x32xf32> to vector<16x16x32xf32>
    %33 = vector.shape_cast %32 : vector<16x16x32xf32> to vector<256x32xf32>
    %34 = arith.truncf %33 : vector<256x32xf32> to vector<256x32xbf16>
    %c1_36 = arith.constant 1 : index
    %c1_37 = arith.constant 1 : index
    %c0_38 = arith.constant 0 : index
    %c0_39 = arith.constant 0 : index
    %35 = vector.load %arg2[%c1_36, %c1_37, %c0_38, %c0_39] : memref<3x3x32x128xbf16, #tpu.memory_space<vmem>>, vector<1x1x32x128xbf16>
    %36 = vector.shape_cast %35 : vector<1x1x32x128xbf16> to vector<32x128xbf16>
    %cst_40 = arith.constant dense<0.000000e+00> : vector<256x128xf32>
    %37 = tpu.matmul %34, %36, %cst_40 {dimension_numbers = #tpu.dot_dimension_numbers<[1], [0], [0], [1], [0, 0, 1, 1], [], []>} : vector<256x32xbf16>, vector<32x128xbf16>, vector<256x128xf32> -> vector<256x128xf32>
    %38 = arith.addf %30, %37 : vector<256x128xf32>
    %c0_41 = arith.constant 0 : index
    %c1_42 = arith.constant 1 : index
    %c2_43 = arith.constant 2 : index
    %c0_44 = arith.constant 0 : index
    %39 = vector.load %arg1[%c0_41, %c1_42, %c2_43, %c0_44] : memref<1x18x18x32xf32, #tpu.memory_space<vmem>>, vector<1x16x16x32xf32>
    %40 = vector.shape_cast %39 : vector<1x16x16x32xf32> to vector<16x16x32xf32>
    %41 = vector.shape_cast %40 : vector<16x16x32xf32> to vector<256x32xf32>
    %42 = arith.truncf %41 : vector<256x32xf32> to vector<256x32xbf16>
    %c1_45 = arith.constant 1 : index
    %c2_46 = arith.constant 2 : index
    %c0_47 = arith.constant 0 : index
    %c0_48 = arith.constant 0 : index
    %43 = vector.load %arg2[%c1_45, %c2_46, %c0_47, %c0_48] : memref<3x3x32x128xbf16, #tpu.memory_space<vmem>>, vector<1x1x32x128xbf16>
    %44 = vector.shape_cast %43 : vector<1x1x32x128xbf16> to vector<32x128xbf16>
    %cst_49 = arith.constant dense<0.000000e+00> : vector<256x128xf32>
    %45 = tpu.matmul %42, %44, %cst_49 {dimension_numbers = #tpu.dot_dimension_numbers<[1], [0], [0], [1], [0, 0, 1, 1], [], []>} : vector<256x32xbf16>, vector<32x128xbf16>, vector<256x128xf32> -> vector<256x128xf32>
    %46 = arith.addf %38, %45 : vector<256x128xf32>
    %c0_50 = arith.constant 0 : index
    %c2_51 = arith.constant 2 : index
    %c0_52 = arith.constant 0 : index
    %c0_53 = arith.constant 0 : index
    %47 = vector.load %arg1[%c0_50, %c2_51, %c0_52, %c0_53] : memref<1x18x18x32xf32, #tpu.memory_space<vmem>>, vector<1x16x16x32xf32>
    %48 = vector.shape_cast %47 : vector<1x16x16x32xf32> to vector<16x16x32xf32>
    %49 = vector.shape_cast %48 : vector<16x16x32xf32> to vector<256x32xf32>
    %50 = arith.truncf %49 : vector<256x32xf32> to vector<256x32xbf16>
    %c2_54 = arith.constant 2 : index
    %c0_55 = arith.constant 0 : index
    %c0_56 = arith.constant 0 : index
    %c0_57 = arith.constant 0 : index
    %51 = vector.load %arg2[%c2_54, %c0_55, %c0_56, %c0_57] : memref<3x3x32x128xbf16, #tpu.memory_space<vmem>>, vector<1x1x32x128xbf16>
    %52 = vector.shape_cast %51 : vector<1x1x32x128xbf16> to vector<32x128xbf16>
    %cst_58 = arith.constant dense<0.000000e+00> : vector<256x128xf32>
    %53 = tpu.matmul %50, %52, %cst_58 {dimension_numbers = #tpu.dot_dimension_numbers<[1], [0], [0], [1], [0, 0, 1, 1], [], []>} : vector<256x32xbf16>, vector<32x128xbf16>, vector<256x128xf32> -> vector<256x128xf32>
    %54 = arith.addf %46, %53 : vector<256x128xf32>
    %c0_59 = arith.constant 0 : index
    %c2_60 = arith.constant 2 : index
    %c1_61 = arith.constant 1 : index
    %c0_62 = arith.constant 0 : index
    %55 = vector.load %arg1[%c0_59, %c2_60, %c1_61, %c0_62] : memref<1x18x18x32xf32, #tpu.memory_space<vmem>>, vector<1x16x16x32xf32>
    %56 = vector.shape_cast %55 : vector<1x16x16x32xf32> to vector<16x16x32xf32>
    %57 = vector.shape_cast %56 : vector<16x16x32xf32> to vector<256x32xf32>
    %58 = arith.truncf %57 : vector<256x32xf32> to vector<256x32xbf16>
    %c2_63 = arith.constant 2 : index
    %c1_64 = arith.constant 1 : index
    %c0_65 = arith.constant 0 : index
    %c0_66 = arith.constant 0 : index
    %59 = vector.load %arg2[%c2_63, %c1_64, %c0_65, %c0_66] : memref<3x3x32x128xbf16, #tpu.memory_space<vmem>>, vector<1x1x32x128xbf16>
    %60 = vector.shape_cast %59 : vector<1x1x32x128xbf16> to vector<32x128xbf16>
    %cst_67 = arith.constant dense<0.000000e+00> : vector<256x128xf32>
    %61 = tpu.matmul %58, %60, %cst_67 {dimension_numbers = #tpu.dot_dimension_numbers<[1], [0], [0], [1], [0, 0, 1, 1], [], []>} : vector<256x32xbf16>, vector<32x128xbf16>, vector<256x128xf32> -> vector<256x128xf32>
    %62 = arith.addf %54, %61 : vector<256x128xf32>
    %c0_68 = arith.constant 0 : index
    %c2_69 = arith.constant 2 : index
    %c2_70 = arith.constant 2 : index
    %c0_71 = arith.constant 0 : index
    %63 = vector.load %arg1[%c0_68, %c2_69, %c2_70, %c0_71] : memref<1x18x18x32xf32, #tpu.memory_space<vmem>>, vector<1x16x16x32xf32>
    %64 = vector.shape_cast %63 : vector<1x16x16x32xf32> to vector<16x16x32xf32>
    %65 = vector.shape_cast %64 : vector<16x16x32xf32> to vector<256x32xf32>
    %66 = arith.truncf %65 : vector<256x32xf32> to vector<256x32xbf16>
    %c2_72 = arith.constant 2 : index
    %c2_73 = arith.constant 2 : index
    %c0_74 = arith.constant 0 : index
    %c0_75 = arith.constant 0 : index
    %67 = vector.load %arg2[%c2_72, %c2_73, %c0_74, %c0_75] : memref<3x3x32x128xbf16, #tpu.memory_space<vmem>>, vector<1x1x32x128xbf16>
    %68 = vector.shape_cast %67 : vector<1x1x32x128xbf16> to vector<32x128xbf16>
    %cst_76 = arith.constant dense<0.000000e+00> : vector<256x128xf32>
    %69 = tpu.matmul %66, %68, %cst_76 {dimension_numbers = #tpu.dot_dimension_numbers<[1], [0], [0], [1], [0, 0, 1, 1], [], []>} : vector<256x32xbf16>, vector<32x128xbf16>, vector<256x128xf32> -> vector<256x128xf32>
    %70 = arith.addf %62, %69 : vector<256x128xf32>
    %c0_77 = arith.constant 0 : index
    %c0_78 = arith.constant 0 : index
    %71 = vector.load %arg3[%c0_77, %c0_78] : memref<1x128xf32, #tpu.memory_space<vmem>>, vector<1x128xf32>
    %72 = vector.broadcast %71 : vector<1x128xf32> to vector<256x128xf32>
    %73 = arith.addf %70, %72 : vector<256x128xf32>
    %cst_79 = arith.constant dense<0.000000e+00> : vector<256xf32>
    %74 = vector.multi_reduction <add>, %73, %cst_79 [1] : vector<256x128xf32> to vector<256xf32>
    %75 = vector.shape_cast %74 : vector<256xf32> to vector<256x1xf32>
    %cst_80 = arith.constant 1.280000e+02 : f32
    %76 = vector.broadcast %cst_80 : f32 to vector<256x1xf32>
    %77 = arith.divf %75, %76 : vector<256x1xf32>
    %78 = vector.broadcast %77 : vector<256x1xf32> to vector<256x128xf32>
    %79 = arith.subf %73, %78 : vector<256x128xf32>
    %80 = arith.mulf %79, %79 : vector<256x128xf32>
    %cst_81 = arith.constant dense<0.000000e+00> : vector<256xf32>
    %81 = vector.multi_reduction <add>, %80, %cst_81 [1] : vector<256x128xf32> to vector<256xf32>
    %82 = vector.shape_cast %81 : vector<256xf32> to vector<256x1xf32>
    %cst_82 = arith.constant 1.280000e+02 : f32
    %83 = vector.broadcast %cst_82 : f32 to vector<256x1xf32>
    %84 = arith.divf %82, %83 : vector<256x1xf32>
    %85 = vector.broadcast %77 : vector<256x1xf32> to vector<256x128xf32>
    %86 = arith.subf %73, %85 : vector<256x128xf32>
    %cst_83 = arith.constant 9.99999997E-7 : f32
    %87 = vector.broadcast %cst_83 : f32 to vector<256x1xf32>
    %88 = arith.addf %84, %87 : vector<256x1xf32>
    %89 = math.rsqrt %88 : vector<256x1xf32>
    %90 = vector.broadcast %89 : vector<256x1xf32> to vector<256x128xf32>
    %91 = arith.mulf %86, %90 : vector<256x128xf32>
    %c0_84 = arith.constant 0 : index
    %c0_85 = arith.constant 0 : index
    %92 = vector.load %arg4[%c0_84, %c0_85] : memref<1x128xf32, #tpu.memory_space<vmem>>, vector<1x128xf32>
    %93 = vector.broadcast %92 : vector<1x128xf32> to vector<256x128xf32>
    %94 = arith.mulf %91, %93 : vector<256x128xf32>
    %c0_86 = arith.constant 0 : index
    %c0_87 = arith.constant 0 : index
    %95 = vector.load %arg5[%c0_86, %c0_87] : memref<1x128xf32, #tpu.memory_space<vmem>>, vector<1x128xf32>
    %96 = vector.broadcast %95 : vector<1x128xf32> to vector<256x128xf32>
    %97 = arith.addf %94, %96 : vector<256x128xf32>
    %cst_88 = arith.constant -1.000000e+30 : f32
    %98 = vector.broadcast %cst_88 : f32 to vector<18x18x128xf32>
    %c0_89 = arith.constant 0 : index
    %c0_90 = arith.constant 0 : index
    %c0_91 = arith.constant 0 : index
    %99 = vector.load %arg7[%c0_89, %c0_90, %c0_91] : memref<18x18x128xf32, #tpu.memory_space<vmem>>, vector<18x18x128xf32>
    tpu.vector_store %arg7[%c0_89, %c0_90, %c0_91], %98 {strides = array<i32>} : memref<18x18x128xf32, #tpu.memory_space<vmem>>, vector<18x18x128xf32>,
    %100 = vector.shape_cast %97 : vector<256x128xf32> to vector<16x16x128xf32>
    %c1_92 = arith.constant 1 : index
    %c1_93 = arith.constant 1 : index
    %c0_94 = arith.constant 0 : index
    %101 = vector.load %arg7[%c1_92, %c1_93, %c0_94] : memref<18x18x128xf32, #tpu.memory_space<vmem>>, vector<16x16x128xf32>
    tpu.vector_store %arg7[%c1_92, %c1_93, %c0_94], %100 {strides = array<i32>} : memref<18x18x128xf32, #tpu.memory_space<vmem>>, vector<16x16x128xf32>,
    %c0_95 = arith.constant 0 : index
    %c0_96 = arith.constant 0 : index
    %c0_97 = arith.constant 0 : index
    %102 = vector.load %arg7[%c0_95, %c0_96, %c0_97] : memref<18x18x128xf32, #tpu.memory_space<vmem>>, vector<16x16x128xf32>
    %c0_98 = arith.constant 0 : index
    %c1_99 = arith.constant 1 : index
    %c0_100 = arith.constant 0 : index
    %103 = vector.load %arg7[%c0_98, %c1_99, %c0_100] : memref<18x18x128xf32, #tpu.memory_space<vmem>>, vector<16x16x128xf32>
    %104 = arith.maximumf %102, %103 : vector<16x16x128xf32>
    %c0_101 = arith.constant 0 : index
    %c2_102 = arith.constant 2 : index
    %c0_103 = arith.constant 0 : index
    %105 = vector.load %arg7[%c0_101, %c2_102, %c0_103] : memref<18x18x128xf32, #tpu.memory_space<vmem>>, vector<16x16x128xf32>
    %106 = arith.maximumf %104, %105 : vector<16x16x128xf32>
    %c1_104 = arith.constant 1 : index
    %c0_105 = arith.constant 0 : index
    %c0_106 = arith.constant 0 : index
    %107 = vector.load %arg7[%c1_104, %c0_105, %c0_106] : memref<18x18x128xf32, #tpu.memory_space<vmem>>, vector<16x16x128xf32>
    %108 = arith.maximumf %106, %107 : vector<16x16x128xf32>
    %c1_107 = arith.constant 1 : index
    %c1_108 = arith.constant 1 : index
    %c0_109 = arith.constant 0 : index
    %109 = vector.load %arg7[%c1_107, %c1_108, %c0_109] : memref<18x18x128xf32, #tpu.memory_space<vmem>>, vector<16x16x128xf32>
    %110 = arith.maximumf %108, %109 : vector<16x16x128xf32>
    %c1_110 = arith.constant 1 : index
    %c2_111 = arith.constant 2 : index
    %c0_112 = arith.constant 0 : index
    %111 = vector.load %arg7[%c1_110, %c2_111, %c0_112] : memref<18x18x128xf32, #tpu.memory_space<vmem>>, vector<16x16x128xf32>
    %112 = arith.maximumf %110, %111 : vector<16x16x128xf32>
    %c2_113 = arith.constant 2 : index
    %c0_114 = arith.constant 0 : index
    %c0_115 = arith.constant 0 : index
    %113 = vector.load %arg7[%c2_113, %c0_114, %c0_115] : memref<18x18x128xf32, #tpu.memory_space<vmem>>, vector<16x16x128xf32>
    %114 = arith.maximumf %112, %113 : vector<16x16x128xf32>
    %c2_116 = arith.constant 2 : index
    %c1_117 = arith.constant 1 : index
    %c0_118 = arith.constant 0 : index
    %115 = vector.load %arg7[%c2_116, %c1_117, %c0_118] : memref<18x18x128xf32, #tpu.memory_space<vmem>>, vector<16x16x128xf32>
    %116 = arith.maximumf %114, %115 : vector<16x16x128xf32>
    %c2_119 = arith.constant 2 : index
    %c2_120 = arith.constant 2 : index
    %c0_121 = arith.constant 0 : index
    %117 = vector.load %arg7[%c2_119, %c2_120, %c0_121] : memref<18x18x128xf32, #tpu.memory_space<vmem>>, vector<16x16x128xf32>
    %118 = arith.maximumf %116, %117 : vector<16x16x128xf32>
    %119 = vector.shape_cast %118 : vector<16x16x128xf32> to vector<8x2x16x128xf32>
    %120 = vector.extract_strided_slice %119 {offsets = [0, 0, 0, 0], sizes = [8, 1, 16, 128], strides = [1, 1, 1, 1]} : vector<8x2x16x128xf32> to vector<8x1x16x128xf32>
    %121 = vector.shape_cast %120 : vector<8x1x16x128xf32> to vector<8x16x128xf32>
    %c0_122 = arith.constant 0 : index
    %c0_123 = arith.constant 0 : index
    %c0_124 = arith.constant 0 : index
    %122 = vector.load %arg7[%c0_122, %c0_123, %c0_124] : memref<18x18x128xf32, #tpu.memory_space<vmem>>, vector<8x16x128xf32>
    tpu.vector_store %arg7[%c0_122, %c0_123, %c0_124], %121 {strides = array<i32>} : memref<18x18x128xf32, #tpu.memory_space<vmem>>, vector<8x16x128xf32>,
    %c0_125 = arith.constant 0 : index
    %c0_126 = arith.constant 0 : index
    %c0_127 = arith.constant 0 : index
    %123 = tpu.strided_load %arg7[%c0_125, %c0_126, %c0_127] {strides = array<i32: 1, 2, 1>} : memref<18x18x128xf32, #tpu.memory_space<vmem>>, vector<8x8x128xf32>
    %c0_128 = arith.constant 0 : index
    %c0_129 = arith.constant 0 : index
    %c0_130 = arith.constant 0 : index
    %c0_131 = arith.constant 0 : index
    %124 = vector.load %arg6[%c0_128, %c0_129, %c0_130, %c0_131] : memref<1x8x8x128xf32, #tpu.memory_space<vmem>>, vector<1x8x8x128xf32>
    %125 = vector.shape_cast %124 : vector<1x8x8x128xf32> to vector<8x8x128xf32>
    %126 = vector.shape_cast %123 : vector<8x8x128xf32> to vector<1x8x8x128xf32>
    tpu.vector_store %arg6[%c0_128, %c0_129, %c0_130, %c0_131], %126 {strides = array<i32>} : memref<1x8x8x128xf32, #tpu.memory_space<vmem>>, vector<1x8x8x128xf32>,
    return
  }
  func.func @transform_0(%arg0: i32) -> (i32, i32, i32, i32) {
    %c0_i32 = arith.constant 0 : i32
    %c0_i32_0 = arith.constant 0 : i32
    %c0_i32_1 = arith.constant 0 : i32
    %c0_i32_2 = arith.constant 0 : i32
    return %arg0, %c0_i32, %c0_i32_0, %c0_i32_1 : i32, i32, i32, i32
  }
  func.func @transform_1(%arg0: i32) -> (i32, i32, i32, i32) {
    %c0_i32 = arith.constant 0 : i32
    %c0_i32_0 = arith.constant 0 : i32
    %c0_i32_1 = arith.constant 0 : i32
    %c0_i32_2 = arith.constant 0 : i32
    %c0_i32_3 = arith.constant 0 : i32
    return %c0_i32, %c0_i32_0, %c0_i32_1, %c0_i32_2 : i32, i32, i32, i32
  }
  func.func @transform_2(%arg0: i32) -> (i32, i32) {
    %c0_i32 = arith.constant 0 : i32
    %c0_i32_0 = arith.constant 0 : i32
    %c0_i32_1 = arith.constant 0 : i32
    return %c0_i32, %c0_i32_0 : i32, i32
  }
  func.func @transform_3(%arg0: i32) -> (i32, i32) {
    %c0_i32 = arith.constant 0 : i32
    %c0_i32_0 = arith.constant 0 : i32
    %c0_i32_1 = arith.constant 0 : i32
    return %c0_i32, %c0_i32_0 : i32, i32
  }
  func.func @transform_4(%arg0: i32) -> (i32, i32) {
    %c0_i32 = arith.constant 0 : i32
    %c0_i32_0 = arith.constant 0 : i32
    %c0_i32_1 = arith.constant 0 : i32
    return %c0_i32, %c0_i32_0 : i32, i32
  }
  func.func @transform_5(%arg0: i32) -> (i32, i32, i32, i32) {
    %c0_i32 = arith.constant 0 : i32
    %c0_i32_0 = arith.constant 0 : i32
    %c0_i32_1 = arith.constant 0 : i32
    %c0_i32_2 = arith.constant 0 : i32
    return %arg0, %c0_i32, %c0_i32_0, %c0_i32_1 : i32, i32, i32, i32
  }
}

</mosaic_0001>

<bundles_post_ra>
// kernel: tpu_custom_call.1
= control target key start
LH: loop header
LB: loop body
LE: loop exit
PB: predicated region body
PF: predicated region fallthrough
CT: control target
= control target key end

     0   :  { %10 = vsyncpa [#allocation4], 0  ;;  %s6653_s0 = inlined_call_operand.vmem [shape: f32[2,18,18,32], index: 0, kind: input, shape index: {}]   ;;  %s6654_s1 = inlined_call_operand.vmem [shape: bf16[3,3,32,128], index: 1, kind: input, shape index: {}]   ;;  %s6655_s2 = inlined_call_operand.vmem [shape: f32[1,128], index: 2, kind: input, shape index: {}]   ;;  %s6656_s3 = inlined_call_operand.vmem [shape: f32[1,128], index: 3, kind: input, shape index: {}]   ;;  %s6657_s4 = inlined_call_operand.vmem [shape: f32[1,128], index: 4, kind: input, shape index: {}]   ;;  %s6658_s5 = inlined_call_operand.hbm [shape: f32[2,8,8,128], index: 5, kind: output, shape index: {}]  }
   0x1   :  { %12 = vsyncpa [#allocation4 + $0x1], 0  ;;  %s4973_s18 = smov 0   ;;  %s4975_s19 = smov 0  }
   0x2   :  { %s4977_s20 = smov 0   ;;  %s4979_s21 = smov 0  }
   0x3 LB: > { %s4994_s22 = sadd.s32 4294967295, %s4937_s21   ;;  %s3861_s23 = sadd.s32 4294967294, %s4937_s21   ;;  %s4937_s21 = sphi %s4979_s21, %s6714_s21   ;;  %s4933_s20 = sphi %s4977_s20, %s6713_s20   ;;  %s4929_s19 = sphi %s4975_s19, %s6712_s19   ;;  %s4925_s18 = sphi %s4973_s18, %s6711_s18  }
   0x4   : > { %s4998_s24 = sadd.s32 1, %s4937_s21   ;;  %s135_s25 = sadd.s32 1, %s4933_s20 }
   0x5   : > { %s132_s26 = ssub.s32 %s4937_s21, %s4998_s24  ;;  %p145_p0 = scmp.ne.s32.totalorder %s4933_s20, %s4929_s19 }
   0x6   : > { %p133_p1 = scmp.eq.s32.totalorder %s132_s26, 0  ;;  %p146_p2 = scmp.eq.s32.totalorder %s4994_s22, 1 }
   0x7   : > { %p151_p3 = scmp.ne.s32.totalorder %s4929_s19, %s4925_s18  ;;  %p152_p4 = scmp.eq.s32.totalorder %s3861_s23, 1 }
   0x8   : > { %s5009_s27 = scalar_select %p133_p1, %s4933_s20, %s135_s25  }
   0x9   : > { %p5011_p5 = por %p146_p2, %p145_p0  ;;  %p5015_p6 = por %p152_p4, %p151_p3 }
   0xa   : > { %p3864_p7 = scmp.ge.s32.totalorder %s4937_s21, 1  ;;  %p190_p8 = scmp.lt.s32.totalorder %s4937_s21, 3 }
   0xc   : > { %p191_p9 = pnand %p3864_p7, %p190_p8 }
   0xe   : > { %194 = sbr.rel (%p191_p9) target bundleno = 877 (0x36d), region = 40 }
  0x13   : > { %v4795_v0 = vld [vmem:[%s6654_s1 + $0x18] sm:$0xff]   ;;  %p218_p10 = scmp.lt.s32.totalorder %s4994_s22, 1  ;;  %v4796_v1 = vld [vmem:[%s6654_s1 + $0x10] sm:$0xff]   ;;  %v4797_v2 = vld [vmem:[%s6654_s1 + $0x8] sm:$0xff]   ;;  %vm341_vm0 = vcmask 261120   ;;  %s215_s30 = sand.u32 1, %s4929_s19  }
  0x14   : > { %4424 = vmatprep.subr.bf16.mxu0 %v4795_v0  ;;  %4748 = vmatprep.subr.bf16.mxu1 %v4795_v0  ;;  %v4798_v3 = vld [vmem:[%s6654_s1 + $0x28] sm:$0xff]   ;;  %v4799_v11 = vld [vmem:[%s6654_s1] sm:$0xff]   ;;  %v5090_v32 = vld [vmem:[%s6654_s1 + $0x38] sm:$0xff]   ;;  %s6485_s6 = sshll.u32 %s215_s30, 6  ;;  %s4261_s8 = sshll.u32 %s4994_s22, 10 }
  0x15   : > { %s219_s9 = scalar_select %p218_p10, %s4994_s22, 1  ;;  %4425 = vmatpush3.bf16.msra.mxu0 %v4795_v0  ;;  %4750 = vmatpush3.bf16.msra.mxu1 %v4795_v0  ;;  %v4800_v23 = vld [vmem:[%s6654_s1 + $0x20] sm:$0xff]   ;;  %v4802_v43 = vld [vmem:[%s6654_s1 + $0x48] sm:$0xff]  }
  0x16   : > { %4426 = vmatprep.subr.bf16.mxu0 %v4796_v1  ;;  %4749 = vmatprep.subr.bf16.mxu1 %v4796_v1  ;;  %s6510_s7 = scalar_lea.vmem [#allocation3], %s6485_s6  ;;  %s6613_s13 = scalar_lea.sflag [#allocation4], %s215_s30 }
  0x17   : > { %s4752_s12 = smul.u32 432, %s219_s9  ;;  %s3799_s9 = sshll.u32 %s6510_s7, 4  ;;  %s6608_s9 = int_to_ptr.vmem [resolvable:$true] %s3799_s9 }
  0x18   : > { %s4877_s14 = scalar_lea.vmem %s6608_s9, 1024  ;;  %s4940_s22 = smov [#allocation3]  }
  0x19   : > { %s5038_s17 = scalar_lea.vmem %s6653_s0, %s4752_s12  ;;  %4427 = vmatpush3.bf16.msra.mxu0 %v4796_v1  ;;  %4751 = vmatpush3.bf16.msra.mxu1 %v4796_v1  ;;  %s6606_s12 = scalar_lea.hbm %s6658_s5, %s4261_s8 }
  0x1a   : > { %v276_v4 = vld [vmem:[%s5038_s17 + $0x1] sm:$0xff]  ;;  %v277_v5 = vld [vmem:[%s5038_s17 + $0x9] sm:$0xff]  ;;  %v278_v9 = vld [vmem:[%s5038_s17 + $0x19] sm:$0xff]  ;;  %4460 = vmatprep.subr.bf16.mxu1 %v4797_v2  ;;  %4496 = vmatprep.subr.bf16.mxu0 %v4798_v3  ;;  %p4878_p11 = scmp.ne.s32.totalorder %s6608_s9, %s4877_s14 }
  0x1b   : > { %v292_v6 = vld [vmem:[%s5038_s17 + $0xc1] sm:$0xff]  ;;  %v308_v7 = vpack.c.bf16 %v277_v5, %v276_v4  ;;  %v293_v8 = vld [vmem:[%s5038_s17 + $0xc9] sm:$0xff]  ;;  %v294_v14 = vld [vmem:[%s5038_s17 + $0xd9] sm:$0xff] }
  0x1c   : > { %v279_v10 = vld [vmem:[%s5038_s17 + $0x21] sm:$0xff]  ;;  %v5049_v12 = vpack.c.bf16 %v293_v8, %v292_v6  ;;  %v280_v16 = vld [vmem:[%s5038_s17 + $0x31] sm:$0xff]  ;;  %v281_v18 = vld [vmem:[%s5038_s17 + $0x39] sm:$0xff]  ;;  %p4879_p12 = pnand %p4878_p11, %p5011_p5 }
  0x1d   : > { %v5051_v13 = vpack.c.bf16 %v279_v10, %v278_v9  ;;  %v295_v15 = vld [vmem:[%s5038_s17 + $0xe1] sm:$0xff]  ;;  %4428 = vmatprep.mubr.msk.bf16.mxu0 %vm341_vm0, %v308_v7  ;;  %v296_v19 = vld [vmem:[%s5038_s17 + $0xf1] sm:$0xff]  ;;  %v297_v20 = vld [vmem:[%s5038_s17 + $0xf9] sm:$0xff]  ;;  %v5066_v21 = vpack.c.bf16 %v281_v18, %v280_v16 }
  0x1e   : > { %v5057_v17 = vpack.c.bf16 %v295_v15, %v294_v14  ;;  %4444 = vmatprep.mubr.msk.bf16.mxu1 %vm341_vm0, %v5049_v12  ;;  %v5068_v22 = vpack.c.bf16 %v297_v20, %v296_v19  ;;  %v282_v24 = vld [vmem:[%s5038_s17 + $0x49] sm:$0xff]  ;;  %v283_v25 = vld [vmem:[%s5038_s17 + $0x51] sm:$0xff]  ;;  %v284_v28 = vld [vmem:[%s5038_s17 + $0x61] sm:$0xff]  ;;  %p4880_p13 = pneg %p4879_p12 }
  0x1f   : > { %4429 = vmatmul.mubr.msk.bf16.vlgmr.msra.gmra.mxu0 %vm341_vm0, %v5051_v13  ;;  %v298_v26 = vld [vmem:[%s5038_s17 + $0x109] sm:$0xff]  ;;  %v299_v27 = vld [vmem:[%s5038_s17 + $0x111] sm:$0xff]  ;;  %v300_v30 = vld [vmem:[%s5038_s17 + $0x121] sm:$0xff]  ;;  %v5092_v33 = vpack.c.bf16 %v283_v25, %v282_v24 }
  0x20   : > { %4445 = vmatmul.mubr.msk.bf16.vlgmr.msra.gmra.mxu1 %vm341_vm0, %v5057_v17  ;;  %4497 = vmatpush3.bf16.msra.mxu0 %v4798_v3  ;;  %v285_v29 = vld [vmem:[%s5038_s17 + $0x69] sm:$0xff]  ;;  %v5094_v34 = vpack.c.bf16 %v299_v27, %v298_v26  ;;  %v286_v37 = vld [vmem:[%s5038_s17 + $0x79] sm:$0xff]  ;;  %v287_v38 = vld [vmem:[%s5038_s17 + $0x81] sm:$0xff] }
  0x21   : > { %4461 = vmatpush3.bf16.msra.mxu1 %v4797_v2  ;;  %4432 = vmatprep.mubr.msk.bf16.mxu0 %vm341_vm0, %v5066_v21  ;;  %v301_v31 = vld [vmem:[%s5038_s17 + $0x129] sm:$0xff]  ;;  %v5096_v35 = vpack.c.bf16 %v285_v29, %v284_v28  ;;  %v302_v39 = vld [vmem:[%s5038_s17 + $0x139] sm:$0xff]  ;;  %v303_v40 = vld [vmem:[%s5038_s17 + $0x141] sm:$0xff]  ;;  %v5120_v46 = vpack.c.bf16 %v287_v38, %v286_v37 }
  0x22   : > { %4448 = vmatprep.mubr.msk.bf16.mxu1 %vm341_vm0, %v5068_v22  ;;  %4462 = vmatprep.subr.bf16.mxu1 %v4799_v11  ;;  %v5098_v36 = vpack.c.bf16 %v301_v31, %v300_v30  ;;  %v288_v41 = vld [vmem:[%s5038_s17 + $0x91] sm:$0xff]  ;;  %v289_v42 = vld [vmem:[%s5038_s17 + $0x99] sm:$0xff]  ;;  %v5122_v47 = vpack.c.bf16 %v303_v40, %v302_v39  ;;  %v290_v50 = vld [vmem:[%s5038_s17 + $0xa9] sm:$0xff] }
  0x23   : > { %4498 = vmatprep.subr.bf16.mxu0 %v4800_v23  ;;  %v304_v44 = vld [vmem:[%s5038_s17 + $0x151] sm:$0xff]  ;;  %v305_v45 = vld [vmem:[%s5038_s17 + $0x159] sm:$0xff]  ;;  %v5124_v48 = vpack.c.bf16 %v289_v42, %v288_v41  ;;  %v306_v52 = vld [vmem:[%s5038_s17 + $0x169] sm:$0xff] }
  0x24   : > { %4499 = vmatpush3.bf16.msra.mxu0 %v4800_v23  ;;  %v5126_v49 = vpack.c.bf16 %v305_v45, %v304_v44  ;;  %v291_v51 = vld [vmem:[%s5038_s17 + $0xb1] sm:$0xff]  ;;  %v772_v54 = vld [vmem:[%s5038_s17 + $0x2] sm:$0xff]  ;;  %v774_v62 = vld [vmem:[%s5038_s17 + $0x1a] sm:$0xff] }
  0x25   : > { %4463 = vmatpush3.bf16.msra.mxu1 %v4799_v11  ;;  %4568 = vmatprep.subr.bf16.mxu0 %v4802_v43  ;;  %v307_v53 = vld [vmem:[%s5038_s17 + $0x171] sm:$0xff]  ;;  %v224_v56 = vld [vmem:[%s5038_s17] sm:$0xff]  ;;  %v225_v57 = vld [vmem:[%s5038_s17 + $0x8] sm:$0xff]  ;;  %v5144_v58 = vpack.c.bf16 %v291_v51, %v290_v50 }
  0x26   : > { %4532 = vmatprep.subr.bf16.mxu1 %v5090_v32  ;;  %v773_v55 = vld [vmem:[%s5038_s17 + $0xa] sm:$0xff]  ;;  %v5146_v59 = vpack.c.bf16 %v307_v53, %v306_v52  ;;  %v256_v61 = vpack.c.bf16 %v225_v57, %v224_v56  ;;  %v775_v63 = vld [vmem:[%s5038_s17 + $0x22] sm:$0xff]  ;;  %v226_v0 = vld [vmem:[%s5038_s17 + $0x18] sm:$0xff] }
  0x27   : > { %4433 = vmatmul.mubr.msk.bf16.gmra.mxu0 %vm341_vm0, %v5092_v33  ;;  %v804_v60 = vpack.c.bf16 %v773_v55, %v772_v54  ;;  %v227_v1 = vld [vmem:[%s5038_s17 + $0x20] sm:$0xff]  ;;  %v228_v2 = vld [vmem:[%s5038_s17 + $0x30] sm:$0xff]  ;;  %v229_v3 = vld [vmem:[%s5038_s17 + $0x38] sm:$0xff]  ;;  %v5160_v4 = vpack.c.bf16 %v775_v63, %v774_v62 }
  0x28   : > { %4449 = vmatmul.mubr.msk.bf16.gmra.mxu1 %vm341_vm0, %v5094_v34  ;;  %4436 = vmatprep.mubr.msk.bf16.mxu0 %vm341_vm0, %v5096_v35  ;;  %v776_v5 = vld [vmem:[%s5038_s17 + $0x32] sm:$0xff]  ;;  %v777_v6 = vld [vmem:[%s5038_s17 + $0x3a] sm:$0xff]  ;;  %v5164_v7 = vpack.c.bf16 %v227_v1, %v226_v0  ;;  %v5166_v8 = vpack.c.bf16 %v229_v3, %v228_v2  ;;  %v778_v10 = vld [vmem:[%s5038_s17 + $0x4a] sm:$0xff] }
  0x29   : > { %4452 = vmatprep.mubr.msk.bf16.mxu1 %vm341_vm0, %v5098_v36  ;;  %v5168_v9 = vpack.c.bf16 %v777_v6, %v776_v5  ;;  %v779_v11 = vld [vmem:[%s5038_s17 + $0x52] sm:$0xff]  ;;  %v230_v15 = vld [vmem:[%s5038_s17 + $0x48] sm:$0xff]  ;;  %v4804_v19 = vld [vmem:[%s6654_s1 + $0x40] sm:$0xff]  }
  0x2a   : > { %v4803_v14 = vld [vmem:[%s6654_s1 + $0x30] sm:$0xff]   ;;  %v780_v18 = vld [vmem:[%s5038_s17 + $0x62] sm:$0xff]  ;;  %v5201_v26 = vld [vmem:[%s6654_s1 + $0x58] sm:$0xff]   ;;  %v5203_v27 = vpack.c.bf16 %v779_v11, %v778_v10 }
  0x2b   : > { %v231_v16 = vld [vmem:[%s5038_s17 + $0x50] sm:$0xff]  ;;  %v5192_v23 = vld [vmem:[%s6654_s1 + $0x68] sm:$0xff]   ;;  %v232_v24 = vld [vmem:[%s5038_s17 + $0x60] sm:$0xff] }
  0x2c   : > { %v781_v20 = vld [vmem:[%s5038_s17 + $0x6a] sm:$0xff]  ;;  %v5205_v28 = vpack.c.bf16 %v231_v16, %v230_v15  ;;  %v234_v31 = vld [vmem:[%s5038_s17 + $0x78] sm:$0xff]  ;;  %v783_v37 = vld [vmem:[%s5038_s17 + $0x82] sm:$0xff] }
  0x2d   : > { %v233_v25 = vld [vmem:[%s5038_s17 + $0x68] sm:$0xff]  ;;  %v5207_v29 = vpack.c.bf16 %v781_v20, %v780_v18  ;;  %v235_v38 = vld [vmem:[%s5038_s17 + $0x80] sm:$0xff]  ;;  %v784_v39 = vld [vmem:[%s5038_s17 + $0x92] sm:$0xff] }
  0x2e   : > { %v5209_v30 = vpack.c.bf16 %v233_v25, %v232_v24  ;;  %v785_v40 = vld [vmem:[%s5038_s17 + $0x9a] sm:$0xff]  ;;  %v236_v41 = vld [vmem:[%s5038_s17 + $0x90] sm:$0xff]  ;;  %v5231_v44 = vpack.c.bf16 %v235_v38, %v234_v31  ;;  %v238_v51 = vld [vmem:[%s5038_s17 + $0xa8] sm:$0xff] }
  0x2f   : > { %4437 = vmatmul.mubr.msk.bf16.gmra.mxu0 %vm341_vm0, %v5120_v46  ;;  %v237_v42 = vld [vmem:[%s5038_s17 + $0x98] sm:$0xff]  ;;  %v5233_v45 = vpack.c.bf16 %v785_v40, %v784_v39  ;;  %v786_v52 = vld [vmem:[%s5038_s17 + $0xaa] sm:$0xff]  ;;  %v788_v55 = vld [vmem:[%s5038_s17 + $0xc2] sm:$0xff] }
  0x30   : > { %4453 = vmatmul.mubr.msk.bf16.gmra.mxu1 %vm341_vm0, %v5122_v47  ;;  %4440 = vmatprep.mubr.msk.bf16.mxu0 %vm341_vm0, %v5124_v48  ;;  %v5235_v50 = vpack.c.bf16 %v237_v42, %v236_v41  ;;  %v787_v53 = vld [vmem:[%s5038_s17 + $0xb2] sm:$0xff]  ;;  %v789_v56 = vld [vmem:[%s5038_s17 + $0xca] sm:$0xff]  ;;  %v240_v57 = vld [vmem:[%s5038_s17 + $0xc0] sm:$0xff] }
  0x31   : > { %4456 = vmatprep.mubr.msk.bf16.mxu1 %vm341_vm0, %v5126_v49  ;;  %v239_v54 = vld [vmem:[%s5038_s17 + $0xb0] sm:$0xff]  ;;  %v5257_v63 = vpack.c.bf16 %v789_v56, %v788_v55  ;;  %v242_v1 = vld [vmem:[%s5038_s17 + $0xd8] sm:$0xff]  ;;  %v791_v3 = vld [vmem:[%s5038_s17 + $0xe2] sm:$0xff] }
  0x32   : > { %v5255_v62 = vpack.c.bf16 %v239_v54, %v238_v51  ;;  %v790_v2 = vld [vmem:[%s5038_s17 + $0xda] sm:$0xff]  ;;  %v792_v6 = vld [vmem:[%s5038_s17 + $0xf2] sm:$0xff]  ;;  %v246_v20 = vld [vmem:[%s5038_s17 + $0x108] sm:$0xff] }
  0x33   : > { %v243_v5 = vld [vmem:[%s5038_s17 + $0xe0] sm:$0xff]  ;;  %v244_v11 = vld [vmem:[%s5038_s17 + $0xf0] sm:$0xff]  ;;  %v5277_v15 = vpack.c.bf16 %v791_v3, %v790_v2  ;;  %v249_v39 = vld [vmem:[%s5038_s17 + $0x128] sm:$0xff] }
  0x34   : > { %v793_v10 = vld [vmem:[%s5038_s17 + $0xfa] sm:$0xff]  ;;  %v5279_v16 = vpack.c.bf16 %v243_v5, %v242_v1  ;;  %v794_v24 = vld [vmem:[%s5038_s17 + $0x10a] sm:$0xff]  ;;  %v795_v25 = vld [vmem:[%s5038_s17 + $0x112] sm:$0xff] }
  0x35   : > { %v5281_v18 = vpack.c.bf16 %v793_v10, %v792_v6  ;;  %v247_v31 = vld [vmem:[%s5038_s17 + $0x110] sm:$0xff]  ;;  %v248_v38 = vld [vmem:[%s5038_s17 + $0x120] sm:$0xff]  ;;  %v5301_v40 = vpack.c.bf16 %v795_v25, %v794_v24  ;;  %v253_v1 = vld [vmem:[%s5038_s17 + $0x158] sm:$0xff] }
  0x36   : > { %v5303_v41 = vpack.c.bf16 %v247_v31, %v246_v20  ;;  %v5307_v51 = vpack.c.bf16 %v249_v39, %v248_v38  ;;  %v799_v54 = vld [vmem:[%s5038_s17 + $0x142] sm:$0xff]  ;;  %v800_v56 = vld [vmem:[%s5038_s17 + $0x152] sm:$0xff]  ;;  %v802_v10 = vld [vmem:[%s5038_s17 + $0x16a] sm:$0xff] }
  0x37   : > { %4441 = vmatmul.mubr.msk.bf16.gmra.mxu0 %vm341_vm0, %v5144_v58  ;;  %v251_v55 = vld [vmem:[%s5038_s17 + $0x140] sm:$0xff]  ;;  %v255_v20 = vld [vmem:[%s5038_s17 + $0x170] sm:$0xff] }
  0x38   : > { %4457 = vmatmul.mubr.msk.bf16.gmra.mxu1 %vm341_vm0, %v5146_v59  ;;  %4500 = vmatprep.mubr.msk.bf16.mxu0 %vm341_vm0, %v804_v60  ;;  %v241_v60 = vld [vmem:[%s5038_s17 + $0xc8] sm:$0xff]  ;;  %v4807_v31 = vld [vmem:[%s6654_s1 + $0x50] sm:$0xff]   ;;  %v4122_v38 = vld [vmem:[%s5038_s17 + $0x1a0] sm:$0xff] }
  0x39   : > { %4464 = vmatprep.mubr.msk.bf16.mxu1 %vm341_vm0, %v256_v61  ;;  %v5253_v61 = vpack.c.bf16 %v787_v53, %v786_v52  ;;  %v5259_v0 = vpack.c.bf16 %v241_v60, %v240_v57  ;;  %v250_v52 = vld [vmem:[%s5038_s17 + $0x138] sm:$0xff]  ;;  %v252_v60 = vld [vmem:[%s5038_s17 + $0x150] sm:$0xff] }
  0x3a   : > { %v798_v53 = vld [vmem:[%s5038_s17 + $0x13a] sm:$0xff]  ;;  %v5327_v3 = vpack.c.bf16 %v251_v55, %v250_v52  ;;  %v5331_v6 = vpack.c.bf16 %v253_v1, %v252_v60  ;;  %v4145_v52 = vld [vmem:[%s5038_s17 + $0x31] sm:$0xff] }
  0x3b   : > { %v801_v57 = vld [vmem:[%s5038_s17 + $0x15a] sm:$0xff]  ;;  %v5325_v2 = vpack.c.bf16 %v799_v54, %v798_v53 }
  0x3c   : > { %v5329_v5 = vpack.c.bf16 %v801_v57, %v800_v56  ;;  %v4146_v53 = vld [vmem:[%s5038_s17 + $0x39] sm:$0xff] }
  0x3d   : > { %v2336_v1 = vpack.c.bf16 %v4146_v53, %v4145_v52 }
  0x3f   : > { %4501 = vmatmul.mubr.msk.bf16.vlgmr.msra.gmra.mxu0 %vm341_vm0, %v5160_v4 }
  0x40   : > { %4465 = vmatmul.mubr.msk.bf16.vlgmr.msra.gmra.mxu1 %vm341_vm0, %v5164_v7  ;;  %4569 = vmatpush3.bf16.msra.mxu0 %v4802_v43 }
  0x41   : > { %4533 = vmatpush3.bf16.msra.mxu1 %v5090_v32  ;;  %4468 = vmatprep.mubr.msk.bf16.mxu1 %vm341_vm0, %v5166_v8  ;;  %v782_v32 = vld [vmem:[%s5038_s17 + $0x7a] sm:$0xff] }
  0x42   : > { %4504 = vmatprep.mubr.msk.bf16.mxu0 %vm341_vm0, %v5168_v9  ;;  %4534 = vmatprep.subr.bf16.mxu1 %v4803_v14  ;;  %v5229_v43 = vpack.c.bf16 %v783_v37, %v782_v32  ;;  %v796_v32 = vld [vmem:[%s5038_s17 + $0x122] sm:$0xff]  ;;  %v797_v37 = vld [vmem:[%s5038_s17 + $0x12a] sm:$0xff] }
  0x43   : > { %4570 = vmatprep.subr.bf16.mxu0 %v4804_v19  ;;  %v5305_v42 = vpack.c.bf16 %v797_v37, %v796_v32  ;;  %v4808_v32 = vld [vmem:[%s6654_s1 + $0x60] sm:$0xff]   ;;  %v4121_v37 = vld [vmem:[%s5038_s17 + $0x198] sm:$0xff] }
  0x44   : > { %4571 = vmatpush3.bf16.msra.mxu0 %v4804_v19  ;;  %v2045_v55 = vpack.c.bf16 %v4122_v38, %v4121_v37  ;;  %v4153_v37 = vld [vmem:[%s5038_s17 + $0x91] sm:$0xff]  ;;  %v4154_v38 = vld [vmem:[%s5038_s17 + $0x99] sm:$0xff] }
  0x45   : > { %4535 = vmatpush3.bf16.msra.mxu1 %v4803_v14  ;;  %4640 = vmatprep.subr.bf16.mxu0 %v5192_v23  ;;  %v245_v14 = vld [vmem:[%s5038_s17 + $0xf8] sm:$0xff] }
  0x46   : > { %4604 = vmatprep.subr.bf16.mxu1 %v5201_v26  ;;  %v5283_v19 = vpack.c.bf16 %v245_v14, %v244_v11  ;;  %v803_v11 = vld [vmem:[%s5038_s17 + $0x172] sm:$0xff]  ;;  %v254_v14 = vld [vmem:[%s5038_s17 + $0x168] sm:$0xff] }
  0x47   : > { %4505 = vmatmul.mubr.msk.bf16.gmra.mxu0 %vm341_vm0, %v5203_v27  ;;  %v5345_v24 = vpack.c.bf16 %v803_v11, %v802_v10  ;;  %v5347_v25 = vpack.c.bf16 %v255_v20, %v254_v14  ;;  %v4147_v10 = vld [vmem:[%s5038_s17 + $0x49] sm:$0xff]  ;;  %v4148_v11 = vld [vmem:[%s5038_s17 + $0x51] sm:$0xff]  ;;  %v4149_v20 = vld [vmem:[%s5038_s17 + $0x61] sm:$0xff] }
  0x48   : > { %4469 = vmatmul.mubr.msk.bf16.gmra.mxu1 %vm341_vm0, %v5205_v28  ;;  %4508 = vmatprep.mubr.msk.bf16.mxu0 %vm341_vm0, %v5207_v29 }
  0x49   : > { %4472 = vmatprep.mubr.msk.bf16.mxu1 %vm341_vm0, %v5209_v30 }
  0x4f   : > { %4509 = vmatmul.mubr.msk.bf16.gmra.mxu0 %vm341_vm0, %v5229_v43 }
  0x50   : > { %4473 = vmatmul.mubr.msk.bf16.gmra.mxu1 %vm341_vm0, %v5231_v44  ;;  %4512 = vmatprep.mubr.msk.bf16.mxu0 %vm341_vm0, %v5233_v45 }
  0x51   : > { %4476 = vmatprep.mubr.msk.bf16.mxu1 %vm341_vm0, %v5235_v50 }
  0x57   : > { %4513 = vmatmul.mubr.msk.bf16.gmra.mxu0 %vm341_vm0, %v5253_v61 }
  0x58   : > { %4477 = vmatmul.mubr.msk.bf16.gmra.mxu1 %vm341_vm0, %v5255_v62  ;;  %4516 = vmatprep.mubr.msk.bf16.mxu0 %vm341_vm0, %v5257_v63 }
  0x59   : > { %4480 = vmatprep.mubr.msk.bf16.mxu1 %vm341_vm0, %v5259_v0 }
  0x5f   : > { %4517 = vmatmul.mubr.msk.bf16.gmra.mxu0 %vm341_vm0, %v5277_v15 }
  0x60   : > { %4481 = vmatmul.mubr.msk.bf16.gmra.mxu1 %vm341_vm0, %v5279_v16  ;;  %4520 = vmatprep.mubr.msk.bf16.mxu0 %vm341_vm0, %v5281_v18 }
  0x61   : > { %4484 = vmatprep.mubr.msk.bf16.mxu1 %vm341_vm0, %v5283_v19 }
  0x67   : > { %4521 = vmatmul.mubr.msk.bf16.gmra.mxu0 %vm341_vm0, %v5301_v40 }
  0x68   : > { %4485 = vmatmul.mubr.msk.bf16.gmra.mxu1 %vm341_vm0, %v5303_v41  ;;  %4524 = vmatprep.mubr.msk.bf16.mxu0 %vm341_vm0, %v5305_v42 }
  0x69   : > { %4488 = vmatprep.mubr.msk.bf16.mxu1 %vm341_vm0, %v5307_v51 }
  0x6f   : > { %4525 = vmatmul.mubr.msk.bf16.gmra.mxu0 %vm341_vm0, %v5325_v2 }
  0x70   : > { %4489 = vmatmul.mubr.msk.bf16.gmra.mxu1 %vm341_vm0, %v5327_v3  ;;  %4528 = vmatprep.mubr.msk.bf16.mxu0 %vm341_vm0, %v5329_v5 }
  0x71   : > { %4492 = vmatprep.mubr.msk.bf16.mxu1 %vm341_vm0, %v5331_v6 }
  0x77   : > { %4529 = vmatmul.mubr.msk.bf16.gmra.mxu0 %vm341_vm0, %v5345_v24 }
  0x78   : > { %4493 = vmatmul.mubr.msk.bf16.gmra.mxu1 %vm341_vm0, %v5347_v25  ;;  %4572 = vmatprep.mubr.msk.bf16.mxu0 %vm341_vm0, %v5051_v13  ;;  %v4810_v13 = vld [vmem:[%s6654_s1 + $0x88] sm:$0xff]  }
  0x79   : > { %4536 = vmatprep.mubr.msk.bf16.mxu1 %vm341_vm0, %v5164_v7 }
  0x7f   : > { %4573 = vmatmul.mubr.msk.bf16.vlgmr.msra.gmra.mxu0 %vm341_vm0, %v5066_v21  ;;  %v4809_v21 = vld [vmem:[%s6654_s1 + $0x78] sm:$0xff]  }
  0x80   : > { %4537 = vmatmul.mubr.msk.bf16.vlgmr.msra.gmra.mxu1 %vm341_vm0, %v5166_v8  ;;  %4641 = vmatpush3.bf16.msra.mxu0 %v5192_v23 }
  0x81   : > { %4605 = vmatpush3.bf16.msra.mxu1 %v5201_v26  ;;  %4540 = vmatprep.mubr.msk.bf16.mxu1 %vm341_vm0, %v5205_v28 }
  0x82   : > { %4576 = vmatprep.mubr.msk.bf16.mxu0 %vm341_vm0, %v5092_v33  ;;  %4606 = vmatprep.subr.bf16.mxu1 %v4807_v31  ;;  %v3960_v33 = vld [vmem:[%s5038_s17 + $0x188] sm:$0xff] }
  0x83   : > { %4642 = vmatprep.subr.bf16.mxu0 %v4808_v32 }
  0x84   : > { %4643 = vmatpush3.bf16.msra.mxu0 %v4808_v32  ;;  %v2337_v32 = vpack.c.bf16 %v4148_v11, %v4147_v10 }
  0x85   : > { %4607 = vmatpush3.bf16.msra.mxu1 %v4807_v31  ;;  %4712 = vmatprep.subr.bf16.mxu0 %v4810_v13 }
  0x86   : > { %4676 = vmatprep.subr.bf16.mxu1 %v4809_v21 }
  0x87   : > { %4577 = vmatmul.mubr.msk.bf16.gmra.mxu0 %vm341_vm0, %v5096_v35 }
  0x88   : > { %4541 = vmatmul.mubr.msk.bf16.gmra.mxu1 %vm341_vm0, %v5209_v30  ;;  %4580 = vmatprep.mubr.msk.bf16.mxu0 %vm341_vm0, %v5120_v46  ;;  %v4812_v46 = vld [vmem:[%s6654_s1 + $0x80] sm:$0xff]  }
  0x89   : > { %4544 = vmatprep.mubr.msk.bf16.mxu1 %vm341_vm0, %v5231_v44 }
  0x8f   : > { %4581 = vmatmul.mubr.msk.bf16.gmra.mxu0 %vm341_vm0, %v5124_v48 }
  0x90   : > { %4545 = vmatmul.mubr.msk.bf16.gmra.mxu1 %vm341_vm0, %v5235_v50  ;;  %4584 = vmatprep.mubr.msk.bf16.mxu0 %vm341_vm0, %v5144_v58 }
  0x91   : > { %4548 = vmatprep.mubr.msk.bf16.mxu1 %vm341_vm0, %v5255_v62 }
  0x97   : > { %4585 = vmatmul.mubr.msk.bf16.gmra.mxu0 %vm341_vm0, %v5049_v12  ;;  %v4013_v12 = vld [vmem:[%s5038_s17 + $0x181] sm:$0xff] }
  0x98   : > { %4549 = vmatmul.mubr.msk.bf16.gmra.mxu1 %vm341_vm0, %v5259_v0  ;;  %4588 = vmatprep.mubr.msk.bf16.mxu0 %vm341_vm0, %v5057_v17  ;;  %v4014_v17 = vld [vmem:[%s5038_s17 + $0x189] sm:$0xff] }
  0x99   : > { %4552 = vmatprep.mubr.msk.bf16.mxu1 %vm341_vm0, %v5279_v16 }
  0x9f   : > { %4589 = vmatmul.mubr.msk.bf16.gmra.mxu0 %vm341_vm0, %v5068_v22  ;;  %v3959_v22 = vld [vmem:[%s5038_s17 + $0x180] sm:$0xff] }
  0xa0   : > { %4553 = vmatmul.mubr.msk.bf16.gmra.mxu1 %vm341_vm0, %v5283_v19  ;;  %4592 = vmatprep.mubr.msk.bf16.mxu0 %vm341_vm0, %v5094_v34  ;;  %v5431_v34 = vpack.c.bf16 %v4014_v17, %v4013_v12  ;;  %v1126_v35 = vpack.c.bf16 %v3960_v33, %v3959_v22 }
  0xa1   : > { %4556 = vmatprep.mubr.msk.bf16.mxu1 %vm341_vm0, %v5303_v41 }
  0xa7   : > { %4593 = vmatmul.mubr.msk.bf16.gmra.mxu0 %vm341_vm0, %v5098_v36  ;;  %v4811_v36 = vld [vmem:[%s6654_s1 + $0x70] sm:$0xff]  }
  0xa8   : > { %4557 = vmatmul.mubr.msk.bf16.gmra.mxu1 %vm341_vm0, %v5307_v51  ;;  %4596 = vmatprep.mubr.msk.bf16.mxu0 %vm341_vm0, %v5122_v47 }
  0xa9   : > { %4560 = vmatprep.mubr.msk.bf16.mxu1 %vm341_vm0, %v5327_v3 }
  0xaf   : > { %4597 = vmatmul.mubr.msk.bf16.gmra.mxu0 %vm341_vm0, %v5126_v49 }
  0xb0   : > { %4561 = vmatmul.mubr.msk.bf16.gmra.mxu1 %vm341_vm0, %v5331_v6  ;;  %4600 = vmatprep.mubr.msk.bf16.mxu0 %vm341_vm0, %v5146_v59 }
  0xb1   : > { %4564 = vmatprep.mubr.msk.bf16.mxu1 %vm341_vm0, %v5347_v25 }
  0xb7   : > { %4601 = vmatmul.mubr.msk.bf16.gmra.mxu0 %vm341_vm0, %v5431_v34 }
  0xb8   : > { %4565 = vmatmul.mubr.msk.bf16.gmra.mxu1 %vm341_vm0, %v1126_v35  ;;  %4644 = vmatprep.mubr.msk.bf16.mxu0 %vm341_vm0, %v5166_v8 }
  0xb9   : > { %4608 = vmatprep.mubr.msk.bf16.mxu1 %vm341_vm0, %v5160_v4 }
  0xbf   : > { %4645 = vmatmul.mubr.msk.bf16.vlgmr.msra.gmra.mxu0 %vm341_vm0, %v5205_v28 }
  0xc0   : > { %4609 = vmatmul.mubr.msk.bf16.vlgmr.msra.gmra.mxu1 %vm341_vm0, %v5168_v9  ;;  %4713 = vmatpush3.bf16.msra.mxu0 %v4810_v13 }
  0xc1   : > { %4677 = vmatpush3.bf16.msra.mxu1 %v4809_v21  ;;  %4612 = vmatprep.mubr.msk.bf16.mxu1 %vm341_vm0, %v5203_v27 }
  0xc2   : > { %4648 = vmatprep.mubr.msk.bf16.mxu0 %vm341_vm0, %v5209_v30  ;;  %4678 = vmatprep.subr.bf16.mxu1 %v4811_v36 }
  0xc3   : > { %4714 = vmatprep.subr.bf16.mxu0 %v4812_v46 }
  0xc4   : > { %4715 = vmatpush3.bf16.msra.mxu0 %v4812_v46 }
  0xc5   : > { %4679 = vmatpush3.bf16.msra.mxu1 %v4811_v36  ;;  %v4152_v36 = vld [vmem:[%s5038_s17 + $0x81] sm:$0xff] }
  0xc7   : > { %4649 = vmatmul.mubr.msk.bf16.gmra.mxu0 %vm341_vm0, %v5231_v44 }
  0xc8   : > { %4613 = vmatmul.mubr.msk.bf16.gmra.mxu1 %vm341_vm0, %v5207_v29  ;;  %4652 = vmatprep.mubr.msk.bf16.mxu0 %vm341_vm0, %v5235_v50 }
  0xc9   : > { %4616 = vmatprep.mubr.msk.bf16.mxu1 %vm341_vm0, %v5229_v43 }
  0xcf   : > { %4653 = vmatmul.mubr.msk.bf16.gmra.mxu0 %vm341_vm0, %v5255_v62 }
  0xd0   : > { %4617 = vmatmul.mubr.msk.bf16.gmra.mxu1 %vm341_vm0, %v5233_v45  ;;  %4656 = vmatprep.mubr.msk.bf16.mxu0 %vm341_vm0, %v5259_v0 }
  0xd1   : > { %4620 = vmatprep.mubr.msk.bf16.mxu1 %vm341_vm0, %v5253_v61 }
  0xd7   : > { %4657 = vmatmul.mubr.msk.bf16.gmra.mxu0 %vm341_vm0, %v5279_v16 }
  0xd8   : > { %4621 = vmatmul.mubr.msk.bf16.gmra.mxu1 %vm341_vm0, %v5257_v63  ;;  %4660 = vmatprep.mubr.msk.bf16.mxu0 %vm341_vm0, %v5283_v19 }
  0xd9   : > { %4624 = vmatprep.mubr.msk.bf16.mxu1 %vm341_vm0, %v5277_v15 }
  0xdf   : > { %v5478_v47 = vpop.f32.mrf.mxu0  ;;  %4661 = vmatmul.mubr.msk.bf16.gmra.mxu0 %vm341_vm0, %v5303_v41  ;;  %v4067_v41 = vld [vmem:[%s5038_s17 + $0x182] sm:$0xff] }
  0xe0   : > { %v5482_v48 = vpop.f32.mrf.mxu1  ;;  %4625 = vmatmul.mubr.msk.bf16.gmra.mxu1 %vm341_vm0, %v5281_v18  ;;  %4664 = vmatprep.mubr.msk.bf16.mxu0 %vm341_vm0, %v5307_v51 }
  0xe1   : > { %v5488_v49 = vpop.f32.mrf.mxu0  ;;  %4628 = vmatprep.mubr.msk.bf16.mxu1 %vm341_vm0, %v5301_v40 }
  0xe2   : > { %v5492_v58 = vpop.f32.mrf.mxu1 }
  0xe3   : > { %v5494_v59 = vpop.f32.mrf.mxu0 }
  0xe4   : > { %v5496_v4 = vpop.f32.mrf.mxu1 }
  0xe5   : > { %v5498_v7 = vpop.f32.mrf.mxu0 }
  0xe6   : > { %v5500_v8 = vpop.f32.mrf.mxu1 }
  0xe7   : > { %v5502_v23 = vpop.f32.mrf.mxu0  ;;  %4665 = vmatmul.mubr.msk.bf16.gmra.mxu0 %vm341_vm0, %v5327_v3 }
  0xe8   : > { %v5506_v26 = vpop.f32.mrf.mxu1  ;;  %4629 = vmatmul.mubr.msk.bf16.gmra.mxu1 %vm341_vm0, %v5305_v42  ;;  %4668 = vmatprep.mubr.msk.bf16.mxu0 %vm341_vm0, %v5331_v6  ;;  %v4068_v42 = vld [vmem:[%s5038_s17 + $0x18a] sm:$0xff] }
  0xe9   : > { %v5512_v28 = vpop.f32.mrf.mxu0  ;;  %4632 = vmatprep.mubr.msk.bf16.mxu1 %vm341_vm0, %v5325_v2  ;;  %v5551_v57 = vpack.c.bf16 %v4068_v42, %v4067_v41 }
  0xea   : > { %v5516_v30 = vpop.f32.mrf.mxu1 }
  0xeb   : > { %v5518_v44 = vpop.f32.mrf.mxu0 }
  0xec   : > { %v5520_v50 = vpop.f32.mrf.mxu1 }
  0xed   : > { %v5522_v62 = vpop.f32.mrf.mxu0 }
  0xee   : > { %v5524_v0 = vpop.f32.mrf.mxu1 }
  0xef   : > { %v5526_v16 = vpop.f32.mrf.mxu0  ;;  %4669 = vmatmul.mubr.msk.bf16.gmra.mxu0 %vm341_vm0, %v5347_v25 }
  0xf0   : > { %v5530_v19 = vpop.f32.mrf.mxu1  ;;  %4633 = vmatmul.mubr.msk.bf16.gmra.mxu1 %vm341_vm0, %v5329_v5  ;;  %4672 = vmatprep.mubr.msk.bf16.mxu0 %vm341_vm0, %v1126_v35  ;;  %v4151_v35 = vld [vmem:[%s5038_s17 + $0x79] sm:$0xff] }
  0xf1   : > { %v5537_v39 = vpop.f32.mrf.mxu0  ;;  %4636 = vmatprep.mubr.msk.bf16.mxu1 %vm341_vm0, %v5345_v24  ;;  %v4150_v24 = vld [vmem:[%s5038_s17 + $0x69] sm:$0xff]  ;;  %v2339_v53 = vpack.c.bf16 %v4152_v36, %v4151_v35 }
  0xf2   : > { %v5543_v51 = vpop.f32.mrf.mxu1  ;;  %v2338_v13 = vpack.c.bf16 %v4150_v24, %v4149_v20 }
  0xf3   : > { %v5547_v54 = vpop.f32.mrf.mxu0 }
  0xf4   : > { %v5549_v56 = vpop.f32.mrf.mxu1 }
  0xf5   : > { %v5553_v60 = vpop.f32.mrf.mxu0 }
  0xf6   : > { %v5555_v2 = vpop.f32.mrf.mxu1 }
  0xf7   : > { %v5557_v3 = vpop.f32.mrf.mxu0  ;;  %4673 = vmatmul.mubr.msk.bf16.gmra.mxu0 %vm341_vm0, %v2045_v55 }
  0xf8   : > { %v5560_v5 = vpop.f32.mrf.mxu1  ;;  %4637 = vmatmul.mubr.msk.bf16.gmra.mxu1 %vm341_vm0, %v5551_v57  ;;  %4716 = vmatprep.mubr.msk.bf16.mxu0 %vm341_vm0, %v5168_v9 }
  0xf9   : > { %v5566_v6 = vpop.f32.mrf.mxu0  ;;  %4680 = vmatprep.mubr.msk.bf16.mxu1 %vm341_vm0, %v2336_v1  ;;  %v2340_v1 = vpack.c.bf16 %v4154_v38, %v4153_v37 }
  0xfa   : > { %v5571_v14 = vpop.f32.mrf.mxu1 }
  0xfb   : > { %v5575_v25 = vpop.f32.mrf.mxu0 }
  0xfc   : > { %v5577_v31 = vpop.f32.mrf.mxu1 }
  0xfd   : > { %v5579_v9 = vpop.f32.mrf.mxu0 }
  0xfe   : > { %v5581_v21 = vpop.f32.mrf.mxu1 }
  0xff   : > { %v4502_v12 = vpop.f32.mrf.mxu0  ;;  %4717 = vmatmul.mubr.msk.bf16.vlgmr.msra.gmra.mxu0 %vm341_vm0, %v5203_v27 }
 0x100   : > { %v4466_v17 = vpop.f32.mrf.mxu1  ;;  %4681 = vmatmul.mubr.msk.bf16.vlgmr.msra.gmra.mxu1 %vm341_vm0, %v2337_v32  ;;  %4720 = vmatprep.mubr.msk.bf16.mxu0 %vm341_vm0, %v5207_v29 }
 0x101   : > { %v654_v22 = vadd.f32 %v4466_v17, %v5478_v47  ;;  %v919_v33 = vpop.f32.mrf.mxu0  ;;  %4684 = vmatprep.mubr.msk.bf16.mxu1 %vm341_vm0, %v2338_v13  ;;  %v4156_v17 = vld [vmem:[%s5038_s17 + $0xb1] sm:$0xff] }
 0x102   : > { %v645_v46 = vpop.f32.mrf.mxu1 }
 0x103   : > { %v5594_v41 = vadd.f32 %v4502_v12, %v654_v22  ;;  %v646_v27 = vadd.f32 %v645_v46, %v5488_v49  ;;  %v4503_v42 = vpop.f32.mrf.mxu0  ;;  %v4155_v12 = vld [vmem:[%s5038_s17 + $0xa9] sm:$0xff]  ;;  %v4157_v22 = vld [vmem:[%s5038_s17 + $0xc1] sm:$0xff] }
 0x104   : > { %v4467_v52 = vpop.f32.mrf.mxu1  ;;  %v2341_v37 = vpack.c.bf16 %v4156_v17, %v4155_v12 }
 0x105   : > { %v5597_v55 = vadd.f32 %v919_v33, %v646_v27  ;;  %v657_v29 = vadd.f32 %v4467_v52, %v5494_v59  ;;  %v922_v47 = vpop.f32.mrf.mxu0  ;;  %v4158_v33 = vld [vmem:[%s5038_s17 + $0xc9] sm:$0xff] }
 0x106   : > { %v648_v10 = vpop.f32.mrf.mxu1  ;;  %v2342_v27 = vpack.c.bf16 %v4158_v33, %v4157_v22 }
 0x107   : > { %v5600_v11 = vadd.f32 %v4503_v42, %v657_v29  ;;  %v649_v20 = vadd.f32 %v648_v10, %v5498_v7  ;;  %v4506_v24 = vpop.f32.mrf.mxu0  ;;  %4721 = vmatmul.mubr.msk.bf16.gmra.mxu0 %vm341_vm0, %v5229_v43  ;;  %v4159_v10 = vld [vmem:[%s5038_s17 + $0xd9] sm:$0xff] }
 0x108   : > { %v4470_v49 = vpop.f32.mrf.mxu1  ;;  %4685 = vmatmul.mubr.msk.bf16.gmra.mxu1 %vm341_vm0, %v2339_v53  ;;  %4724 = vmatprep.mubr.msk.bf16.mxu0 %vm341_vm0, %v5233_v45 }
 0x109   : > { %v5608_v59 = vadd.f32 %v922_v47, %v649_v20  ;;  %v670_v32 = vadd.f32 %v4470_v49, %v5502_v23  ;;  %v935_v13 = vpop.f32.mrf.mxu0  ;;  %4688 = vmatprep.mubr.msk.bf16.mxu1 %vm341_vm0, %v2340_v1  ;;  %v4160_v20 = vld [vmem:[%s5038_s17 + $0xe1] sm:$0xff]  ;;  %v4162_v49 = vld [vmem:[%s5038_s17 + $0xf9] sm:$0xff] }
 0x10a   : > { %v661_v7 = vpop.f32.mrf.mxu1 }
 0x10b   : > { %v5616_v35 = vadd.f32 %v4506_v24, %v670_v32  ;;  %v662_v43 = vadd.f32 %v661_v7, %v5512_v28  ;;  %v4507_v36 = vpop.f32.mrf.mxu0  ;;  %v4161_v24 = vld [vmem:[%s5038_s17 + $0xf1] sm:$0xff] }
 0x10c   : > { %v4471_v46 = vpop.f32.mrf.mxu1  ;;  %v2344_v22 = vpack.c.bf16 %v4162_v49, %v4161_v24 }
 0x10d   : > { %v5619_v45 = vadd.f32 %v935_v13, %v662_v43  ;;  %v673_v23 = vadd.f32 %v4471_v46, %v5518_v44  ;;  %v938_v38 = vpop.f32.mrf.mxu0 }
 0x10e   : > { %v664_v42 = vpop.f32.mrf.mxu1 }
 0x10f   : > { %v5622_v52 = vadd.f32 %v4507_v36, %v673_v23  ;;  %v665_v53 = vadd.f32 %v664_v42, %v5522_v62  ;;  %v4510_v29 = vpop.f32.mrf.mxu0  ;;  %4725 = vmatmul.mubr.msk.bf16.gmra.mxu0 %vm341_vm0, %v5253_v61  ;;  %v4220_v42 = vld [vmem:[%s5038_s17 + $0x12a] sm:$0xff] }
 0x110   : > { %v4474_v28 = vpop.f32.mrf.mxu1  ;;  %4689 = vmatmul.mubr.msk.bf16.gmra.mxu1 %vm341_vm0, %v2341_v37  ;;  %4728 = vmatprep.mubr.msk.bf16.mxu0 %vm341_vm0, %v5257_v63  ;;  %v2343_v63 = vpack.c.bf16 %v4160_v20, %v4159_v10 }
 0x111   : > { %v5630_v44 = vadd.f32 %v938_v38, %v665_v53  ;;  %v686_v47 = vadd.f32 %v4474_v28, %v5526_v16  ;;  %v951_v1 = vpop.f32.mrf.mxu0  ;;  %4692 = vmatprep.mubr.msk.bf16.mxu1 %vm341_vm0, %v2342_v27  ;;  %v4219_v27 = vld [vmem:[%s5038_s17 + $0x122] sm:$0xff] }
 0x112   : > { %v677_v62 = vpop.f32.mrf.mxu1 }
 0x113   : > { %v5638_v32 = vadd.f32 %v4510_v29, %v686_v47  ;;  %v678_v61 = vadd.f32 %v677_v62, %v5537_v39  ;;  %v4511_v13 = vpop.f32.mrf.mxu0  ;;  %v4165_v29 = vld [vmem:[%s5038_s17 + $0x121] sm:$0xff] }
 0x114   : > { %v4475_v12 = vpop.f32.mrf.mxu1 }
 0x115   : > { %v5641_v17 = vadd.f32 %v951_v1, %v678_v61  ;;  %v689_v16 = vadd.f32 %v4475_v12, %v5547_v54  ;;  %v954_v7 = vpop.f32.mrf.mxu0  ;;  %v4163_v54 = vld [vmem:[%s5038_s17 + $0x109] sm:$0xff] }
 0x116   : > { %v680_v33 = vpop.f32.mrf.mxu1 }
 0x117   : > { %v5644_v43 = vadd.f32 %v4511_v13, %v689_v16  ;;  %v681_v36 = vadd.f32 %v680_v33, %v5553_v60  ;;  %v4514_v39 = vpop.f32.mrf.mxu0  ;;  %4729 = vmatmul.mubr.msk.bf16.gmra.mxu0 %vm341_vm0, %v5277_v15  ;;  %v4164_v60 = vld [vmem:[%s5038_s17 + $0x111] sm:$0xff]  ;;  %v4166_v15 = vld [vmem:[%s5038_s17 + $0x129] sm:$0xff]  ;;  %v4221_v16 = vld [vmem:[%s5038_s17 + $0x13a] sm:$0xff] }
 0x118   : > { %v4478_v46 = vpop.f32.mrf.mxu1  ;;  %4693 = vmatmul.mubr.msk.bf16.gmra.mxu1 %vm341_vm0, %v2343_v63  ;;  %4732 = vmatprep.mubr.msk.bf16.mxu0 %vm341_vm0, %v5281_v18  ;;  %v2345_v10 = vpack.c.bf16 %v4164_v60, %v4163_v54  ;;  %v2346_v49 = vpack.c.bf16 %v4166_v15, %v4165_v29  ;;  %v4169_v54 = vld [vmem:[%s5038_s17 + $0x151] sm:$0xff] }
 0x119   : > { %v5653_v37 = vadd.f32 %v954_v7, %v681_v36  ;;  %v702_v23 = vadd.f32 %v4478_v46, %v5557_v3  ;;  %v967_v38 = vpop.f32.mrf.mxu0  ;;  %4696 = vmatprep.mubr.msk.bf16.mxu1 %vm341_vm0, %v2344_v22  ;;  %v2652_v3 = vpack.c.bf16 %v4220_v42, %v4219_v27  ;;  %v4222_v7 = vld [vmem:[%s5038_s17 + $0x142] sm:$0xff]  ;;  %v4224_v46 = vld [vmem:[%s5038_s17 + $0x15a] sm:$0xff] }
 0x11a   : > { %v693_v53 = vpop.f32.mrf.mxu1  ;;  %v2653_v42 = vpack.c.bf16 %v4222_v7, %v4221_v16 }
 0x11b   : > { %v5662_v28 = vadd.f32 %v4514_v39, %v702_v23  ;;  %v694_v47 = vadd.f32 %v693_v53, %v5566_v6  ;;  %v4515_v1 = vpop.f32.mrf.mxu0  ;;  %v4223_v39 = vld [vmem:[%s5038_s17 + $0x152] sm:$0xff] }
 0x11c   : > { %v4479_v18 = vpop.f32.mrf.mxu1  ;;  %v4170_v23 = vld [vmem:[%s5038_s17 + $0x159] sm:$0xff] }
 0x11d   : > { %v5665_v20 = vadd.f32 %v967_v38, %v694_v47  ;;  %v705_v62 = vadd.f32 %v4479_v18, %v5575_v25  ;;  %v970_v24 = vpop.f32.mrf.mxu0  ;;  %v4167_v25 = vld [vmem:[%s5038_s17 + $0x139] sm:$0xff]  ;;  %v2348_v18 = vpack.c.bf16 %v4170_v23, %v4169_v54 }
 0x11e   : > { %v696_v61 = vpop.f32.mrf.mxu1 }
 0x11f   : > { %v5668_v13 = vadd.f32 %v4515_v1, %v705_v62  ;;  %v697_v6 = vadd.f32 %v696_v61, %v5579_v9  ;;  %v4518_v12 = vpop.f32.mrf.mxu0  ;;  %4733 = vmatmul.mubr.msk.bf16.gmra.mxu0 %vm341_vm0, %v5301_v40  ;;  %v4168_v9 = vld [vmem:[%s5038_s17 + $0x141] sm:$0xff]  ;;  %v4226_v61 = vld [vmem:[%s5038_s17 + $0x172] sm:$0xff] }
 0x120   : > { %v4482_v63 = vpop.f32.mrf.mxu1  ;;  %4697 = vmatmul.mubr.msk.bf16.gmra.mxu1 %vm341_vm0, %v2345_v10  ;;  %4736 = vmatprep.mubr.msk.bf16.mxu0 %vm341_vm0, %v2652_v3  ;;  %v2347_v29 = vpack.c.bf16 %v4168_v9, %v4167_v25  ;;  %v4172_v25 = vld [vmem:[%s5038_s17 + $0x171] sm:$0xff] }
 0x121   : > { %v5678_v22 = vadd.f32 %v970_v24, %v697_v6  ;;  %v718_v33 = vadd.f32 %v4482_v63, %v5482_v48  ;;  %v983_v36 = vpop.f32.mrf.mxu0  ;;  %4700 = vmatprep.mubr.msk.bf16.mxu1 %vm341_vm0, %v2346_v49  ;;  %v2654_v48 = vpack.c.bf16 %v4224_v46, %v4223_v39  ;;  %v4225_v49 = vld [vmem:[%s5038_s17 + $0x16a] sm:$0xff] }
 0x122   : > { %v709_v40 = vpop.f32.mrf.mxu1  ;;  %v4171_v63 = vld [vmem:[%s5038_s17 + $0x169] sm:$0xff] }
 0x123   : > { %v5687_v38 = vadd.f32 %v4518_v12, %v718_v33  ;;  %v710_v60 = vadd.f32 %v709_v40, %v5492_v58  ;;  %v4519_v27 = vpop.f32.mrf.mxu0  ;;  %v2349_v39 = vpack.c.bf16 %v4172_v25, %v4171_v63 }
 0x124   : > { %v4483_v53 = vpop.f32.mrf.mxu1 }
 0x125   : > { %v5690_v15 = vadd.f32 %v983_v36, %v710_v60  ;;  %v721_v47 = vadd.f32 %v4483_v53, %v5496_v4  ;;  %v986_v1 = vpop.f32.mrf.mxu0  ;;  %v2655_v36 = vpack.c.bf16 %v4226_v61, %v4225_v49  ;;  %v4230_v53 = vld [vmem:[%s5038_s17 + $0x1a2] sm:$0xff] }
 0x126   : > { %v712_v10 = vpop.f32.mrf.mxu1 }
 0x127   : > { %v5693_v3 = vadd.f32 %v4519_v27, %v721_v47  ;;  %v713_v58 = vadd.f32 %v712_v10, %v5500_v8  ;;  %v4522_v62 = vpop.f32.mrf.mxu0  ;;  %4737 = vmatmul.mubr.msk.bf16.gmra.mxu0 %vm341_vm0, %v2653_v42  ;;  %v4229_v42 = vld [vmem:[%s5038_s17 + $0x19a] sm:$0xff] }
 0x128   : > { %v4486_v24 = vpop.f32.mrf.mxu1  ;;  %4701 = vmatmul.mubr.msk.bf16.gmra.mxu1 %vm341_vm0, %v2347_v29  ;;  %4740 = vmatprep.mubr.msk.bf16.mxu0 %vm341_vm0, %v2654_v48  ;;  %v4176_v47 = vld [vmem:[%s5038_s17 + $0x1a1] sm:$0xff] }
 0x129   : > { %v5701_v4 = vadd.f32 %v986_v1, %v713_v58  ;;  %v734_v6 = vadd.f32 %v4486_v24, %v5506_v26  ;;  %v999_v12 = vpop.f32.mrf.mxu0  ;;  %4704 = vmatprep.mubr.msk.bf16.mxu1 %vm341_vm0, %v2348_v18 }
 0x12a   : > { %v725_v8 = vpop.f32.mrf.mxu1 }
 0x12b   : > { %v5707_v16 = vadd.f32 %v4522_v62, %v734_v6  ;;  %v726_v7 = vadd.f32 %v725_v8, %v5516_v30  ;;  %v4523_v33 = vpop.f32.mrf.mxu0  ;;  %v2657_v62 = vpack.c.bf16 %v4230_v53, %v4229_v42 }
 0x12c   : > { %v4487_v9 = vpop.f32.mrf.mxu1 }
 0x12d   : > { %v5710_v46 = vadd.f32 %v999_v12, %v726_v7  ;;  %v737_v26 = vadd.f32 %v4487_v9, %v5520_v50  ;;  %v1002_v40 = vpop.f32.mrf.mxu0 }
 0x12e   : > { %v728_v54 = vpop.f32.mrf.mxu1 }
 0x12f   : > { %v5713_v23 = vadd.f32 %v4523_v33, %v737_v26  ;;  %v729_v60 = vadd.f32 %v728_v54, %v5524_v0  ;;  %v4526_v27 = vpop.f32.mrf.mxu0  ;;  %4741 = vmatmul.mubr.msk.bf16.gmra.mxu0 %vm341_vm0, %v2655_v36  ;;  %v4175_v0 = vld [vmem:[%s5038_s17 + $0x199] sm:$0xff]  ;;  %s4881_s17 = sshll.u32 %s4940_s22, 4  ;;  %s4882_s17 = int_to_ptr.vmem [resolvable:$false] %s4881_s17 }
 0x130   : > { %v4490_v30 = vpop.f32.mrf.mxu1  ;;  %4705 = vmatmul.mubr.msk.bf16.gmra.mxu1 %vm341_vm0, %v2349_v39  ;;  %4744 = vmatprep.mubr.msk.bf16.mxu0 %vm341_vm0, %v5551_v57  ;;  %v2351_v24 = vpack.c.bf16 %v4176_v47, %v4175_v0  ;;  %s4883_s15 = scalar_lea.vmem %s4882_s17, 2048  ;;  %p4884_p0 = scmp.lt.s32.totalorder %s6608_s9, %s4882_s17 }
 0x131   : > { %v5722_v50 = vadd.f32 %v1002_v40, %v729_v60  ;;  %v750_v29 = vadd.f32 %v4490_v30, %v5530_v19  ;;  %v1015_v48 = vpop.f32.mrf.mxu0  ;;  %4708 = vmatprep.mubr.msk.bf16.mxu1 %vm341_vm0, %v5431_v34  ;;  %p4885_p1 = scmp.lt.s32.totalorder %s4883_s15, %s4877_s14 }
 0x132   : > { %v741_v1 = vpop.f32.mrf.mxu1 }
 0x133   : > { %v5729_v18 = vadd.f32 %v4526_v27, %v750_v29  ;;  %v742_v10 = vadd.f32 %v741_v1, %v5543_v51  ;;  %v4527_v58 = vpop.f32.mrf.mxu0  ;;  %p4886_p2 = por %p4885_p1, %p4884_p0 }
 0x134   : > { %v4491_v57 = vpop.f32.mrf.mxu1 }
 0x135   : > { %v5732_v49 = vadd.f32 %v1015_v48, %v742_v10  ;;  %v753_v61 = vadd.f32 %v4491_v57, %v5549_v56  ;;  %v1018_v19 = vpop.f32.mrf.mxu0  ;;  %p4887_p3 = pnand %p4886_p2, %p4880_p13 }
 0x136   : > { %v744_v6 = vpop.f32.mrf.mxu1 }
 0x137   : > { %v5735_v12 = vadd.f32 %v4527_v58, %v753_v61  ;;  %v745_v34 = vadd.f32 %v744_v6, %v5555_v2  ;;  %v4530_v63 = vpop.f32.mrf.mxu0  ;;  %4745 = vmatmul.mubr.msk.bf16.gmra.mxu0 %vm341_vm0, %v2657_v62 }
 0x138   : > { %v4494_v25 = vpop.f32.mrf.mxu1  ;;  %4709 = vmatmul.mubr.msk.bf16.gmra.mxu1 %vm341_vm0, %v2351_v24 }
 0x139   : > { %v5740_v51 = vadd.f32 %v1018_v19, %v745_v34  ;;  %v766_v8 = vadd.f32 %v4494_v25, %v5560_v5  ;;  %v1031_v7 = vpop.f32.mrf.mxu0 }
 0x13a   : > { %v757_v33 = vpop.f32.mrf.mxu1 }
 0x13b   : > { %v5743_v36 = vadd.f32 %v4530_v63, %v766_v8  ;;  %v758_v56 = vadd.f32 %v757_v33, %v5571_v14  ;;  %v4531_v9 = vpop.f32.mrf.mxu0 }
 0x13c   : > { %v4495_v39 = vpop.f32.mrf.mxu1 }
 0x13d   : > { %v5746_v26 = vadd.f32 %v1031_v7, %v758_v56  ;;  %v769_v2 = vadd.f32 %v4495_v39, %v5577_v31  ;;  %v1034_v40 = vpop.f32.mrf.mxu0 }
 0x13e   : > { %v760_v54 = vpop.f32.mrf.mxu1 }
 0x13f   : > { %v5749_v60 = vadd.f32 %v4531_v9, %v769_v2  ;;  %v761_v27 = vadd.f32 %v760_v54, %v5581_v21  ;;  %v4574_v30 = vpop.f32.mrf.mxu0 }
 0x140   : > { %v4538_v5 = vpop.f32.mrf.mxu1 }
 0x141   : > { %v5752_v42 = vadd.f32 %v1034_v40, %v761_v27  ;;  %v1355_v53 = vadd.f32 %v4538_v5, %v5594_v41  ;;  %v1532_v29 = vpop.f32.mrf.mxu0 }
 0x142   : > { %v1226_v14 = vpop.f32.mrf.mxu1 }
 0x143   : > { %v5755_v48 = vadd.f32 %v4574_v30, %v1355_v53  ;;  %v1353_v0 = vadd.f32 %v1226_v14, %v5597_v55  ;;  %v4575_v47 = vpop.f32.mrf.mxu0 }
 0x144   : > { %v4539_v31 = vpop.f32.mrf.mxu1 }
 0x145   : > { %v5758_v1 = vadd.f32 %v1532_v29, %v1353_v0  ;;  %v1356_v10 = vadd.f32 %v4539_v31, %v5600_v11  ;;  %v1535_v58 = vpop.f32.mrf.mxu0 }
 0x146   : > { %v1229_v21 = vpop.f32.mrf.mxu1 }
 0x147   : > { %v5761_v62 = vadd.f32 %v4575_v47, %v1356_v10  ;;  %v1354_v57 = vadd.f32 %v1229_v21, %v5608_v59  ;;  %v4578_v24 = vpop.f32.mrf.mxu0 }
 0x148   : > { %v4542_v41 = vpop.f32.mrf.mxu1 }
 0x149   : > { %v5764_v61 = vadd.f32 %v1535_v58, %v1354_v57  ;;  %v1359_v19 = vadd.f32 %v4542_v41, %v5616_v35  ;;  %v1548_v6 = vpop.f32.mrf.mxu0 }
 0x14a   : > { %v1242_v55 = vpop.f32.mrf.mxu1 }
 0x14b   : > { %v5767_v34 = vadd.f32 %v4578_v24, %v1359_v19  ;;  %v1357_v63 = vadd.f32 %v1242_v55, %v5619_v45  ;;  %v4579_v25 = vpop.f32.mrf.mxu0 }
 0x14c   : > { %v4543_v11 = vpop.f32.mrf.mxu1 }
 0x14d   : > { %v5770_v8 = vadd.f32 %v1548_v6, %v1357_v63  ;;  %v1360_v7 = vadd.f32 %v4543_v11, %v5622_v52  ;;  %v1551_v33 = vpop.f32.mrf.mxu0 }
 0x14e   : > { %v1245_v59 = vpop.f32.mrf.mxu1 }
 0x14f   : > { %v5773_v56 = vadd.f32 %v4579_v25, %v1360_v7  ;;  %v1358_v9 = vadd.f32 %v1245_v59, %v5630_v44  ;;  %v4582_v39 = vpop.f32.mrf.mxu0 }
 0x150   : > { %v4546_v35 = vpop.f32.mrf.mxu1 }
 0x151   : > { %v5776_v2 = vadd.f32 %v1551_v33, %v1358_v9  ;;  %v1363_v40 = vadd.f32 %v4546_v35, %v5638_v32  ;;  %v1564_v54 = vpop.f32.mrf.mxu0 }
 0x152   : > { %v1258_v45 = vpop.f32.mrf.mxu1 }
 0x153   : > { %v5779_v27 = vadd.f32 %v4582_v39, %v1363_v40  ;;  %v1361_v30 = vadd.f32 %v1258_v45, %v5641_v17  ;;  %v4583_v5 = vpop.f32.mrf.mxu0 }
 0x154   : > { %v4547_v52 = vpop.f32.mrf.mxu1 }
 0x155   : > { %v5782_v53 = vadd.f32 %v1564_v54, %v1361_v30  ;;  %v1364_v29 = vadd.f32 %v4547_v52, %v5644_v43  ;;  %v1567_v14 = vpop.f32.mrf.mxu0 }
 0x156   : > { %v1261_v44 = vpop.f32.mrf.mxu1 }
 0x157   : > { %v5785_v0 = vadd.f32 %v4583_v5, %v1364_v29  ;;  %v1362_v47 = vadd.f32 %v1261_v44, %v5653_v37  ;;  %v4586_v31 = vpop.f32.mrf.mxu0 }
 0x158   : > { %v4550_v32 = vpop.f32.mrf.mxu1 }
 0x159   : > { %v5788_v10 = vadd.f32 %v1567_v14, %v1362_v47  ;;  %v1367_v58 = vadd.f32 %v4550_v32, %v5662_v28  ;;  %v1580_v21 = vpop.f32.mrf.mxu0 }
 0x15a   : > { %v1274_v17 = vpop.f32.mrf.mxu1 }
 0x15b   : > { %v5791_v57 = vadd.f32 %v4586_v31, %v1367_v58  ;;  %v1365_v24 = vadd.f32 %v1274_v17, %v5665_v20  ;;  %v4587_v41 = vpop.f32.mrf.mxu0 }
 0x15c   : > { %v4551_v43 = vpop.f32.mrf.mxu1 }
 0x15d   : > { %v5794_v19 = vadd.f32 %v1580_v21, %v1365_v24  ;;  %v1368_v6 = vadd.f32 %v4551_v43, %v5668_v13  ;;  %v1583_v55 = vpop.f32.mrf.mxu0 }
 0x15e   : > { %v1277_v37 = vpop.f32.mrf.mxu1 }
 0x15f   : > { %v5797_v63 = vadd.f32 %v4587_v41, %v1368_v6  ;;  %v1366_v25 = vadd.f32 %v1277_v37, %v5678_v22  ;;  %v4590_v11 = vpop.f32.mrf.mxu0 }
 0x160   : > { %v4554_v28 = vpop.f32.mrf.mxu1 }
 0x161   : > { %v5800_v7 = vadd.f32 %v1583_v55, %v1366_v25  ;;  %v1371_v33 = vadd.f32 %v4554_v28, %v5687_v38  ;;  %v1596_v59 = vpop.f32.mrf.mxu0 }
 0x162   : > { %v1290_v20 = vpop.f32.mrf.mxu1 }
 0x163   : > { %v5803_v9 = vadd.f32 %v4590_v11, %v1371_v33  ;;  %v1369_v39 = vadd.f32 %v1290_v20, %v5690_v15  ;;  %v4591_v35 = vpop.f32.mrf.mxu0 }
 0x164   : > { %v4555_v13 = vpop.f32.mrf.mxu1 }
 0x165   : > { %v5806_v40 = vadd.f32 %v1596_v59, %v1369_v39  ;;  %v1372_v54 = vadd.f32 %v4555_v13, %v5693_v3  ;;  %v1599_v45 = vpop.f32.mrf.mxu0 }
 0x166   : > { %v1293_v22 = vpop.f32.mrf.mxu1 }
 0x167   : > { %v5809_v30 = vadd.f32 %v4591_v35, %v1372_v54  ;;  %v1370_v5 = vadd.f32 %v1293_v22, %v5701_v4  ;;  %v4594_v52 = vpop.f32.mrf.mxu0 }
 0x168   : > { %v4558_v38 = vpop.f32.mrf.mxu1 }
 0x169   : > { %v5812_v29 = vadd.f32 %v1599_v45, %v1370_v5  ;;  %v1375_v14 = vadd.f32 %v4558_v38, %v5707_v16  ;;  %v1612_v44 = vpop.f32.mrf.mxu0 }
 0x16a   : > { %v1306_v15 = vpop.f32.mrf.mxu1 }
 0x16b   : > { %v5815_v47 = vadd.f32 %v4594_v52, %v1375_v14  ;;  %v1373_v31 = vadd.f32 %v1306_v15, %v5710_v46  ;;  %v4595_v32 = vpop.f32.mrf.mxu0 }
 0x16c   : > { %v4559_v3 = vpop.f32.mrf.mxu1 }
 0x16d   : > { %6661 = vst [vmem:[#allocation6_spill] sm:$0xff] %v5815_v47  ;;  %v5818_v58 = vadd.f32 %v1612_v44, %v1373_v31  ;;  %v1376_v21 = vadd.f32 %v4559_v3, %v5713_v23  ;;  %v1615_v17 = vpop.f32.mrf.mxu0 }
 0x16e   : > { %v1309_v4 = vpop.f32.mrf.mxu1 }
 0x16f   : > { %6662 = vst [vmem:[#allocation7_spill] sm:$0xff] %v5818_v58  ;;  %v5821_v24 = vadd.f32 %v4595_v32, %v1376_v21  ;;  %v1374_v41 = vadd.f32 %v1309_v4, %v5722_v50  ;;  %v4598_v43 = vpop.f32.mrf.mxu0 }
 0x170   : > { %v4562_v16 = vpop.f32.mrf.mxu1 }
 0x171   : > { %6663 = vst [vmem:[#allocation8_spill] sm:$0xff] %v5821_v24  ;;  %v5824_v6 = vadd.f32 %v1615_v17, %v1374_v41  ;;  %v1379_v55 = vadd.f32 %v4562_v16, %v5729_v18  ;;  %v1628_v37 = vpop.f32.mrf.mxu0 }
 0x172   : > { %v1322_v46 = vpop.f32.mrf.mxu1 }
 0x173   : > { %v5827_v25 = vadd.f32 %v4598_v43, %v1379_v55  ;;  %v1377_v11 = vadd.f32 %v1322_v46, %v5732_v49  ;;  %v4599_v28 = vpop.f32.mrf.mxu0 }
 0x174   : > { %v4563_v23 = vpop.f32.mrf.mxu1 }
 0x175   : > { %6664 = vst [vmem:[#allocation9_spill] sm:$0xff] %v5827_v25  ;;  %v5830_v33 = vadd.f32 %v1628_v37, %v1377_v11  ;;  %v1380_v59 = vadd.f32 %v4563_v23, %v5735_v12  ;;  %v1631_v20 = vpop.f32.mrf.mxu0 }
 0x176   : > { %v1325_v50 = vpop.f32.mrf.mxu1 }
 0x177   : > { %6665 = vst [vmem:[#allocation10_spill] sm:$0xff] %v5830_v33  ;;  %v5833_v39 = vadd.f32 %v4599_v28, %v1380_v59  ;;  %v1378_v35 = vadd.f32 %v1325_v50, %v5740_v51  ;;  %v4602_v13 = vpop.f32.mrf.mxu0 }
 0x178   : > { %v4566_v18 = vpop.f32.mrf.mxu1 }
 0x179   : > { %6666 = vst [vmem:[#allocation11_spill] sm:$0xff] %v5833_v39  ;;  %v5836_v54 = vadd.f32 %v1631_v20, %v1378_v35  ;;  %v1383_v45 = vadd.f32 %v4566_v18, %v5743_v36  ;;  %v1644_v22 = vpop.f32.mrf.mxu0 }
 0x17a   : > { %v1338_v49 = vpop.f32.mrf.mxu1 }
 0x17b   : > { %v5839_v5 = vadd.f32 %v4602_v13, %v1383_v45  ;;  %v1381_v52 = vadd.f32 %v1338_v49, %v5746_v26  ;;  %v4603_v38 = vpop.f32.mrf.mxu0 }
 0x17c   : > { %v4567_v12 = vpop.f32.mrf.mxu1 }
 0x17d   : > { %v5842_v14 = vadd.f32 %v1644_v22, %v1381_v52  ;;  %v1384_v44 = vadd.f32 %v4567_v12, %v5749_v60  ;;  %v1647_v15 = vpop.f32.mrf.mxu0 }
 0x17e   : > { %v1341_v51 = vpop.f32.mrf.mxu1 }
 0x17f   : > { %6667 = vst [vmem:[#allocation12_spill] sm:$0xff] %v5842_v14  ;;  %v5845_v31 = vadd.f32 %v4603_v38, %v1384_v44  ;;  %v1382_v32 = vadd.f32 %v1341_v51, %v5752_v42  ;;  %v5848_v3 = vpop.f32.mrf.mxu0 }
 0x180   : > { %v5850_v36 = vpop.f32.mrf.mxu1 }
 0x181   : > { %v5852_v21 = vadd.f32 %v1647_v15, %v1382_v32  ;;  %v5854_v17 = vpop.f32.mrf.mxu0 }
 0x182   : > { %v5856_v26 = vpop.f32.mrf.mxu1 }
 0x183   : > { %6668 = vst [vmem:[#allocation13_spill] sm:$0xff] %v5852_v21  ;;  %v4647_v4 = vpop.f32.mrf.mxu0 }
 0x184   : > { %v4611_v41 = vpop.f32.mrf.mxu1 }
 0x185   : > { %v1968_v60 = vadd.f32 %v4611_v41, %v5761_v62  ;;  %v5859_v43 = vpop.f32.mrf.mxu0 }
 0x186   : > { %v5861_v16 = vpop.f32.mrf.mxu1 }
 0x187   : > { %v5863_v55 = vadd.f32 %v4647_v4, %v1968_v60  ;;  %v5865_v42 = vpop.f32.mrf.mxu0 }
 0x188   : > { %v5867_v37 = vpop.f32.mrf.mxu1 }
 0x189   : > { %v5869_v46 = vpop.f32.mrf.mxu0 }
 0x18a   : > { %v5871_v11 = vpop.f32.mrf.mxu1 }
 0x18b   : > { %v5873_v28 = vpop.f32.mrf.mxu0 }
 0x18c   : > { %v5875_v23 = vpop.f32.mrf.mxu1 }
 0x18d   : > { %v2164_v59 = vpop.f32.mrf.mxu0 }
 0x18e   : > { %v1857_v62 = vpop.f32.mrf.mxu1 }
 0x18f   : > { %v1970_v20 = vadd.f32 %v1857_v62, %v5776_v2  ;;  %v5878_v50 = vpop.f32.mrf.mxu0 }
 0x190   : > { %v5880_v35 = vpop.f32.mrf.mxu1 }
 0x191   : > { %v5882_v13 = vadd.f32 %v2164_v59, %v1970_v20  ;;  %v5884_v18 = vpop.f32.mrf.mxu0 }
 0x192   : > { %v5886_v45 = vpop.f32.mrf.mxu1 }
 0x193   : > { %v5888_v22 = vpop.f32.mrf.mxu0 }
 0x194   : > { %v5890_v49 = vpop.f32.mrf.mxu1 }
 0x195   : > { %v2180_v52 = vpop.f32.mrf.mxu0 }
 0x196   : > { %v1873_v38 = vpop.f32.mrf.mxu1 }
 0x197   : > { %v1974_v12 = vadd.f32 %v1873_v38, %v5788_v10  ;;  %v5893_v44 = vpop.f32.mrf.mxu0 }
 0x198   : > { %v5895_v2 = vpop.f32.mrf.mxu1 }
 0x199   : > { %v5897_v15 = vadd.f32 %v2180_v52, %v1974_v12  ;;  %v5899_v51 = vpop.f32.mrf.mxu0 }
 0x19a   : > { %v5901_v32 = vpop.f32.mrf.mxu1 }
 0x19b   : > { %v5903_v4 = vpop.f32.mrf.mxu0 }
 0x19c   : > { %v5905_v41 = vpop.f32.mrf.mxu1 }
 0x19d   : > { %v2196_v60 = vpop.f32.mrf.mxu0 }
 0x19e   : > { %v1889_v59 = vpop.f32.mrf.mxu1 }
 0x19f   : > { %v1978_v62 = vadd.f32 %v1889_v59, %v5800_v7  ;;  %v5908_v20 = vpop.f32.mrf.mxu0 }
 0x1a0   : > { %6669 = vst [vmem:[#allocation14_spill] sm:$0xff] %v5908_v20  ;;  %v5910_v10 = vpop.f32.mrf.mxu1 }
 0x1a1   : > { %v5912_v38 = vadd.f32 %v2196_v60, %v1978_v62  ;;  %v5914_v52 = vpop.f32.mrf.mxu0 }
 0x1a2   : > { %6671 = vst [vmem:[#allocation16_spill] sm:$0xff] %v5914_v52  ;;  %v5916_v12 = vpop.f32.mrf.mxu1 }
 0x1a3   : > { %6670 = vst [vmem:[#allocation15_spill] sm:$0xff] %v5912_v38  ;;  %v5918_v21 = vpop.f32.mrf.mxu0 }
 0x1a4   : > { %6672 = vst [vmem:[#allocation17_spill] sm:$0xff] %v5918_v21  ;;  %v5920_v14 = vpop.f32.mrf.mxu1 }
 0x1a5   : > { %v2212_v39 = vpop.f32.mrf.mxu0 }
 0x1a6   : > { %v1905_v33 = vpop.f32.mrf.mxu1 }
 0x1a7   : > { %v1982_v25 = vadd.f32 %v1905_v33, %v5812_v29  ;;  %v5923_v24 = vpop.f32.mrf.mxu0 }
 0x1a8   : > { %6673 = vst [vmem:[#allocation18_spill] sm:$0xff] %v5923_v24  ;;  %v5925_v7 = vpop.f32.mrf.mxu1 }
 0x1a9   : > { %v5927_v59 = vadd.f32 %v2212_v39, %v1982_v25  ;;  %v5929_v60 = vpop.f32.mrf.mxu0 }
 0x1aa   : > { %6675 = vst [vmem:[#allocation20_spill] sm:$0xff] %v5929_v60  ;;  %v5931_v62 = vpop.f32.mrf.mxu1 }
 0x1ab   : > { %6674 = vst [vmem:[#allocation19_spill] sm:$0xff] %v5927_v59  ;;  %6676 = vst [vmem:[#allocation21_spill] sm:$0xff] %v5931_v62  ;;  %v5933_v58 = vpop.f32.mrf.mxu0 }
 0x1ac   : > { %6677 = vst [vmem:[#allocation22_spill] sm:$0xff] %v5933_v58  ;;  %v5935_v47 = vpop.f32.mrf.mxu1 }
 0x1ad   : > { %6678 = vst [vmem:[#allocation23_spill] sm:$0xff] %v5935_v47  ;;  %v2228_v21 = vpop.f32.mrf.mxu0 }
 0x1ae   : > { %v1921_v52 = vpop.f32.mrf.mxu1 }
 0x1af   : > { %v1986_v38 = vadd.f32 %v1921_v52, %v5824_v6  ;;  %v5938_v20 = vpop.f32.mrf.mxu0 }
 0x1b0   : > { %6679 = vst [vmem:[#allocation24_spill] sm:$0xff] %v5938_v20  ;;  %v5940_v29 = vpop.f32.mrf.mxu1 }
 0x1b1   : > { %v5942_v33 = vadd.f32 %v2228_v21, %v1986_v38  ;;  %v5944_v25 = vpop.f32.mrf.mxu0 }
 0x1b2   : > { %6681 = vst [vmem:[#allocation26_spill] sm:$0xff] %v5944_v25  ;;  %v5946_v39 = vpop.f32.mrf.mxu1  ;;  %v1967_v25 = vadd.f32 %v5850_v36, %v5755_v48  ;;  %v1966_v36 = vadd.f32 %v5861_v16, %v5764_v61 }
 0x1b3   : > { %6680 = vst [vmem:[#allocation25_spill] sm:$0xff] %v5942_v33  ;;  %v5948_v60 = vpop.f32.mrf.mxu0 }
 0x1b4   : > { %6682 = vst [vmem:[#allocation27_spill] sm:$0xff] %v5948_v60  ;;  %v5950_v59 = vpop.f32.mrf.mxu1  ;;  %v2273_v61 = vadd.f32 %v5859_v43, %v1966_v36 }
 0x1b5   : > { %6683 = vst [vmem:[#allocation28_spill] sm:$0xff] %v5950_v59  ;;  %v2244_v58 = vpop.f32.mrf.mxu0 }
 0x1b6   : > { %v1937_v24 = vpop.f32.mrf.mxu1 }
 0x1b7   : > { %v1990_v47 = vadd.f32 %v1937_v24, %v5836_v54  ;;  %v4674_v62 = vpop.f32.mrf.mxu0  ;;  %v1965_v24 = vadd.f32 %v5856_v26, %v5758_v1 }
 0x1b8   : > { %v4638_v6 = vpop.f32.mrf.mxu1 }
 0x1b9   : > { %v5953_v52 = vadd.f32 %v2244_v58, %v1990_v47  ;;  %v1995_v20 = vadd.f32 %v4638_v6, %v5839_v5  ;;  %v5956_v21 = vpop.f32.mrf.mxu0  ;;  %v2274_v5 = vadd.f32 %v5848_v3, %v1967_v25  ;;  %v2272_v48 = vadd.f32 %v5854_v17, %v1965_v24 }
 0x1ba   : > { %6685 = vst [vmem:[#allocation30_spill] sm:$0xff] %v5956_v21  ;;  %v5958_v38 = vpop.f32.mrf.mxu1  ;;  %v1971_v3 = vadd.f32 %v5867_v37, %v5767_v34  ;;  %v1969_v17 = vadd.f32 %v5871_v11, %v5770_v8 }
 0x1bb   : > { %6684 = vst [vmem:[#allocation29_spill] sm:$0xff] %v5953_v52  ;;  %v5962_v60 = vadd.f32 %v4674_v62, %v1995_v20  ;;  %v4675_v33 = vpop.f32.mrf.mxu0 }
 0x1bc   : > { %v4639_v59 = vpop.f32.mrf.mxu1  ;;  %v2278_v37 = vadd.f32 %v5865_v42, %v1971_v3  ;;  %v2276_v11 = vadd.f32 %v5869_v46, %v1969_v17  ;;  %v1975_v42 = vadd.f32 %v5880_v35, %v5779_v27  ;;  %v1976_v27 = vadd.f32 %v5890_v49, %v5785_v0 }
 0x1bd   : > { %v1996_v54 = vadd.f32 %v4639_v59, %v5845_v31  ;;  %v5967_v47 = vpop.f32.mrf.mxu0  ;;  %v5980_v31 = vld [vmem:[%s6655_s2] ss:$0 sm:$0xff] }
 0x1be   : > { %v5969_v58 = vpop.f32.mrf.mxu1 }
 0x1bf   : > { %v5972_v6 = vadd.f32 %v4675_v33, %v1996_v54  ;;  %v4718_v21 = vpop.f32.mrf.mxu0 }
 0x1c0   : > { %v4682_v52 = vpop.f32.mrf.mxu1 }
 0x1c1   : > { %v2580_v20 = vadd.f32 %v4682_v52, %v2274_v5  ;;  %v2757_v62 = vpop.f32.mrf.mxu0  ;;  %v1972_v5 = vadd.f32 %v5875_v23, %v5773_v56 }
 0x1c2   : > { %v2451_v1 = vpop.f32.mrf.mxu1 }
 0x1c3   : > { %v2886_v26 = vadd.f32 %v4718_v21, %v2580_v20  ;;  %v2578_v59 = vadd.f32 %v2451_v1, %v2272_v48  ;;  %v4719_v33 = vpop.f32.mrf.mxu0  ;;  %v2279_v1 = vadd.f32 %v5873_v28, %v1972_v5 }
 0x1c4   : > { %v4683_v25 = vpop.f32.mrf.mxu1 }
 0x1c5   : > { %v2884_v16 = vadd.f32 %v2757_v62, %v2578_v59  ;;  %v2581_v52 = vadd.f32 %v4683_v25, %v5863_v55  ;;  %v2760_v24 = vpop.f32.mrf.mxu0  ;;  %v5989_v54 = vadd.f32 %v5980_v31, %v2886_v26 }
 0x1c6   : > { %v2454_v34 = vpop.f32.mrf.mxu1 }
 0x1c7   : > { %v2579_v21 = vadd.f32 %v2454_v34, %v2273_v61  ;;  %2959 = vadd.xlane.f32.xlu0 %v5989_v54  ;;  %v4722_v8 = vpop.f32.mrf.mxu0  ;;  %v2887_v48 = vadd.f32 %v4719_v33, %v2581_v52  ;;  %v5997_v62 = vadd.f32 %v5980_v31, %v2884_v16  ;;  %v1973_v33 = vadd.f32 %v5886_v45, %v5782_v53 }
 0x1c8   : > { %v4686_v43 = vpop.f32.mrf.mxu1  ;;  %v2282_v16 = vadd.f32 %v5878_v50, %v1975_v42  ;;  %v2283_v50 = vadd.f32 %v5888_v22, %v1976_v27 }
 0x1c9   : > { %v2885_v36 = vadd.f32 %v2760_v24, %v2579_v21  ;;  %v2584_v55 = vadd.f32 %v4686_v43, %v2278_v37  ;;  %v2773_v20 = vpop.f32.mrf.mxu0  ;;  %v6010_v61 = vadd.f32 %v5980_v31, %v2887_v48  ;;  %v2280_v34 = vadd.f32 %v5884_v18, %v1973_v33 }
 0x1ca   : > { %v2467_v56 = vpop.f32.mrf.mxu1 }
 0x1cb   : > { %v2890_v23 = vadd.f32 %v4722_v8, %v2584_v55  ;;  %v2582_v3 = vadd.f32 %v2467_v56, %v2276_v11  ;;  %2955 = vadd.xlane.f32.xlu0 %v5997_v62  ;;  %v4723_v26 = vpop.f32.mrf.mxu0  ;;  %v6004_v46 = vadd.f32 %v5980_v31, %v2885_v36  ;;  %v1977_v55 = vadd.f32 %v5901_v32, %v5794_v19 }
 0x1cc   : > { %v4687_v59 = vpop.f32.mrf.mxu1 }
 0x1cd   : > { %v2888_v17 = vadd.f32 %v2773_v20, %v2582_v3  ;;  %v2585_v25 = vadd.f32 %v4687_v59, %v2279_v1  ;;  %2957 = vadd.xlane.f32.xlu1 %v6004_v46  ;;  %v2776_v28 = vpop.f32.mrf.mxu0  ;;  %v6018_v45 = vadd.f32 %v5980_v31, %v2890_v23  ;;  %v2284_v59 = vadd.f32 %v5899_v51, %v1977_v55  ;;  %v6690_v55 = vld [vmem:[#allocation6_spill] sm:$0xff] }
 0x1ce   : > { %v2470_v35 = vpop.f32.mrf.mxu1 }
 0x1cf   : > { %v2891_v52 = vadd.f32 %v4723_v26, %v2585_v25  ;;  %v2583_v24 = vadd.f32 %v2470_v35, %v5882_v13  ;;  %2961 = vadd.xlane.f32.xlu0 %v6010_v61  ;;  %v4726_v53 = vpop.f32.mrf.mxu0  ;;  %v6023_v0 = vadd.f32 %v5980_v31, %v2888_v17  ;;  %v1979_v13 = vadd.f32 %v5895_v2, %v5791_v57 }
 0x1d0   : > { %v4690_v5 = vpop.f32.mrf.mxu1  ;;  %v1980_v2 = vadd.f32 %v5905_v41, %v5797_v63 }
 0x1d1   : > { %v2588_v37 = vadd.f32 %v4690_v5, %v2282_v16  ;;  %2967 = vadd.xlane.f32.xlu1 %v6018_v45  ;;  %v2789_v21 = vpop.f32.mrf.mxu0  ;;  %v2889_v8 = vadd.f32 %v2776_v28, %v2583_v24  ;;  %v6030_v18 = vadd.f32 %v5980_v31, %v2891_v52  ;;  %v2286_v42 = vadd.f32 %v5893_v44, %v1979_v13 }
 0x1d2   : > { %v2483_v49 = vpop.f32.mrf.mxu1  ;;  %v2287_v44 = vadd.f32 %v5903_v4, %v1980_v2  ;;  %v1981_v52 = vadd.f32 %v5916_v12, %v5806_v40 }
 0x1d3   : > { %v2894_v11 = vadd.f32 %v4726_v53, %v2588_v37  ;;  %v2586_v43 = vadd.f32 %v2483_v49, %v2280_v34  ;;  %2963 = vadd.xlane.f32.xlu0 %v6023_v0  ;;  %v4727_v48 = vpop.f32.mrf.mxu0  ;;  %v6044_v32 = vadd.f32 %v5980_v31, %v2889_v8  ;;  %v6686_v34 = vld [vmem:[#allocation14_spill] sm:$0xff]  ;;  %v6688_v8 = vld [vmem:[#allocation16_spill] sm:$0xff] }
 0x1d4   : > { %v4691_v36 = vpop.f32.mrf.mxu1 }
 0x1d5   : > { %v2892_v20 = vadd.f32 %v2789_v21, %v2586_v43  ;;  %v2589_v1 = vadd.f32 %v4691_v36, %v2283_v50  ;;  %2969 = vadd.xlane.f32.xlu1 %v6030_v18  ;;  %v2792_v22 = vpop.f32.mrf.mxu0  ;;  %v6036_v57 = vadd.f32 %v5980_v31, %v2894_v11  ;;  %v6687_v50 = vld [vmem:[#allocation15_spill] sm:$0xff]  ;;  %v2288_v11 = vadd.f32 %v6688_v8, %v1981_v52 }
 0x1d6   : > { %v2486_v56 = vpop.f32.mrf.mxu1  ;;  %v6696_v52 = vld [vmem:[#allocation19_spill] sm:$0xff] }
 0x1d7   : > { %v2895_v23 = vadd.f32 %v4727_v48, %v2589_v1  ;;  %v2587_v3 = vadd.f32 %v2486_v56, %v5897_v15  ;;  %2975 = vadd.xlane.f32.xlu0 %v6036_v57  ;;  %v4730_v19 = vpop.f32.mrf.mxu0  ;;  %v6049_v63 = vadd.f32 %v5980_v31, %v2892_v20  ;;  %v1983_v15 = vadd.f32 %v5910_v10, %v5803_v9 }
 0x1d8   : > { %v4694_v26 = vpop.f32.mrf.mxu1  ;;  %v1984_v10 = vadd.f32 %v5920_v14, %v5809_v30  ;;  %v6689_v14 = vld [vmem:[#allocation17_spill] sm:$0xff]  ;;  %v1987_v20 = vadd.f32 %v5925_v7, %v6690_v55 }
 0x1d9   : > { %v2592_v33 = vadd.f32 %v4694_v26, %v2286_v42  ;;  %2965 = vadd.xlane.f32.xlu1 %v6044_v32  ;;  %v2805_v17 = vpop.f32.mrf.mxu0  ;;  %v2893_v25 = vadd.f32 %v2792_v22, %v2587_v3  ;;  %v6056_v51 = vadd.f32 %v5980_v31, %v2895_v23  ;;  %v2290_v37 = vadd.f32 %v6686_v34, %v1983_v15  ;;  %v6692_v26 = vld [vmem:[#allocation21_spill] sm:$0xff]  ;;  %v6693_v15 = vld [vmem:[#allocation8_spill] sm:$0xff] }
 0x1da   : > { %v2499_v41 = vpop.f32.mrf.mxu1  ;;  %v2291_v36 = vadd.f32 %v6689_v14, %v1984_v10 }
 0x1db   : > { %v2898_v28 = vadd.f32 %v4730_v19, %v2592_v33  ;;  %v2590_v27 = vadd.f32 %v2499_v41, %v2284_v59  ;;  %2971 = vadd.xlane.f32.xlu0 %v6049_v63  ;;  %v4731_v35 = vpop.f32.mrf.mxu0  ;;  %v6070_v12 = vadd.f32 %v5980_v31, %v2893_v25  ;;  %v6691_v19 = vld [vmem:[#allocation7_spill] sm:$0xff] }
 0x1dc   : > { %v4695_v16 = vpop.f32.mrf.mxu1  ;;  %v1985_v59 = vadd.f32 %v6692_v26, %v6691_v19  ;;  %v6694_v41 = vld [vmem:[#allocation23_spill] sm:$0xff]  ;;  %v6702_v19 = vld [vmem:[#allocation28_spill] sm:$0xff] }
 0x1dd   : > { %v2896_v24 = vadd.f32 %v2805_v17, %v2590_v27  ;;  %v2593_v53 = vadd.f32 %v4695_v16, %v2287_v44  ;;  %2977 = vadd.xlane.f32.xlu1 %v6056_v51  ;;  %v2808_v4 = vpop.f32.mrf.mxu0  ;;  %v6062_v9 = vadd.f32 %v5980_v31, %v2898_v28  ;;  %v1988_v25 = vadd.f32 %v6694_v41, %v6693_v15  ;;  %v6695_v27 = vld [vmem:[#allocation18_spill] sm:$0xff]  ;;  %v6704_v15 = vld [vmem:[#allocation25_spill] sm:$0xff] }
 0x1de   : > { %v2502_v5 = vpop.f32.mrf.mxu1 }
 0x1df   : > { %v2899_v21 = vadd.f32 %v4731_v35, %v2593_v53  ;;  %v2591_v13 = vadd.f32 %v2502_v5, %v6687_v50  ;;  %2983 = vadd.xlane.f32.xlu0 %v6062_v9  ;;  %v4734_v40 = vpop.f32.mrf.mxu0  ;;  %v6075_v30 = vadd.f32 %v5980_v31, %v2896_v24  ;;  %v2294_v35 = vadd.f32 %v6695_v27, %v1987_v20  ;;  %v6697_v5 = vld [vmem:[#allocation20_spill] sm:$0xff]  ;;  %v6705_v27 = vld [vmem:[#allocation26_spill] sm:$0xff] }
 0x1e0   : > { %v4698_v49 = vpop.f32.mrf.mxu1  ;;  %v2292_v34 = vadd.f32 %v6697_v5, %v1985_v59 }
 0x1e1   : > { %v2596_v43 = vadd.f32 %v4698_v49, %v2290_v37  ;;  %2973 = vadd.xlane.f32.xlu1 %v6070_v12  ;;  %v2821_v48 = vpop.f32.mrf.mxu0  ;;  %v2897_v22 = vadd.f32 %v2808_v4, %v2591_v13  ;;  %v6082_v23 = vadd.f32 %v5980_v31, %v2899_v21  ;;  %v6698_v13 = vld [vmem:[#allocation22_spill] sm:$0xff]  ;;  %v6699_v49 = vld [vmem:[#allocation9_spill] sm:$0xff] }
 0x1e2   : > { %v2515_v1 = vpop.f32.mrf.mxu1  ;;  %v1991_v8 = vadd.f32 %v5940_v29, %v6699_v49 }
 0x1e3   : > { %v2902_v2 = vadd.f32 %v4734_v40, %v2596_v43  ;;  %v2594_v56 = vadd.f32 %v2515_v1, %v2288_v11  ;;  %2979 = vadd.xlane.f32.xlu0 %v6075_v30  ;;  %v4735_v42 = vpop.f32.mrf.mxu0  ;;  %v6096_v4 = vadd.f32 %v5980_v31, %v2897_v22  ;;  %v2295_v40 = vadd.f32 %v6698_v13, %v1988_v25  ;;  %v6700_v1 = vld [vmem:[#allocation10_spill] sm:$0xff] }
 0x1e4   : > { %v4699_v3 = vpop.f32.mrf.mxu1  ;;  %v1989_v22 = vadd.f32 %v5946_v39, %v6700_v1 }
 0x1e5   : > { %v2900_v33 = vadd.f32 %v2821_v48, %v2594_v56  ;;  %v2597_v17 = vadd.f32 %v4699_v3, %v2291_v36  ;;  %2985 = vadd.xlane.f32.xlu1 %v6082_v23  ;;  %v2824_v44 = vpop.f32.mrf.mxu0  ;;  %v6088_v7 = vadd.f32 %v5980_v31, %v2902_v2  ;;  %v6701_v3 = vld [vmem:[#allocation11_spill] sm:$0xff] }
 0x1e6   : > { %v2518_v28 = vpop.f32.mrf.mxu1  ;;  %v1992_v26 = vadd.f32 %v6702_v19, %v6701_v3 }
 0x1e7   : > { %v2903_v16 = vadd.f32 %v4735_v42, %v2597_v17  ;;  %v2595_v24 = vadd.f32 %v2518_v28, %v6696_v52  ;;  %2991 = vadd.xlane.f32.xlu0 %v6088_v7  ;;  %v4738_v53 = vpop.f32.mrf.mxu0  ;;  %v6101_v50 = vadd.f32 %v5980_v31, %v2900_v33  ;;  %v6703_v33 = vld [vmem:[#allocation24_spill] sm:$0xff] }
 0x1e8   : > { %v4702_v10 = vpop.f32.mrf.mxu1  ;;  %v2298_v17 = vadd.f32 %v6703_v33, %v1991_v8  ;;  %v6707_v8 = vld [vmem:[#allocation12_spill] sm:$0xff] }
 0x1e9   : > { %v2600_v37 = vadd.f32 %v4702_v10, %v2294_v35  ;;  %2981 = vadd.xlane.f32.xlu1 %v6096_v4  ;;  %v2837_v21 = vpop.f32.mrf.mxu0  ;;  %v2901_v43 = vadd.f32 %v2824_v44, %v2595_v24  ;;  %v6108_v55 = vadd.f32 %v5980_v31, %v2903_v16  ;;  %v2296_v35 = vadd.f32 %v6705_v27, %v1989_v22  ;;  %v6708_v22 = vld [vmem:[#allocation29_spill] sm:$0xff] }
 0x1ea   : > { %v2531_v11 = vpop.f32.mrf.mxu1 }
 0x1eb   : > { %v2906_v48 = vadd.f32 %v4738_v53, %v2600_v37  ;;  %v2598_v14 = vadd.f32 %v2531_v11, %v2292_v34  ;;  %2987 = vadd.xlane.f32.xlu0 %v6101_v50  ;;  %v4739_v36 = vpop.f32.mrf.mxu0  ;;  %v6122_v25 = vadd.f32 %v5980_v31, %v2901_v43  ;;  %v6706_v53 = vld [vmem:[#allocation27_spill] sm:$0xff]  ;;  %v1993_v11 = vadd.f32 %v5958_v38, %v6707_v8  ;;  %v6709_v38 = vld [vmem:[#allocation30_spill] sm:$0xff] }
 0x1ec   : > { %v4703_v20 = vpop.f32.mrf.mxu1  ;;  %v2299_v10 = vadd.f32 %v6706_v53, %v1992_v26  ;;  %v6710_v26 = vld [vmem:[#allocation13_spill] sm:$0xff]  ;;  %v4939_v8 = vmov -1e+30  }
 0x1ed   : > { %v2904_v2 = vadd.f32 %v2837_v21, %v2598_v14  ;;  %v2601_v56 = vadd.f32 %v4703_v20, %v2295_v40  ;;  %2993 = vadd.xlane.f32.xlu1 %v6108_v55  ;;  %v2840_v42 = vpop.f32.mrf.mxu0  ;;  %v6114_v29 = vadd.f32 %v5980_v31, %v2906_v48  ;;  %v2300_v19 = vadd.f32 %v6709_v38, %v1993_v11 }
 0x1ee   : > { %v2534_v59 = vpop.f32.mrf.mxu1  ;;  %3392 = vst [vmem:[#allocation2 + $0x30] sm:$0xff] %v4939_v8  ;;  %3393 = vst [vmem:[#allocation2 + $0x38] sm:$0xff] %v4939_v8 }
 0x1ef   : > { %v2907_v44 = vadd.f32 %v4739_v36, %v2601_v56  ;;  %v2599_v41 = vadd.f32 %v2534_v59, %v6704_v15  ;;  %2999 = vadd.xlane.f32.xlu0 %v6114_v29  ;;  %v4742_v39 = vpop.f32.mrf.mxu0  ;;  %v6127_v24 = vadd.f32 %v5980_v31, %v2904_v2  ;;  %v1994_v59 = vadd.f32 %v5969_v58, %v6710_v26 }
 0x1f0   : > { %v4706_v28 = vpop.f32.mrf.mxu1  ;;  %3386 = vst [vmem:[#allocation2] sm:$0xff] %v4939_v8  ;;  %3387 = vst [vmem:[#allocation2 + $0x8] sm:$0xff] %v4939_v8 }
 0x1f1   : > { %v2604_v16 = vadd.f32 %v4706_v28, %v2298_v17  ;;  %2989 = vadd.xlane.f32.xlu1 %v6122_v25  ;;  %v2853_v52 = vpop.f32.mrf.mxu0  ;;  %v2905_v34 = vadd.f32 %v2840_v42, %v2599_v41  ;;  %v6132_v40 = vadd.f32 %v5980_v31, %v2907_v44  ;;  %v2301_v58 = vadd.f32 %v5967_v47, %v1994_v59 }
 0x1f2   : > { %v2547_v5 = vpop.f32.mrf.mxu1  ;;  %3388 = vst [vmem:[#allocation2 + $0x10] sm:$0x3] %v4939_v8  ;;  %3389 = vst [vmem:[#allocation2 + $0x18] sm:$0xff] %v4939_v8 }
 0x1f3   : > { %v2910_v37 = vadd.f32 %v4742_v39, %v2604_v16  ;;  %v2602_v21 = vadd.f32 %v2547_v5, %v2296_v35  ;;  %2995 = vadd.xlane.f32.xlu0 %v6127_v24  ;;  %v4743_v13 = vpop.f32.mrf.mxu0  ;;  %v6143_v42 = vadd.f32 %v5980_v31, %v2905_v34  ;;  %3390 = vst [vmem:[#allocation2 + $0x20] sm:$0xff] %v4939_v8  ;;  %3391 = vst [vmem:[#allocation2 + $0x28] sm:$0x3] %v4939_v8 }
 0x1f4   : > { %v4707_v49 = vpop.f32.mrf.mxu1  ;;  %3394 = vst [vmem:[#allocation2 + $0x40] sm:$0x3] %v4939_v8  ;;  %3395 = vst [vmem:[#allocation2 + $0x48] sm:$0xff] %v4939_v8 }
 0x1f5   : > { %v2908_v43 = vadd.f32 %v2853_v52, %v2602_v21  ;;  %v2605_v48 = vadd.f32 %v4707_v49, %v2299_v10  ;;  %3001 = vadd.xlane.f32.xlu1 %v6132_v40  ;;  %v2856_v14 = vpop.f32.mrf.mxu0  ;;  %v6138_v36 = vadd.f32 %v5980_v31, %v2910_v37  ;;  %3396 = vst [vmem:[#allocation2 + $0x50] sm:$0xff] %v4939_v8  ;;  %3397 = vst [vmem:[#allocation2 + $0x58] sm:$0x3] %v4939_v8 }
 0x1f6   : > { %v2550_v20 = vpop.f32.mrf.mxu1  ;;  %3398 = vst [vmem:[#allocation2 + $0x60] sm:$0xff] %v4939_v8  ;;  %3399 = vst [vmem:[#allocation2 + $0x68] sm:$0xff] %v4939_v8 }
 0x1f7   : > { %v2911_v1 = vadd.f32 %v4743_v13, %v2605_v48  ;;  %v2603_v2 = vadd.f32 %v2550_v20, %v6708_v22  ;;  %3007 = vadd.xlane.f32.xlu0 %v6138_v36  ;;  %v4746_v56 = vpop.f32.mrf.mxu0  ;;  %v6150_v17 = vadd.f32 %v5980_v31, %v2908_v43  ;;  %3400 = vst [vmem:[#allocation2 + $0x70] sm:$0x3] %v4939_v8  ;;  %3401 = vst [vmem:[#allocation2 + $0x78] sm:$0xff] %v4939_v8 }
 0x1f8   : > { %v4710_v3 = vpop.f32.mrf.mxu1  ;;  %3402 = vst [vmem:[#allocation2 + $0x80] sm:$0xff] %v4939_v8  ;;  %3403 = vst [vmem:[#allocation2 + $0x88] sm:$0x3] %v4939_v8 }
 0x1f9   : > { %2997 = vadd.xlane.f32.xlu1 %v6143_v42  ;;  %v2869_v33 = vpop.f32.mrf.mxu0  ;;  %v2608_v44 = vadd.f32 %v4710_v3, %v5962_v60  ;;  %v2909_v41 = vadd.f32 %v2856_v14, %v2603_v2  ;;  %v6155_v28 = vadd.f32 %v5980_v31, %v2911_v1  ;;  %3404 = vst [vmem:[#allocation2 + $0x90] sm:$0xff] %v4939_v8  ;;  %3405 = vst [vmem:[#allocation2 + $0x98] sm:$0xff] %v4939_v8 }
 0x1fa   : > { %v2563_v15 = vpop.f32.mrf.mxu1  ;;  %3406 = vst [vmem:[#allocation2 + $0xa0] sm:$0x3] %v4939_v8  ;;  %3407 = vst [vmem:[#allocation2 + $0xa8] sm:$0xff] %v4939_v8 }
 0x1fb   : > { %v2606_v39 = vadd.f32 %v2563_v15, %v2300_v19  ;;  %3003 = vadd.xlane.f32.xlu0 %v6150_v17  ;;  %v4747_v35 = vpop.f32.mrf.mxu0  ;;  %v2914_v53 = vadd.f32 %v4746_v56, %v2608_v44  ;;  %v6161_v34 = vadd.f32 %v5980_v31, %v2909_v41  ;;  %3408 = vst [vmem:[#allocation2 + $0xb0] sm:$0xff] %v4939_v8  ;;  %3409 = vst [vmem:[#allocation2 + $0xb8] sm:$0x3] %v4939_v8 }
 0x1fc   : > { %v4711_v27 = vpop.f32.mrf.mxu1  ;;  %3410 = vst [vmem:[#allocation2 + $0xc0] sm:$0xff] %v4939_v8  ;;  %3411 = vst [vmem:[#allocation2 + $0xc8] sm:$0xff] %v4939_v8 }
 0x1fd   : > { %v2912_v16 = vadd.f32 %v2869_v33, %v2606_v39  ;;  %v2609_v52 = vadd.f32 %v4711_v27, %v5972_v6  ;;  %3009 = vadd.xlane.f32.xlu1 %v6155_v28  ;;  %v2872_v21 = vpop.f32.mrf.mxu0  ;;  %v6175_v49 = vadd.f32 %v5980_v31, %v2914_v53  ;;  %3412 = vst [vmem:[#allocation2 + $0xd0] sm:$0x3] %v4939_v8  ;;  %3413 = vst [vmem:[#allocation2 + $0xd8] sm:$0xff] %v4939_v8 }
 0x1fe   : > { %v2566_v10 = vpop.f32.mrf.mxu1  ;;  %3414 = vst [vmem:[#allocation2 + $0xe0] sm:$0xff] %v4939_v8  ;;  %3415 = vst [vmem:[#allocation2 + $0xe8] sm:$0x3] %v4939_v8 }
 0x1ff   : > { %v2915_v60 = vadd.f32 %v4747_v35, %v2609_v52  ;;  %v2607_v5 = vadd.f32 %v2566_v10, %v2301_v58  ;;  %v6164_v37 = vadd.f32 %v5980_v31, %v2912_v16  ;;  %3416 = vst [vmem:[#allocation2 + $0xf0] sm:$0xff] %v4939_v8  ;;  %3417 = vst [vmem:[#allocation2 + $0xf8] sm:$0xff] %v4939_v8 }
 0x200   : > { %3418 = vst [vmem:[#allocation2 + $0x100] sm:$0x3] %v4939_v8  ;;  %3419 = vst [vmem:[#allocation2 + $0x108] sm:$0xff] %v4939_v8 }
 0x201   : > { %v2913_v13 = vadd.f32 %v2872_v21, %v2607_v5  ;;  %3005 = vadd.xlane.f32.xlu1 %v6161_v34  ;;  %3011 = vadd.xlane.f32.xlu0 %v6164_v37  ;;  %v6169_v47 = vadd.f32 %v5980_v31, %v2915_v60  ;;  %3420 = vst [vmem:[#allocation2 + $0x110] sm:$0xff] %v4939_v8  ;;  %3421 = vst [vmem:[#allocation2 + $0x118] sm:$0x3] %v4939_v8 }
 0x202   : > { %3422 = vst [vmem:[#allocation2 + $0x120] sm:$0xff] %v4939_v8  ;;  %3423 = vst [vmem:[#allocation2 + $0x128] sm:$0xff] %v4939_v8 }
 0x203   : > { %v6172_v6 = vadd.f32 %v5980_v31, %v2913_v13  ;;  %3424 = vst [vmem:[#allocation2 + $0x130] sm:$0x3] %v4939_v8  ;;  %3425 = vst [vmem:[#allocation2 + $0x138] sm:$0xff] %v4939_v8 }
 0x204   : > { %3426 = vst [vmem:[#allocation2 + $0x140] sm:$0xff] %v4939_v8  ;;  %3427 = vst [vmem:[#allocation2 + $0x148] sm:$0x3] %v4939_v8 }
 0x205   : > { %3013 = vadd.xlane.f32.xlu1 %v6172_v6  ;;  %3015 = vadd.xlane.f32.xlu0 %v6175_v49  ;;  %3428 = vst [vmem:[#allocation2 + $0x150] sm:$0xff] %v4939_v8  ;;  %3429 = vst [vmem:[#allocation2 + $0x158] sm:$0xff] %v4939_v8 }
 0x206   : > { %3430 = vst [vmem:[#allocation2 + $0x160] sm:$0x3] %v4939_v8  ;;  %3431 = vst [vmem:[#allocation2 + $0x168] sm:$0xff] %v4939_v8 }
 0x207   : > { %3432 = vst [vmem:[#allocation2 + $0x170] sm:$0xff] %v4939_v8  ;;  %3433 = vst [vmem:[#allocation2 + $0x178] sm:$0x3] %v4939_v8 }
 0x208   : > { %3434 = vst [vmem:[#allocation2 + $0x180] sm:$0xff] %v4939_v8  ;;  %3435 = vst [vmem:[#allocation2 + $0x188] sm:$0xff] %v4939_v8 }
 0x209   : > { %3017 = vadd.xlane.f32.xlu1 %v6169_v47  ;;  %3436 = vst [vmem:[#allocation2 + $0x190] sm:$0x3] %v4939_v8 }
 0x250   : > { %v2960_v31 = vpop.xlane.xlu0 %2959 }
 0x251   : > { %v3022_v11 = vmul.f32 0.0078125, %v2960_v31 }
 0x253   : > { %v6181_v43 = vsub.f32 %v5989_v54, %v3022_v11 }
 0x254   : > { %v2956_v48 = vpop.xlane.xlu0 %2955 }
 0x255   : > { %v3020_v14 = vmul.f32 0.0078125, %v2956_v48  ;;  %v3086_v20 = vmul.f32 %v6181_v43, %v6181_v43 }
 0x256   : > { %v2958_v1 = vpop.xlane.xlu1 %2957 }
 0x257   : > { %v6186_v22 = vsub.f32 %v5997_v62, %v3020_v14  ;;  %3120 = vadd.xlane.f32.xlu0 %v3086_v20  ;;  %v3021_v56 = vmul.f32 0.0078125, %v2958_v1 }
 0x258   : > { %v2962_v2 = vpop.xlane.xlu0 %2961 }
 0x259   : > { %v3023_v3 = vmul.f32 0.0078125, %v2962_v2  ;;  %v3084_v38 = vmul.f32 %v6186_v22, %v6186_v22  ;;  %v6194_v33 = vsub.f32 %v6004_v46, %v3021_v56 }
 0x25a   : > { %v2968_v19 = vpop.xlane.xlu1 %2967 }
 0x25b   : > { %v6191_v54 = vsub.f32 %v6010_v61, %v3023_v3  ;;  %v3026_v26 = vmul.f32 0.0078125, %v2968_v19  ;;  %3116 = vadd.xlane.f32.xlu0 %v3084_v38 }
 0x25c   : > { %v2964_v59 = vpop.xlane.xlu0 %2963 }
 0x25d   : > { %v6197_v62 = vsub.f32 %v6018_v45, %v3026_v26  ;;  %v3024_v44 = vmul.f32 0.0078125, %v2964_v59  ;;  %v3087_v15 = vmul.f32 %v6191_v54, %v6191_v54  ;;  %v3085_v45 = vmul.f32 %v6194_v33, %v6194_v33 }
 0x25e   : > { %v2970_v41 = vpop.xlane.xlu1 %2969 }
 0x25f   : > { %v6202_v39 = vsub.f32 %v6023_v0, %v3024_v44  ;;  %v3027_v27 = vmul.f32 0.0078125, %v2970_v41  ;;  %3122 = vadd.xlane.f32.xlu1 %v3087_v15  ;;  %v3090_v61 = vmul.f32 %v6197_v62, %v6197_v62 }
 0x260   : > { %v2976_v35 = vpop.xlane.xlu0 %2975 }
 0x261   : > { %v6207_v46 = vsub.f32 %v6030_v18, %v3027_v27  ;;  %v3030_v58 = vmul.f32 0.0078125, %v2976_v35  ;;  %3128 = vadd.xlane.f32.xlu0 %v3090_v61  ;;  %v3088_v53 = vmul.f32 %v6202_v39, %v6202_v39 }
 0x262   : > { %v2966_v16 = vpop.xlane.xlu1 %2965 }
 0x263   : > { %v6212_v52 = vsub.f32 %v6036_v57, %v3030_v58  ;;  %v3025_v0 = vmul.f32 0.0078125, %v2966_v16  ;;  %3118 = vadd.xlane.f32.xlu1 %v3085_v45  ;;  %v3091_v5 = vmul.f32 %v6207_v46, %v6207_v46 }
 0x264   : > { %v2972_v10 = vpop.xlane.xlu0 %2971 }
 0x265   : > { %v6217_v60 = vsub.f32 %v6044_v32, %v3025_v0  ;;  %v3028_v18 = vmul.f32 0.0078125, %v2972_v10  ;;  %3124 = vadd.xlane.f32.xlu0 %v3088_v53  ;;  %v3094_v8 = vmul.f32 %v6212_v52, %v6212_v52 }
 0x266   : > { %v2978_v21 = vpop.xlane.xlu1 %2977 }
 0x267   : > { %v6222_v13 = vsub.f32 %v6049_v63, %v3028_v18  ;;  %v3031_v57 = vmul.f32 0.0078125, %v2978_v21  ;;  %3130 = vadd.xlane.f32.xlu1 %v3091_v5  ;;  %v3089_v48 = vmul.f32 %v6217_v60, %v6217_v60 }
 0x268   : > { %v2984_v31 = vpop.xlane.xlu0 %2983 }
 0x269   : > { %v6227_v11 = vsub.f32 %v6056_v51, %v3031_v57  ;;  %v3034_v32 = vmul.f32 0.0078125, %v2984_v31  ;;  %3136 = vadd.xlane.f32.xlu0 %v3094_v8  ;;  %v3092_v1 = vmul.f32 %v6222_v13, %v6222_v13 }
 0x26a   : > { %v2974_v14 = vpop.xlane.xlu1 %2973 }
 0x26b   : > { %v6232_v20 = vsub.f32 %v6062_v9, %v3034_v32  ;;  %v3029_v63 = vmul.f32 0.0078125, %v2974_v14  ;;  %3126 = vadd.xlane.f32.xlu1 %v3089_v48  ;;  %v3095_v3 = vmul.f32 %v6227_v11, %v6227_v11 }
 0x26c   : > { %v2980_v2 = vpop.xlane.xlu0 %2979 }
 0x26d   : > { %v6237_v56 = vsub.f32 %v6070_v12, %v3029_v63  ;;  %v3032_v51 = vmul.f32 0.0078125, %v2980_v2  ;;  %3132 = vadd.xlane.f32.xlu0 %v3092_v1  ;;  %v3098_v26 = vmul.f32 %v6232_v20, %v6232_v20 }
 0x26e   : > { %v2986_v38 = vpop.xlane.xlu1 %2985 }
 0x26f   : > { %v6242_v19 = vsub.f32 %v6075_v30, %v3032_v51  ;;  %v3035_v9 = vmul.f32 0.0078125, %v2986_v38  ;;  %3138 = vadd.xlane.f32.xlu1 %v3095_v3  ;;  %v3093_v15 = vmul.f32 %v6237_v56, %v6237_v56 }
 0x270   : > { %v2992_v59 = vpop.xlane.xlu0 %2991 }
 0x271   : > { %v6247_v44 = vsub.f32 %v6082_v23, %v3035_v9  ;;  %v3038_v12 = vmul.f32 0.0078125, %v2992_v59  ;;  %3144 = vadd.xlane.f32.xlu0 %v3098_v26  ;;  %v3096_v61 = vmul.f32 %v6242_v19, %v6242_v19 }
 0x272   : > { %v2982_v41 = vpop.xlane.xlu1 %2981 }
 0x273   : > { %v6252_v27 = vsub.f32 %v6088_v7, %v3038_v12  ;;  %v3033_v30 = vmul.f32 0.0078125, %v2982_v41  ;;  %3134 = vadd.xlane.f32.xlu1 %v3093_v15  ;;  %v3099_v45 = vmul.f32 %v6247_v44, %v6247_v44 }
 0x274   : > { %v2988_v35 = vpop.xlane.xlu0 %2987 }
 0x275   : > { %v6257_v58 = vsub.f32 %v6096_v4, %v3033_v30  ;;  %v3036_v23 = vmul.f32 0.0078125, %v2988_v35  ;;  %3140 = vadd.xlane.f32.xlu0 %v3096_v61  ;;  %v3102_v53 = vmul.f32 %v6252_v27, %v6252_v27 }
 0x276   : > { %v2994_v16 = vpop.xlane.xlu1 %2993 }
 0x277   : > { %v6262_v0 = vsub.f32 %v6101_v50, %v3036_v23  ;;  %v3039_v7 = vmul.f32 0.0078125, %v2994_v16  ;;  %3146 = vadd.xlane.f32.xlu1 %v3099_v45  ;;  %v3097_v5 = vmul.f32 %v6257_v58, %v6257_v58 }
 0x278   : > { %v3000_v10 = vpop.xlane.xlu0 %2999 }
 0x279   : > { %v6267_v18 = vsub.f32 %v6108_v55, %v3039_v7  ;;  %v3042_v4 = vmul.f32 0.0078125, %v3000_v10  ;;  %3152 = vadd.xlane.f32.xlu0 %v3102_v53  ;;  %v3100_v8 = vmul.f32 %v6262_v0, %v6262_v0 }
 0x27a   : > { %v2990_v21 = vpop.xlane.xlu1 %2989 }
 0x27b   : > { %v6272_v57 = vsub.f32 %v6114_v29, %v3042_v4  ;;  %v3037_v50 = vmul.f32 0.0078125, %v2990_v21  ;;  %3142 = vadd.xlane.f32.xlu1 %v3097_v5  ;;  %v3103_v48 = vmul.f32 %v6267_v18, %v6267_v18 }
 0x27c   : > { %v2996_v31 = vpop.xlane.xlu0 %2995 }
 0x27d   : > { %v6277_v32 = vsub.f32 %v6122_v25, %v3037_v50  ;;  %v3040_v55 = vmul.f32 0.0078125, %v2996_v31  ;;  %3148 = vadd.xlane.f32.xlu0 %v3100_v8  ;;  %v3106_v1 = vmul.f32 %v6272_v57, %v6272_v57 }
 0x27e   : > { %v3002_v14 = vpop.xlane.xlu1 %3001 }
 0x27f   : > { %v6282_v63 = vsub.f32 %v6127_v24, %v3040_v55  ;;  %v3043_v29 = vmul.f32 0.0078125, %v3002_v14  ;;  %3154 = vadd.xlane.f32.xlu1 %v3103_v48  ;;  %v3101_v3 = vmul.f32 %v6277_v32, %v6277_v32 }
 0x280   : > { %v3008_v2 = vpop.xlane.xlu0 %3007 }
 0x281   : > { %v6287_v51 = vsub.f32 %v6132_v40, %v3043_v29  ;;  %v3046_v25 = vmul.f32 0.0078125, %v3008_v2  ;;  %3160 = vadd.xlane.f32.xlu0 %v3106_v1  ;;  %v3104_v26 = vmul.f32 %v6282_v63, %v6282_v63 }
 0x282   : > { %v2998_v38 = vpop.xlane.xlu1 %2997 }
 0x283   : > { %v6292_v9 = vsub.f32 %v6138_v36, %v3046_v25  ;;  %v3041_v24 = vmul.f32 0.0078125, %v2998_v38  ;;  %3150 = vadd.xlane.f32.xlu1 %v3101_v3  ;;  %v3107_v15 = vmul.f32 %v6287_v51, %v6287_v51 }
 0x284   : > { %v3004_v59 = vpop.xlane.xlu0 %3003 }
 0x285   : > { %v6297_v12 = vsub.f32 %v6143_v42, %v3041_v24  ;;  %v3044_v40 = vmul.f32 0.0078125, %v3004_v59  ;;  %3156 = vadd.xlane.f32.xlu0 %v3104_v26  ;;  %v3110_v61 = vmul.f32 %v6292_v9, %v6292_v9 }
 0x286   : > { %v3010_v41 = vpop.xlane.xlu1 %3009 }
 0x287   : > { %v6302_v30 = vsub.f32 %v6150_v17, %v3044_v40  ;;  %v3047_v36 = vmul.f32 0.0078125, %v3010_v41  ;;  %3162 = vadd.xlane.f32.xlu1 %v3107_v15  ;;  %v3105_v42 = vmul.f32 %v6297_v12, %v6297_v12 }
 0x289   : > { %v6307_v35 = vsub.f32 %v6155_v28, %v3047_v36  ;;  %3168 = vadd.xlane.f32.xlu0 %v3110_v61  ;;  %v3108_v17 = vmul.f32 %v6302_v30, %v6302_v30 }
 0x28a   : > { %v3006_v23 = vpop.xlane.xlu1 %3005  ;;  %v3012_v45 = vpop.xlane.xlu0 %3011 }
 0x28b   : > { %v3045_v16 = vmul.f32 0.0078125, %v3006_v23  ;;  %v3048_v7 = vmul.f32 0.0078125, %v3012_v45  ;;  %3158 = vadd.xlane.f32.xlu1 %v3105_v42  ;;  %v3111_v28 = vmul.f32 %v6307_v35, %v6307_v35 }
 0x28d   : > { %v6314_v53 = vsub.f32 %v6161_v34, %v3045_v16  ;;  %v6317_v10 = vsub.f32 %v6164_v37, %v3048_v7  ;;  %3164 = vadd.xlane.f32.xlu0 %v3108_v17 }
 0x28e   : > { %v3014_v4 = vpop.xlane.xlu1 %3013  ;;  %v3016_v5 = vpop.xlane.xlu0 %3015 }
 0x28f   : > { %v3049_v21 = vmul.f32 0.0078125, %v3014_v4  ;;  %v3050_v50 = vmul.f32 0.0078125, %v3016_v5  ;;  %3170 = vadd.xlane.f32.xlu1 %v3111_v28  ;;  %v3112_v8 = vmul.f32 %v6317_v10, %v6317_v10  ;;  %v3109_v37 = vmul.f32 %v6314_v53, %v6314_v53  ;;  %v6343_v4 = vld [vmem:[%s6656_s3] ss:$0 sm:$0xff] }
 0x291   : > { %v6324_v31 = vsub.f32 %v6172_v6, %v3049_v21  ;;  %v6327_v34 = vsub.f32 %v6175_v49, %v3050_v50  ;;  %3172 = vadd.xlane.f32.xlu0 %v3112_v8 }
 0x292   : > { %v3018_v55 = vpop.xlane.xlu1 %3017 }
 0x293   : > { %v3051_v48 = vmul.f32 0.0078125, %v3018_v55  ;;  %3166 = vadd.xlane.f32.xlu1 %v3109_v37  ;;  %v3114_v14 = vmul.f32 %v6327_v34, %v6327_v34  ;;  %v3113_v6 = vmul.f32 %v6324_v31, %v6324_v31  ;;  %v6349_v37 = vld [vmem:[%s6657_s4] ss:$0 sm:$0xff] }
 0x295   : > { %v6334_v29 = vsub.f32 %v6169_v47, %v3051_v48  ;;  %3176 = vadd.xlane.f32.xlu0 %v3114_v14 }
 0x297   : > { %3174 = vadd.xlane.f32.xlu1 %v3113_v6  ;;  %v3115_v49 = vmul.f32 %v6334_v29, %v6334_v29 }
 0x29b   : > { %3178 = vadd.xlane.f32.xlu1 %v3115_v49 }
 0x2e0   : > { %v3121_v1 = vpop.xlane.xlu0 %3120 }
 0x2e1   : > { %v3182_v2 = vmul.f32 0.0078125, %v3121_v1 }
 0x2e3   : > { %v3214_v25 = vadd.f32 1e-06, %v3182_v2 }
 0x2e4   : > { %v3117_v3 = vpop.xlane.xlu0 %3116 }
 0x2e5   : > { %4813 = vrsqrt.f32 %v3214_v25  ;;  %v3180_v38 = vmul.f32 0.0078125, %v3117_v3 }
 0x2e7   : > { %v3212_v24 = vadd.f32 1e-06, %v3180_v38 }
 0x2e8   : > { %v3123_v26 = vpop.xlane.xlu1 %3122 }
 0x2e9   : > { %4815 = vrsqrt.f32 %v3212_v24  ;;  %v3183_v47 = vmul.f32 0.0078125, %v3123_v26  ;;  %v3489_v24 = vld [vmem:[#allocation2 + $0x1] sm:$0xff] }
 0x2ea   : > { %v3129_v59 = vpop.xlane.xlu0 %3128 }
 0x2eb   : > { %v3215_v40 = vadd.f32 1e-06, %v3183_v47  ;;  %v3186_v15 = vmul.f32 0.0078125, %v3129_v59 }
 0x2ec   : > { %v3119_v41 = vpop.xlane.xlu1 %3118 }
 0x2ed   : > { %4817 = vrsqrt.f32 %v3215_v40  ;;  %v3218_v36 = vadd.f32 1e-06, %v3186_v15  ;;  %v3181_v61 = vmul.f32 0.0078125, %v3119_v41 }
 0x2ee   : > { %v3125_v42 = vpop.xlane.xlu0 %3124 }
 0x2ef   : > { %4819 = vrsqrt.f32 %v3218_v36  ;;  %v3213_v23 = vadd.f32 1e-06, %v3181_v61  ;;  %v3184_v45 = vmul.f32 0.0078125, %v3125_v42 }
 0x2f0   : > { %v3131_v16 = vpop.xlane.xlu1 %3130 }
 0x2f1   : > { %4821 = vrsqrt.f32 %v3213_v23  ;;  %v3216_v7 = vadd.f32 1e-06, %v3184_v45  ;;  %v3187_v17 = vmul.f32 0.0078125, %v3131_v16  ;;  %v3505_v23 = vmax.f32 %v3489_v24, -1e+30 }
 0x2f2   : > { %v4814_v28 = vpop.eup %4813  ;;  %v3137_v5 = vpop.xlane.xlu0 %3136 }
 0x2f3   : > { %v3278_v21 = vmul.f32 %v4814_v28, %v6181_v43  ;;  %4823 = vrsqrt.f32 %v3216_v7  ;;  %v3219_v50 = vadd.f32 1e-06, %v3187_v17  ;;  %v3190_v8 = vmul.f32 0.0078125, %v3137_v5  ;;  %v3521_v5 = vld [vmem:[#allocation2 + $0x2] sm:$0xff] }
 0x2f4   : > { %v3127_v55 = vpop.xlane.xlu1 %3126 }
 0x2f5   : > { %v3317_v48 = vmul.f32 %v6343_v4, %v3278_v21  ;;  %4825 = vrsqrt.f32 %v3219_v50  ;;  %v3222_v14 = vadd.f32 1e-06, %v3190_v8  ;;  %v3185_v6 = vmul.f32 0.0078125, %v3127_v55 }
 0x2f6   : > { %v4816_v49 = vpop.eup %4815  ;;  %v3133_v1 = vpop.xlane.xlu0 %3132 }
 0x2f7   : > { %v6353_v2 = vadd.f32 %v6349_v37, %v3317_v48  ;;  %v3276_v43 = vmul.f32 %v4816_v49, %v6186_v22  ;;  %4827 = vrsqrt.f32 %v3222_v14  ;;  %v3217_v25 = vadd.f32 1e-06, %v3185_v6 }
 0x2f8   : > { %v3188_v3 = vmul.f32 0.0078125, %v3133_v1  ;;  %v3139_v38 = vpop.xlane.xlu1 %3138  ;;  %v3537_v1 = vmax.f32 %v3505_v23, %v3521_v5 }
 0x2f9   : > { %3443 = vst [vmem:[#allocation2 + $0x31] sm:$0xff] %v6353_v2  ;;  %v3315_v26 = vmul.f32 %v6343_v4, %v3276_v43  ;;  %4829 = vrsqrt.f32 %v3217_v25  ;;  %v3191_v47 = vmul.f32 0.0078125, %v3139_v38  ;;  %v3490_v43 = vld [vmem:[#allocation2 + $0x9] sm:$0xff] }
 0x2fa   : > { %v4818_v59 = vpop.eup %4817  ;;  %v3220_v40 = vadd.f32 1e-06, %v3188_v3  ;;  %v3145_v15 = vpop.xlane.xlu0 %3144 }
 0x2fb   : > { %v6359_v41 = vadd.f32 %v6349_v37, %v3315_v26  ;;  %v3279_v36 = vmul.f32 %v4818_v59, %v6191_v54  ;;  %v3223_v22 = vadd.f32 1e-06, %v3191_v47  ;;  %v3194_v61 = vmul.f32 0.0078125, %v3145_v15 }
 0x2fc   : > { %v4820_v42 = vpop.eup %4819  ;;  %4831 = vrsqrt.f32 %v3220_v40  ;;  %v3135_v45 = vpop.xlane.xlu1 %3134 }
 0x2fd   : > { %3441 = vst [vmem:[#allocation2 + $0x19] sm:$0xff] %v6359_v41  ;;  %v3318_v16 = vmul.f32 %v6343_v4, %v3279_v36  ;;  %v3282_v7 = vmul.f32 %v4820_v42, %v6197_v62  ;;  %4833 = vrsqrt.f32 %v3223_v22  ;;  %v3226_v17 = vadd.f32 1e-06, %v3194_v61 }
 0x2fe   : > { %v4822_v28 = vpop.eup %4821  ;;  %v3189_v21 = vmul.f32 0.0078125, %v3135_v45  ;;  %v3141_v50 = vpop.xlane.xlu0 %3140  ;;  %v3506_v61 = vmax.f32 %v3490_v43, -1e+30  ;;  %v3522_v45 = vld [vmem:[#allocation2 + $0xa] sm:$0xff] }
 0x2ff   : > { %v6366_v54 = vadd.f32 %v6349_v37, %v3318_v16  ;;  %v3321_v8 = vmul.f32 %v6343_v4, %v3282_v7  ;;  %v3277_v55 = vmul.f32 %v4822_v28, %v6194_v33  ;;  %4835 = vrsqrt.f32 %v3226_v17 }
 0x300   : > { %v4824_v48 = vpop.eup %4823  ;;  %v3221_v14 = vadd.f32 1e-06, %v3189_v21  ;;  %v3192_v6 = vmul.f32 0.0078125, %v3141_v50  ;;  %v3147_v49 = vpop.xlane.xlu1 %3146 }
 0x301   : > { %3444 = vst [vmem:[#allocation2 + $0x39] sm:$0xff] %v6366_v54  ;;  %v6372_v62 = vadd.f32 %v6349_v37, %v3321_v8  ;;  %v3316_v25 = vmul.f32 %v6343_v4, %v3277_v55  ;;  %v3280_v3 = vmul.f32 %v4824_v48, %v6202_v39  ;;  %v3195_v33 = vmul.f32 0.0078125, %v3147_v49 }
 0x302   : > { %v4826_v38 = vpop.eup %4825  ;;  %4837 = vrsqrt.f32 %v3221_v14  ;;  %v3224_v24 = vadd.f32 1e-06, %v3192_v6  ;;  %v3153_v26 = vpop.xlane.xlu0 %3152 }
 0x303   : > { %3447 = vst [vmem:[#allocation2 + $0x61] sm:$0xff] %v6372_v62  ;;  %v6378_v47 = vadd.f32 %v6349_v37, %v3316_v25  ;;  %v3319_v59 = vmul.f32 %v6343_v4, %v3280_v3  ;;  %v3283_v40 = vmul.f32 %v4826_v38, %v6207_v46  ;;  %v3198_v15 = vmul.f32 0.0078125, %v3153_v26  ;;  %v3475_v46 = vld [vmem:[#allocation2 + $0x30] sm:$0xff] }
 0x304   : > { %v4828_v36 = vpop.eup %4827  ;;  %v3553_v22 = vld [vmem:[#allocation2 + $0x18] sm:$0xff]  ;;  %4839 = vrsqrt.f32 %v3224_v24  ;;  %v3227_v39 = vadd.f32 1e-06, %v3195_v33  ;;  %v3143_v42 = vpop.xlane.xlu1 %3142  ;;  %v3507_v3 = vmax.f32 %v3475_v46, %v6353_v2 }
 0x305   : > { %v3569_v23 = vmax.f32 %v3537_v1, %v3553_v22  ;;  %3442 = vst [vmem:[#allocation2 + $0x21] sm:$0xff] %v6378_v47  ;;  %v6384_v16 = vadd.f32 %v6349_v37, %v3319_v59  ;;  %v3322_v7 = vmul.f32 %v6343_v4, %v3283_v40  ;;  %v3286_v17 = vmul.f32 %v4828_v36, %v6212_v52 }
 0x306   : > { %v4830_v28 = vpop.eup %4829  ;;  %4841 = vrsqrt.f32 %v3227_v39  ;;  %v3230_v5 = vadd.f32 1e-06, %v3198_v15  ;;  %v3193_v21 = vmul.f32 0.0078125, %v3143_v42  ;;  %v3149_v50 = vpop.xlane.xlu0 %3148  ;;  %v3538_v52 = vmax.f32 %v3506_v61, %v3522_v45 }
 0x307   : > { %3445 = vst [vmem:[#allocation2 + $0x49] sm:$0xff] %v6384_v16  ;;  %v6390_v8 = vadd.f32 %v6349_v37, %v3322_v7  ;;  %v3325_v55 = vmul.f32 %v6343_v4, %v3286_v17  ;;  %v3281_v48 = vmul.f32 %v4830_v28, %v6217_v60  ;;  %v3196_v1 = vmul.f32 0.0078125, %v3149_v50 }
 0x308   : > { %v6394_v14 = vld [vmem:[#allocation2 + $0x38] sm:$0xff]  ;;  %4843 = vrsqrt.f32 %v3230_v5  ;;  %v3225_v49 = vadd.f32 1e-06, %v3193_v21  ;;  %v3155_v43 = vpop.xlane.xlu1 %3154  ;;  %v3601_v38 = vmax.f32 %v3569_v23, %v6359_v41 }
 0x309   : > { %v6396_v6 = vld [vmem:[#allocation2 + $0x32] sm:$0xff]  ;;  %v4832_v25 = vpop.eup %4831  ;;  %3448 = vst [vmem:[#allocation2 + $0x69] sm:$0xff] %v6390_v8  ;;  %v6402_v24 = vadd.f32 %v6349_v37, %v3325_v55  ;;  %v3320_v60 = vmul.f32 %v6343_v4, %v3281_v48  ;;  %v3228_v59 = vadd.f32 1e-06, %v3196_v1  ;;  %v3199_v40 = vmul.f32 0.0078125, %v3155_v43 }
 0x30a   : > { %v4834_v33 = vpop.eup %4833  ;;  %v3284_v26 = vmul.f32 %v4832_v25, %v6222_v13  ;;  %4845 = vrsqrt.f32 %v3225_v49  ;;  %v3161_v15 = vpop.xlane.xlu0 %3160  ;;  %v3508_v36 = vmax.f32 %v6394_v14, %v6366_v54  ;;  %v3539_v22 = vmax.f32 %v3507_v3, %v6396_v6  ;;  %v3477_v25 = vld [vmem:[#allocation2 + $0x60] sm:$0xff] }
 0x30b   : > { %3451 = vst [vmem:[#allocation2 + $0x91] sm:$0xff] %v6402_v24  ;;  %v6411_v41 = vadd.f32 %v6349_v37, %v3320_v60  ;;  %v3287_v61 = vmul.f32 %v4834_v33, %v6227_v11  ;;  %4847 = vrsqrt.f32 %v3228_v59  ;;  %v3231_v45 = vadd.f32 1e-06, %v3199_v40  ;;  %v3524_v33 = vld [vmem:[#allocation2 + $0x3a] sm:$0xff] }
 0x30c   : > { %v4836_v39 = vpop.eup %4835  ;;  %v3554_v42 = vld [vmem:[#allocation2 + $0x20] sm:$0xff]  ;;  %v3323_v13 = vmul.f32 %v6343_v4, %v3284_v26  ;;  %v3202_v7 = vmul.f32 0.0078125, %v3161_v15  ;;  %v3151_v17 = vpop.xlane.xlu1 %3150 }
 0x30d   : > { %v3617_v23 = vld [vmem:[#allocation2 + $0x1a] sm:$0xff]  ;;  %v3570_v28 = vmax.f32 %v3538_v52, %v3554_v42  ;;  %3446 = vst [vmem:[#allocation2 + $0x51] sm:$0xff] %v6411_v41  ;;  %v3326_v21 = vmul.f32 %v6343_v4, %v3287_v61  ;;  %v3290_v50 = vmul.f32 %v4836_v39, %v6232_v20  ;;  %4849 = vrsqrt.f32 %v3231_v45  ;;  %v3618_v26 = vld [vmem:[#allocation2 + $0x22] sm:$0xff] }
 0x30e   : > { %v3633_v5 = vmax.f32 %v3601_v38, %v3617_v23  ;;  %v3555_v55 = vld [vmem:[#allocation2 + $0x48] sm:$0xff]  ;;  %v6419_v11 = vadd.f32 %v6349_v37, %v3323_v13  ;;  %v3234_v48 = vadd.f32 1e-06, %v3202_v7  ;;  %v3197_v49 = vmul.f32 0.0078125, %v3151_v17  ;;  %v3157_v1 = vpop.xlane.xlu0 %3156 }
 0x30f   : > { %v4838_v43 = vpop.eup %4837  ;;  %v3602_v3 = vmax.f32 %v3570_v28, %v6378_v47  ;;  %v3571_v38 = vmax.f32 %v3539_v22, %v3555_v55  ;;  %v6423_v60 = vadd.f32 %v6349_v37, %v3326_v21  ;;  %v3329_v59 = vmul.f32 %v6343_v4, %v3290_v50 }
 0x310   : > { %v3666_v52 = vmax.f32 %v3633_v5, %v3475_v46  ;;  %v6425_v20 = vld [vmem:[#allocation2 + $0x68] sm:$0xff]  ;;  %3449 = vst [vmem:[#allocation2 + $0x79] sm:$0xff] %v6419_v11  ;;  %v3285_v40 = vmul.f32 %v4838_v43, %v6237_v56  ;;  %4851 = vrsqrt.f32 %v3234_v48  ;;  %v3229_v15 = vadd.f32 1e-06, %v3197_v49  ;;  %v3163_v61 = vpop.xlane.xlu1 %3162 }
 0x311   : > { %v4840_v39 = vpop.eup %4839  ;;  %v3540_v47 = vmax.f32 %v3508_v36, %v3524_v33  ;;  %v3634_v46 = vmax.f32 %v3602_v3, %v3618_v26  ;;  %3452 = vst [vmem:[#allocation2 + $0x99] sm:$0xff] %v6423_v60  ;;  %v3509_v42 = vmax.f32 %v3477_v25, %v6372_v62  ;;  %v6434_v23 = vadd.f32 %v6349_v37, %v3329_v59  ;;  %v3525_v28 = vld [vmem:[#allocation2 + $0x62] sm:$0xff] }
 0x312   : > { %v3698_v22 = vmax.f32 %v3666_v52, %v6353_v2  ;;  %v3324_v13 = vmul.f32 %v6343_v4, %v3285_v40  ;;  %v3288_v45 = vmul.f32 %v4840_v39, %v6242_v19  ;;  %v3603_v36 = vmax.f32 %v3571_v38, %v6384_v16 }
 0x313   : > { %v4842_v56 = vpop.eup %4841  ;;  %v3667_v7 = vmax.f32 %v3634_v46, %v6394_v14  ;;  %v3510_v2 = vmax.f32 %v6425_v20, %v6390_v8  ;;  %3455 = vst [vmem:[#allocation2 + $0xc1] sm:$0xff] %v6434_v23  ;;  %4853 = vrsqrt.f32 %v3229_v15  ;;  %v3169_v14 = vpop.xlane.xlu0 %3168  ;;  %v3200_v3 = vmul.f32 0.0078125, %v3157_v1  ;;  %v3479_v15 = vld [vmem:[#allocation2 + $0x90] sm:$0xff] }
 0x314   : > { %v3730_v17 = vmax.f32 %v3698_v22, %v6396_v6  ;;  %v3556_v5 = vld [vmem:[#allocation2 + $0x50] sm:$0xff]  ;;  %v6445_v50 = vadd.f32 %v6349_v37, %v3324_v13  ;;  %v3327_v19 = vmul.f32 %v6343_v4, %v3288_v45  ;;  %v3291_v55 = vmul.f32 %v4842_v56, %v6247_v44  ;;  %v6449_v6 = vpop.xlane.xlu1 %3158 }
 0x315   : > { %v3619_v21 = vld [vmem:[#allocation2 + $0x4a] sm:$0xff]  ;;  %v4844_v16 = vpop.eup %4843  ;;  %v3699_v48 = vmax.f32 %v3667_v7, %v6366_v54  ;;  %v3572_v49 = vmax.f32 %v3540_v47, %v3556_v5  ;;  %v3541_v52 = vmax.f32 %v3509_v42, %v3525_v28  ;;  %v3232_v46 = vadd.f32 1e-06, %v3200_v3  ;;  %v3620_v22 = vld [vmem:[#allocation2 + $0x52] sm:$0xff] }
 0x316   : > { %3746 = vst [vmem:[#allocation2] sm:$0xff] %v3730_v17  ;;  %v3635_v43 = vmax.f32 %v3603_v36, %v3619_v21  ;;  %3450 = vst [vmem:[#allocation2 + $0x81] sm:$0xff] %v6445_v50  ;;  %v6454_v38 = vadd.f32 %v6349_v37, %v3327_v19  ;;  %v3330_v26 = vmul.f32 %v6343_v4, %v3291_v55  ;;  %v3526_v1 = vld [vmem:[#allocation2 + $0x6a] sm:$0xff]  ;;  %v3203_v17 = vmul.f32 0.0078125, %v3163_v61 }
 0x317   : > { %v3294_v44 = vmul.f32 %v4844_v16, %v6252_v27  ;;  %v4846_v59 = vpop.eup %4845  ;;  %v3731_v40 = vmax.f32 %v3699_v48, %v3524_v33  ;;  %v3604_v54 = vmax.f32 %v3572_v49, %v6411_v41  ;;  %v3557_v47 = vld [vmem:[#allocation2 + $0x78] sm:$0xff]  ;;  %v3542_v41 = vmax.f32 %v3510_v2, %v3526_v1  ;;  %v3165_v55 = vpop.xlane.xlu0 %3164 }
 0x318   : > { %v3668_v39 = vmax.f32 %v3635_v43, %v3477_v25  ;;  %v3573_v42 = vmax.f32 %v3541_v52, %v3557_v47  ;;  %v6459_v13 = vld [vmem:[#allocation2 + $0x98] sm:$0xff]  ;;  %3453 = vst [vmem:[#allocation2 + $0xa9] sm:$0xff] %v6454_v38  ;;  %v6463_v45 = vadd.f32 %v6349_v37, %v3330_v26  ;;  %v3289_v33 = vmul.f32 %v4846_v59, %v6257_v58  ;;  %v4848_v56 = vpop.eup %4847  ;;  %v6469_v36 = vpop.xlane.xlu1 %3170 }
 0x319   : > { %v3333_v27 = vmul.f32 %v6343_v4, %v3294_v44  ;;  %3747 = vst [vmem:[#allocation2 + $0x8] sm:$0xff] %v3731_v40  ;;  %v3636_v25 = vmax.f32 %v3604_v54, %v3620_v22  ;;  %v3511_v5 = vmax.f32 %v3479_v15, %v6402_v24  ;;  %v6472_v21 = vld [vmem:[#allocation2 + $0x92] sm:$0xff]  ;;  %v3292_v2 = vmul.f32 %v4848_v56, %v6262_v0 }
 0x31a   : > { %v3700_v7 = vmax.f32 %v3668_v39, %v6372_v62  ;;  %3456 = vst [vmem:[#allocation2 + $0xc9] sm:$0xff] %v6463_v45  ;;  %v3328_v58 = vmul.f32 %v6343_v4, %v3289_v33  ;;  %v4850_v16 = vpop.eup %4849  ;;  %v3512_v48 = vmax.f32 %v6459_v13, %v6423_v60  ;;  %4855 = vrsqrt.f32 %v3232_v46 }
 0x31b   : > { %v6476_v19 = vadd.f32 %v6349_v37, %v3333_v27  ;;  %v3669_v62 = vmax.f32 %v3636_v25, %v6425_v20  ;;  %v3605_v49 = vmax.f32 %v3573_v42, %v6419_v11  ;;  %v3331_v0 = vmul.f32 %v6343_v4, %v3292_v2 }
 0x31c   : > { %v3732_v61 = vmax.f32 %v3700_v7, %v3525_v28  ;;  %v6490_v43 = vadd.f32 %v6349_v37, %v3328_v58  ;;  %v3295_v3 = vmul.f32 %v4850_v16, %v6267_v18  ;;  %v3543_v52 = vmax.f32 %v3511_v5, %v6472_v21  ;;  %v3167_v42 = vpop.xlane.xlu1 %3166 }
 0x31d   : > { %3459 = vst [vmem:[#allocation2 + $0xf1] sm:$0xff] %v6476_v19  ;;  %v4852_v20 = vpop.eup %4851  ;;  %v3701_v28 = vmax.f32 %v3669_v62, %v6390_v8  ;;  %v3558_v26 = vld [vmem:[#allocation2 + $0x80] sm:$0xff]  ;;  %v3235_v59 = vadd.f32 1e-06, %v3203_v17  ;;  %v3206_v40 = vmul.f32 0.0078125, %v3169_v14  ;;  %v6498_v39 = vadd.f32 %v6349_v37, %v3331_v0 }
 0x31e   : > { %3748 = vst [vmem:[#allocation2 + $0x18] sm:$0xff] %v3732_v61  ;;  %v3621_v44 = vld [vmem:[#allocation2 + $0x7a] sm:$0xff]  ;;  %v3574_v11 = vmax.f32 %v3542_v41, %v3558_v26  ;;  %3454 = vst [vmem:[#allocation2 + $0xb1] sm:$0xff] %v6490_v43  ;;  %v3334_v47 = vmul.f32 %v6343_v4, %v3295_v3  ;;  %v3298_v8 = vmul.f32 %v4852_v20, %v6272_v57  ;;  %v3173_v41 = vpop.xlane.xlu0 %3172  ;;  %v3622_v17 = vld [vmem:[#allocation2 + $0x82] sm:$0xff]  ;;  %v3201_v5 = vmul.f32 0.0078125, %v6449_v6 }
 0x31f   : > { %v3637_v54 = vmax.f32 %v3605_v49, %v3621_v44  ;;  %v3733_v18 = vmax.f32 %v3701_v28, %v3526_v1  ;;  %v3559_v46 = vld [vmem:[#allocation2 + $0xa8] sm:$0xff]  ;;  %4857 = vrsqrt.f32 %v3235_v59  ;;  %v3238_v22 = vadd.f32 1e-06, %v3206_v40  ;;  %3457 = vst [vmem:[#allocation2 + $0xd9] sm:$0xff] %v6498_v39  ;;  %v3481_v1 = vld [vmem:[#allocation2 + $0xc0] sm:$0xff] }
 0x320   : > { %v3606_v27 = vmax.f32 %v3574_v11, %v6445_v50  ;;  %v3575_v33 = vmax.f32 %v3543_v52, %v3559_v46  ;;  %v6505_v56 = vadd.f32 %v6349_v37, %v3334_v47  ;;  %v3762_v25 = vld [vmem:[#allocation2] ss:$2 sm:$0xff]  ;;  %v4854_v7 = vpop.eup %4853  ;;  %v3337_v57 = vmul.f32 %v6343_v4, %v3298_v8  ;;  %v3175_v26 = vpop.xlane.xlu1 %3174 }
 0x321   : > { %v3670_v14 = vmax.f32 %v3637_v54, %v3479_v15  ;;  %3749 = vst [vmem:[#allocation2 + $0x20] sm:$0xff] %v3733_v18  ;;  %4859 = vrsqrt.f32 %v3238_v22  ;;  %v3204_v58 = vmul.f32 0.0078125, %v3165_v55  ;;  %3777 = vst [vmem:[%s6510_s7] sm:$0xff] %v3762_v25  ;;  %v3528_v50 = vld [vmem:[#allocation2 + $0x9a] sm:$0xff]  ;;  %v3293_v61 = vmul.f32 %v4854_v7, %v6277_v32  ;;  %v3529_v20 = vld [vmem:[#allocation2 + $0xc2] sm:$0xff] }
 0x322   : > { %v3638_v15 = vmax.f32 %v3606_v27, %v3622_v17  ;;  %3460 = vst [vmem:[#allocation2 + $0xf9] sm:$0xff] %v6505_v56  ;;  %v3544_v16 = vmax.f32 %v3512_v48, %v3528_v50  ;;  %v6516_v62 = vadd.f32 %v6349_v37, %v3337_v57  ;;  %v3233_v49 = vadd.f32 1e-06, %v3201_v5  ;;  %v3177_v40 = vpop.xlane.xlu0 %3176 }
 0x323   : > { %v3702_v2 = vmax.f32 %v3670_v14, %v6402_v24  ;;  %v3513_v6 = vmax.f32 %v3481_v1, %v6434_v23  ;;  %v3607_v3 = vmax.f32 %v3575_v33, %v6454_v38  ;;  %v3332_v48 = vmul.f32 %v6343_v4, %v3293_v61  ;;  %v3482_v38 = vld [vmem:[#allocation2 + $0xc8] sm:$0xff] }
 0x324   : > { %v3671_v55 = vmax.f32 %v3638_v15, %v6459_v13  ;;  %3463 = vst [vmem:[#allocation2 + $0x121] sm:$0xff] %v6516_v62  ;;  %4861 = vrsqrt.f32 %v3233_v49  ;;  %v3236_v52 = vadd.f32 1e-06, %v3204_v58  ;;  %v3207_v32 = vmul.f32 0.0078125, %v6469_v36  ;;  %v3179_v5 = vpop.xlane.xlu1 %3178  ;;  %v3530_v49 = vld [vmem:[#allocation2 + $0xca] sm:$0xff] }
 0x325   : > { %v3734_v0 = vmax.f32 %v3702_v2, %v6472_v21  ;;  %v3560_v28 = vld [vmem:[#allocation2 + $0xb0] sm:$0xff]  ;;  %v3208_v21 = vmul.f32 0.0078125, %v3173_v41  ;;  %v3371_v11 = vadd.f32 %v6349_v37, %v3332_v48  ;;  %v3205_v47 = vmul.f32 0.0078125, %v3167_v42 }
 0x326   : > { %v3623_v24 = vld [vmem:[#allocation2 + $0xaa] sm:$0xff]  ;;  %v3703_v44 = vmax.f32 %v3671_v55, %v6423_v60  ;;  %v3576_v13 = vmax.f32 %v3544_v16, %v3560_v28  ;;  %4863 = vrsqrt.f32 %v3236_v52  ;;  %v3239_v54 = vadd.f32 1e-06, %v3207_v32  ;;  %v3561_v27 = vld [vmem:[#allocation2 + $0xd8] sm:$0xff] }
 0x327   : > { %3750 = vst [vmem:[#allocation2 + $0x30] sm:$0xff] %v3734_v0  ;;  %v3639_v59 = vmax.f32 %v3607_v3, %v3623_v24  ;;  %v4856_v18 = vpop.eup %4855  ;;  %v3545_v8 = vmax.f32 %v3513_v6, %v3529_v20  ;;  %v3624_v14 = vld [vmem:[#allocation2 + $0xb2] sm:$0xff]  ;;  %3458 = vst [vmem:[#allocation2 + $0xe1] sm:$0xff] %v3371_v11  ;;  %v3240_v41 = vadd.f32 1e-06, %v3208_v21  ;;  %v3210_v25 = vmul.f32 0.0078125, %v3177_v40 }
 0x328   : > { %v3735_v46 = vmax.f32 %v3703_v44, %v3528_v50  ;;  %v3608_v36 = vmax.f32 %v3576_v13, %v6490_v43  ;;  %v3764_v60 = vld [vmem:[#allocation2 + $0x18] ss:$2 sm:$0xff]  ;;  %v3296_v33 = vmul.f32 %v4856_v18, %v6282_v63  ;;  %4865 = vrsqrt.f32 %v3239_v54 }
 0x329   : > { %v3672_v22 = vmax.f32 %v3639_v59, %v3481_v1  ;;  %3778 = vst [vmem:[%s6510_s7 + $0x8] sm:$0xff] %v3764_v60  ;;  %v3514_v7 = vmax.f32 %v3482_v38, %v6463_v45  ;;  %v3577_v57 = vmax.f32 %v3545_v8, %v3561_v27  ;;  %4867 = vrsqrt.f32 %v3240_v41  ;;  %v3483_v59 = vld [vmem:[#allocation2 + $0xf0] sm:$0xff]  ;;  %v3484_v27 = vld [vmem:[#allocation2 + $0xf8] sm:$0xff] }
 0x32a   : > { %3751 = vst [vmem:[#allocation2 + $0x38] sm:$0xff] %v3735_v46  ;;  %v3640_v42 = vmax.f32 %v3608_v36, %v3624_v14  ;;  %v3335_v43 = vmul.f32 %v6343_v4, %v3296_v33  ;;  %v3237_v1 = vadd.f32 1e-06, %v3205_v47  ;;  %v3242_v63 = vadd.f32 1e-06, %v3210_v25  ;;  %v3531_v60 = vld [vmem:[#allocation2 + $0xf2] sm:$0xff] }
 0x32b   : > { %v3704_v17 = vmax.f32 %v3672_v22, %v6434_v23  ;;  %v3209_v6 = vmul.f32 0.0078125, %v3175_v26  ;;  %v3211_v55 = vmul.f32 0.0078125, %v3179_v5  ;;  %v3546_v0 = vmax.f32 %v3514_v7, %v3530_v49  ;;  %v3532_v5 = vld [vmem:[#allocation2 + $0xfa] sm:$0xff] }
 0x32c   : > { %v4858_v58 = vpop.eup %4857  ;;  %v3673_v50 = vmax.f32 %v3640_v42, %v3482_v38  ;;  %v6535_v2 = vadd.f32 %v6349_v37, %v3335_v43  ;;  %4869 = vrsqrt.f32 %v3237_v1  ;;  %v3609_v3 = vmax.f32 %v3577_v57, %v6498_v39 }
 0x32d   : > { %v3736_v15 = vmax.f32 %v3704_v17, %v3529_v20  ;;  %v3299_v16 = vmul.f32 %v4858_v58, %v6287_v51  ;;  %4871 = vrsqrt.f32 %v3242_v63  ;;  %v3241_v52 = vadd.f32 1e-06, %v3209_v6  ;;  %v3485_v6 = vld [vmem:[#allocation2 + $0x120] sm:$0xff] }
 0x32e   : > { %v4860_v61 = vpop.eup %4859  ;;  %v3705_v23 = vmax.f32 %v3673_v50, %v6463_v45  ;;  %3461 = vst [vmem:[#allocation2 + $0x109] sm:$0xff] %v6535_v2  ;;  %v3562_v24 = vld [vmem:[#allocation2 + $0xe0] sm:$0xff]  ;;  %v3243_v21 = vadd.f32 1e-06, %v3211_v55  ;;  %v3515_v14 = vmax.f32 %v3483_v59, %v6476_v19  ;;  %v3516_v63 = vmax.f32 %v3484_v27, %v6505_v56 }
 0x32f   : > { %3752 = vst [vmem:[#allocation2 + $0x48] sm:$0xff] %v3736_v15  ;;  %v3338_v20 = vmul.f32 %v6343_v4, %v3299_v16  ;;  %v3302_v28 = vmul.f32 %v4860_v61, %v6292_v9  ;;  %v3625_v48 = vld [vmem:[#allocation2 + $0xda] sm:$0xff]  ;;  %v3578_v32 = vmax.f32 %v3546_v0, %v3562_v24  ;;  %4873 = vrsqrt.f32 %v3241_v52  ;;  %v3626_v18 = vld [vmem:[#allocation2 + $0xe2] sm:$0xff] }
 0x330   : > { %v3737_v51 = vmax.f32 %v3705_v23, %v3530_v49  ;;  %v3641_v45 = vmax.f32 %v3609_v3, %v3625_v48  ;;  %4875 = vrsqrt.f32 %v3243_v21  ;;  %v3547_v57 = vmax.f32 %v3515_v14, %v3531_v60 }
 0x331   : > { %v6544_v44 = vadd.f32 %v6349_v37, %v3338_v20  ;;  %v3341_v26 = vmul.f32 %v6343_v4, %v3302_v28  ;;  %v3766_v13 = vld [vmem:[#allocation2 + $0x30] ss:$2 sm:$0xff]  ;;  %v4862_v39 = vpop.eup %4861  ;;  %v3610_v40 = vmax.f32 %v3578_v32, %v3371_v11  ;;  %v3548_v20 = vmax.f32 %v3516_v63, %v3532_v5 }
 0x332   : > { %3753 = vst [vmem:[#allocation2 + $0x50] sm:$0xff] %v3737_v51  ;;  %3779 = vst [vmem:[%s6510_s7 + $0x10] sm:$0xff] %v3766_v13  ;;  %v3674_v9 = vmax.f32 %v3641_v45, %v3483_v59  ;;  %v3297_v54 = vmul.f32 %v4862_v39, %v6297_v12 }
 0x333   : > { %3464 = vst [vmem:[#allocation2 + $0x129] sm:$0xff] %v6544_v44  ;;  %v6550_v38 = vadd.f32 %v6349_v37, %v3341_v26  ;;  %v4864_v47 = vpop.eup %4863  ;;  %v3642_v46 = vmax.f32 %v3610_v40, %v3626_v18 }
 0x334   : > { %v3706_v8 = vmax.f32 %v3674_v9, %v6476_v19  ;;  %v3336_v36 = vmul.f32 %v6343_v4, %v3297_v54  ;;  %v3300_v11 = vmul.f32 %v4864_v47, %v6302_v30 }
 0x335   : > { %3467 = vst [vmem:[#allocation2 + $0x151] sm:$0xff] %v6550_v38  ;;  %v4866_v22 = vpop.eup %4865  ;;  %v3675_v33 = vmax.f32 %v3642_v46, %v3484_v27  ;;  %v3563_v7 = vld [vmem:[#allocation2 + $0x108] sm:$0xff] }
 0x336   : > { %v3738_v41 = vmax.f32 %v3706_v8, %v3531_v60  ;;  %v3375_v12 = vadd.f32 %v6349_v37, %v3336_v36  ;;  %v4868_v25 = vpop.eup %4867  ;;  %v3339_v42 = vmul.f32 %v6343_v4, %v3300_v11  ;;  %v3303_v17 = vmul.f32 %v4866_v22, %v6307_v35 }
 0x337   : > { %v3707_v43 = vmax.f32 %v3675_v33, %v6505_v56  ;;  %v3304_v30 = vmul.f32 %v4868_v25, %v6317_v10  ;;  %v3579_v35 = vmax.f32 %v3547_v57, %v3563_v7 }
 0x338   : > { %3754 = vst [vmem:[#allocation2 + $0x60] sm:$0xff] %v3738_v41  ;;  %3462 = vst [vmem:[#allocation2 + $0x111] sm:$0xff] %v3375_v12  ;;  %v3378_v58 = vadd.f32 %v6349_v37, %v3339_v42  ;;  %v3342_v50 = vmul.f32 %v6343_v4, %v3303_v17 }
 0x339   : > { %v3768_v1 = vld [vmem:[#allocation2 + $0x48] ss:$2 sm:$0xff]  ;;  %v4870_v19 = vpop.eup %4869  ;;  %v3739_v16 = vmax.f32 %v3707_v43, %v3532_v5  ;;  %v3343_v61 = vmul.f32 %v6343_v4, %v3304_v30  ;;  %v3611_v28 = vmax.f32 %v3579_v35, %v6535_v2 }
 0x33a   : > { %3780 = vst [vmem:[%s6510_s7 + $0x18] sm:$0xff] %v3768_v1  ;;  %v4872_v15 = vpop.eup %4871  ;;  %3465 = vst [vmem:[#allocation2 + $0x139] sm:$0xff] %v3378_v58  ;;  %v6569_v49 = vadd.f32 %v6349_v37, %v3342_v50  ;;  %v3301_v10 = vmul.f32 %v4870_v19, %v6314_v53  ;;  %v3533_v51 = vld [vmem:[#allocation2 + $0x122] sm:$0xff]  ;;  %v3517_v53 = vmax.f32 %v3485_v6, %v6516_v62  ;;  %v3534_v25 = vld [vmem:[#allocation2 + $0x12a] sm:$0xff] }
 0x33b   : > { %v3306_v23 = vmul.f32 %v4872_v15, %v6327_v34  ;;  %3755 = vst [vmem:[#allocation2 + $0x68] sm:$0xff] %v3739_v16  ;;  %v3382_v55 = vadd.f32 %v6349_v37, %v3343_v61  ;;  %v3486_v24 = vld [vmem:[#allocation2 + $0x128] sm:$0xff] }
 0x33c   : > { %3468 = vst [vmem:[#allocation2 + $0x159] sm:$0xff] %v6569_v49  ;;  %v3340_v56 = vmul.f32 %v6343_v4, %v3301_v10  ;;  %v4874_v3 = vpop.eup %4873  ;;  %v3487_v13 = vld [vmem:[#allocation2 + $0x150] sm:$0xff]  ;;  %v3549_v21 = vmax.f32 %v3517_v53, %v3533_v51  ;;  %v3518_v9 = vmax.f32 %v3486_v24, %v6544_v44 }
 0x33d   : > { %v3345_v0 = vmul.f32 %v6343_v4, %v3306_v23  ;;  %3469 = vst [vmem:[#allocation2 + $0x169] sm:$0xff] %v3382_v55  ;;  %v3305_v45 = vmul.f32 %v4874_v3, %v6324_v31  ;;  %v4876_v26 = vpop.eup %4875  ;;  %v3519_v31 = vmax.f32 %v3487_v13, %v6550_v38 }
 0x33e   : > { %v3379_v52 = vadd.f32 %v6349_v37, %v3340_v56  ;;  %v3307_v40 = vmul.f32 %v4876_v26, %v6334_v29  ;;  %v3550_v17 = vmax.f32 %v3518_v9, %v3534_v25 }
 0x33f   : > { %v3564_v34 = vld [vmem:[#allocation2 + $0x110] sm:$0xff]  ;;  %v6581_v32 = vadd.f32 %v6349_v37, %v3345_v0  ;;  %v3344_v2 = vmul.f32 %v6343_v4, %v3305_v45 }
 0x340   : > { %v3627_v48 = vld [vmem:[#allocation2 + $0x10a] sm:$0xff]  ;;  %v3580_v39 = vmax.f32 %v3548_v20, %v3564_v34  ;;  %3466 = vst [vmem:[#allocation2 + $0x141] sm:$0xff] %v3379_v52  ;;  %v3628_v46 = vld [vmem:[#allocation2 + $0x112] sm:$0xff]  ;;  %v3346_v11 = vmul.f32 %v6343_v4, %v3307_v40 }
 0x341   : > { %v3643_v59 = vmax.f32 %v3611_v28, %v3627_v48  ;;  %3471 = vst [vmem:[#allocation2 + $0x181] sm:$0xff] %v6581_v32  ;;  %v3565_v18 = vld [vmem:[#allocation2 + $0x138] sm:$0xff]  ;;  %v3383_v36 = vadd.f32 %v6349_v37, %v3344_v2 }
 0x342   : > { %v3612_v54 = vmax.f32 %v3580_v39, %v3375_v12  ;;  %v3581_v8 = vmax.f32 %v3549_v21, %v3565_v18  ;;  %v3770_v22 = vld [vmem:[#allocation2 + $0x60] ss:$2 sm:$0xff]  ;;  %v3385_v12 = vadd.f32 %v6349_v37, %v3346_v11 }
 0x343   : > { %v3676_v47 = vmax.f32 %v3643_v59, %v3485_v6  ;;  %v3488_v14 = vld [vmem:[#allocation2 + $0x158] sm:$0xff]  ;;  %3781 = vst [vmem:[%s6510_s7 + $0x20] sm:$0xff] %v3770_v22  ;;  %3470 = vst [vmem:[#allocation2 + $0x171] sm:$0xff] %v3383_v36 }
 0x344   : > { %v3644_v27 = vmax.f32 %v3612_v54, %v3628_v46  ;;  %v3535_v33 = vld [vmem:[#allocation2 + $0x152] sm:$0xff]  ;;  %v3567_v41 = vld [vmem:[#allocation2 + $0x168] sm:$0xff]  ;;  %v3613_v57 = vmax.f32 %v3581_v8, %v3378_v58  ;;  %v3520_v43 = vmax.f32 %v3488_v14, %v6569_v49  ;;  %3472 = vst [vmem:[#allocation2 + $0x189] sm:$0xff] %v3385_v12  ;;  %v3536_v15 = vld [vmem:[#allocation2 + $0x15a] sm:$0xff] }
 0x345   : > { %v3708_v60 = vmax.f32 %v3676_v47, %v6516_v62  ;;  %v3551_v29 = vmax.f32 %v3519_v31, %v3535_v33 }
 0x346   : > { %v3677_v7 = vmax.f32 %v3644_v27, %v3486_v24  ;;  %v3552_v63 = vmax.f32 %v3520_v43, %v3536_v15 }
 0x347   : > { %v3740_v42 = vmax.f32 %v3708_v60, %v3533_v51  ;;  %v3583_v4 = vmax.f32 %v3551_v29, %v3567_v41  ;;  %v3566_v62 = vld [vmem:[#allocation2 + $0x140] sm:$0xff] }
 0x348   : > { %v3709_v30 = vmax.f32 %v3677_v7, %v6544_v44  ;;  %v3629_v1 = vld [vmem:[#allocation2 + $0x13a] sm:$0xff]  ;;  %v3582_v19 = vmax.f32 %v3550_v17, %v3566_v62  ;;  %v3630_v61 = vld [vmem:[#allocation2 + $0x142] sm:$0xff] }
 0x349   : > { %3756 = vst [vmem:[#allocation2 + $0x78] sm:$0xff] %v3740_v42  ;;  %v3645_v5 = vmax.f32 %v3613_v57, %v3629_v1  ;;  %v3615_v37 = vmax.f32 %v3583_v4, %v3382_v55  ;;  %v3664_v0 = vld [vmem:[#allocation2 + $0x180] sm:$0xff] }
 0x34a   : > { %v3741_v50 = vmax.f32 %v3709_v30, %v3534_v25  ;;  %v3614_v16 = vmax.f32 %v3582_v19, %v3379_v52  ;;  %v3568_v58 = vld [vmem:[#allocation2 + $0x170] sm:$0xff] }
 0x34b   : > { %v3678_v35 = vmax.f32 %v3645_v5, %v3487_v13  ;;  %v3631_v10 = vld [vmem:[#allocation2 + $0x16a] sm:$0xff]  ;;  %v3584_v56 = vmax.f32 %v3552_v63, %v3568_v58  ;;  %v3632_v53 = vld [vmem:[#allocation2 + $0x172] sm:$0xff] }
 0x34c   : > { %3757 = vst [vmem:[#allocation2 + $0x80] sm:$0xff] %v3741_v50  ;;  %v3646_v23 = vmax.f32 %v3614_v16, %v3630_v61  ;;  %v3647_v44 = vmax.f32 %v3615_v37, %v3631_v10  ;;  %v3665_v48 = vld [vmem:[#allocation2 + $0x188] sm:$0xff] }
 0x34d   : > { %v3710_v6 = vmax.f32 %v3678_v35, %v6550_v38  ;;  %v3616_v28 = vmax.f32 %v3584_v56, %v3383_v36  ;;  %v3728_v38 = vld [vmem:[#allocation2 + $0x182] sm:$0xff] }
 0x34e   : > { %v3679_v3 = vmax.f32 %v3646_v23, %v3488_v14  ;;  %v3680_v51 = vmax.f32 %v3647_v44, %v3664_v0 }
 0x34f   : > { %v3742_v20 = vmax.f32 %v3710_v6, %v3535_v33  ;;  %v3648_v24 = vmax.f32 %v3616_v28, %v3632_v53 }
 0x350   : > { %v3711_v55 = vmax.f32 %v3679_v3, %v6569_v49  ;;  %v3712_v34 = vmax.f32 %v3680_v51, %v6581_v32  ;;  %v3729_v49 = vld [vmem:[#allocation2 + $0x18a] sm:$0xff] }
 0x351   : > { %3758 = vst [vmem:[#allocation2 + $0x90] sm:$0xff] %v3742_v20  ;;  %v3681_v45 = vmax.f32 %v3648_v24, %v3665_v48 }
 0x352   : > { %v3743_v52 = vmax.f32 %v3711_v55, %v3536_v15  ;;  %v3744_v26 = vmax.f32 %v3712_v34, %v3728_v38 }
 0x353   : > { %v3772_v13 = vld [vmem:[#allocation2 + $0x78] ss:$2 sm:$0xff]  ;;  %v3713_v39 = vmax.f32 %v3681_v45, %v3385_v12 }
 0x354   : > { %3782 = vst [vmem:[%s6510_s7 + $0x28] sm:$0xff] %v3772_v13  ;;  %3759 = vst [vmem:[#allocation2 + $0x98] sm:$0xff] %v3743_v52 }
 0x355   : > { %3760 = vst [vmem:[#allocation2 + $0xa8] sm:$0xff] %v3744_v26  ;;  %v3745_v59 = vmax.f32 %v3713_v39, %v3729_v49 }
 0x357   : > { %3761 = vst [vmem:[#allocation2 + $0xb0] sm:$0xff] %v3745_v59 }
 0x35b   : > { %v3774_v32 = vld [vmem:[#allocation2 + $0x90] ss:$2 sm:$0xff] }
 0x35c   : > { %3783 = vst [vmem:[%s6510_s7 + $0x30] sm:$0xff] %v3774_v32 }
 0x35e   : > { %v3776_v21 = vld [vmem:[#allocation2 + $0xa8] ss:$2 sm:$0xff] }
 0x35f   : > { %3784 = vst [vmem:[%s6510_s7 + $0x38] sm:$0xff] %v3776_v21 }
 0x360   : > { %4890 = shalt.err (!%p4887_p3)
}
 0x361   : > { %s4891_s16 = scalar_lea.hbm %s6606_s12, 1024  ;;  %s4895_s26 = scalar_lea.hbm %s6658_s5, 2048 }
 0x362   : > { %p4892_p4 = scmp.ne.s32.totalorder %s6606_s12, %s4891_s16  ;;  %p4896_p9 = scmp.lt.s32.totalorder %s6606_s12, %s6658_s5 }
 0x363   : > { %p4897_p10 = scmp.lt.s32.totalorder %s4895_s26, %s4891_s16 }
 0x364   : > { %p4893_p7 = pnand %p4892_p4, %p5011_p5 }
 0x365   : > { %p4898_p11 = por %p4897_p10, %p4896_p9 }
 0x366   : > { %p4894_p8 = pneg %p4893_p7 }
 0x368   : > { %p4899_p12 = pnand %p4898_p11, %p4894_p8 }
 0x36a   : > { %4902 = shalt.err (!%p4899_p12)
}
 0x36b   : > { %s4941_s7 = smov 128   ;;  %s4942_s8 = smov 8  }
 0x36c   : > { %4753 = dma.vmem_to_hbm [thread:$0]  (%p5011_p5), %s6608_s9, 1024, %s6606_s12, %s6613_s13, %s4941_s7, %s4941_s7, %s4942_s8  }
 0x36d PF: > { %p4759_p13 = scmp.ge.s32.totalorder %s4937_s21, 2  ;;  %s3814_s10 = sand.u32 1, %s4925_s18  }
 0x36e   : > { %s3815_s11 = scalar_lea.sflag [#allocation4], %s3814_s10 }
 0x36f   : > { %p4756_p0 = pnand %p4759_p13, %p5015_p6 }
 0x371   : > { %p4757_p1 = pneg %p4756_p0 }
 0x373   : > { %4920 = dma.done.wait (%p4757_p1), %s3815_s11, 1024  }
 0x374   : > { %4922 = vsyncadd (%p4757_p1), %s3815_s11, 4294966272  ;;  %p15_p2 = scmp.ge.s32.totalorder %s4998_s24, 4   ;;  %s6711_s18 = smov %s4929_s19 }
 0x375   : > { %s6712_s19 = smov %s4933_s20  ;;  %s6713_s20 = smov %s5009_s27 }
 0x376   : > { %s6714_s21 = smov %s4998_s24  ;;  %17 = sbr.rel (!%p15_p2) target bundleno = 3 (0x3), region = 94 }
 0x37b   :  { %3820 = vsyncpa [#allocation4], 1 }
 0x37c   :  { %3822 = vsyncpa [#allocation4 + $0x1], 1 }

</bundles_post_ra>
